<compile_context>
chip_gen: v7x
topology: tpu7x:2x2x1
jax: 0.10.0
libtpu: 0.0.40
codegen_flags: <defaults>
</compile_context>

<pallas_src>
import jax
import jax.numpy as jnp
import numpy as np
from jax.experimental import pallas as pl
from jax.experimental.pallas import tpu as pltpu

NH = 4  # number of heading bins -> fc3 out = 3 + 3 + 2*NH = 14


# ----------------------------------------------------------------------------
# Kernel 1: conv1..conv4 (pointwise) + MaxPool1d(num_seg_points), fully fused.
# ----------------------------------------------------------------------------
def _conv_pool_kernel(x_ref, w1, b1, w2, b2, w3, b3, w4, b4, gf_ref, acc_ref):
    j = pl.program_id(1)  # point-tile index within this batch element

    @pl.when(j == 0)
    def _init():
        acc_ref[...] = jnp.full_like(acc_ref, -jnp.inf)

    h = x_ref[...]                                                      # (tile_n, 3)
    h = jnp.maximum(jnp.dot(h, w1[...], preferred_element_type=jnp.float32) + b1[...], 0.0)
    h = jnp.maximum(jnp.dot(h, w2[...], preferred_element_type=jnp.float32) + b2[...], 0.0)
    h = jnp.maximum(jnp.dot(h, w3[...], preferred_element_type=jnp.float32) + b3[...], 0.0)
    h = jnp.maximum(jnp.dot(h, w4[...], preferred_element_type=jnp.float32) + b4[...], 0.0)

    # Running max over the pooled window (all points of this batch element).
    acc_ref[...] = jnp.maximum(acc_ref[...], jnp.max(h, axis=0, keepdims=True))

    @pl.when(j == pl.num_programs(1) - 1)
    def _finalize():
        gf_ref[...] = acc_ref[...].reshape(gf_ref.shape)


# ----------------------------------------------------------------------------
# Kernel 2: fc1 -> relu -> fc2 -> relu -> fc3, fused (operates on (B, 512)).
# ----------------------------------------------------------------------------
def _fc_head_kernel(gf_ref, w1, b1, w2, b2, w3, b3, out_ref):
    h = gf_ref[...]                                                     # (B, 512)
    h = jnp.maximum(jnp.dot(h, w1[...], preferred_element_type=jnp.float32) + b1[...], 0.0)
    h = jnp.maximum(jnp.dot(h, w2[...], preferred_element_type=jnp.float32) + b2[...], 0.0)
    y = jnp.dot(h, w3[...], preferred_element_type=jnp.float32) + b3[...]
    out_ref[...] = y.astype(out_ref.dtype)


# ----------------------------------------------------------------------------
# Forward pass (mirrors BboxNet.forward)
# ----------------------------------------------------------------------------
def bboxnet_forward(x, params, tile_n=512):
    """x: (B, 3, N) in the PyTorch NCL convention.  Returns (B, 3+3+2*NH)."""
    B, cin, N = x.shape
    assert cin == 3
    if N <= tile_n:
        tile_n = N
    assert N % tile_n == 0 and tile_n % 8 == 0
    NT = N // tile_n

    # channels-last, points flattened to rows
    x_flat = jnp.transpose(x, (0, 2, 1)).reshape(B * N, cin)

    (w1, b1) = params["conv1"]
    (w2, b2) = params["conv2"]
    (w3, b3) = params["conv3"]
    (w4, b4) = params["conv4"]

    def _full(w):  # whole-array block, resident across the grid
        return pl.BlockSpec(w.shape, lambda b, j: (0,) * w.ndim)

    gf = pl.pallas_call(
        _conv_pool_kernel,
        out_shape=jax.ShapeDtypeStruct((B, 1, 512), jnp.float32),
        grid=(B, NT),
        in_specs=[
            pl.BlockSpec((tile_n, cin), lambda b, j: (b * NT + j, 0)),
            _full(w1), _full(b1), _full(w2), _full(b2),
            _full(w3), _full(b3), _full(w4), _full(b4),
        ],
        out_specs=pl.BlockSpec((1, 1, 512), lambda b, j: (b, 0, 0)),
        scratch_shapes=[pltpu.VMEM((1, 512), jnp.float32)],
        compiler_params=pltpu.CompilerParams(
            dimension_semantics=("parallel", "arbitrary"),
            vmem_limit_bytes=32 << 20,
        ),
    )(x_flat, w1, b1, w2, b2, w3, b3, w4, b4)
    gf = gf.reshape(B, 512)

    (fw1, fb1) = params["fc1"]
    (fw2, fb2) = params["fc2"]
    (fw3, fb3) = params["fc3"]
    cout = fw3.shape[1]

    out = pl.pallas_call(
        _fc_head_kernel,
        out_shape=jax.ShapeDtypeStruct((B, cout), jnp.float32),
        grid=(1,),
        in_specs=[
            pl.BlockSpec((B, 512), lambda i: (0, 0)),
            pl.BlockSpec(fw1.shape, lambda i: (0, 0)),
            pl.BlockSpec(fb1.shape, lambda i: (0, 0)),
            pl.BlockSpec(fw2.shape, lambda i: (0, 0)),
            pl.BlockSpec(fb2.shape, lambda i: (0, 0)),
            pl.BlockSpec(fw3.shape, lambda i: (0, 0)),
            pl.BlockSpec(fb3.shape, lambda i: (0, 0)),
        ],
        out_specs=pl.BlockSpec((B, cout), lambda i: (0, 0)),
        compiler_params=pltpu.CompilerParams(vmem_limit_bytes=32 << 20),
    )(gf, fw1, fb1, fw2, fb2, fw3, fb3)
    return out


# ----------------------------------------------------------------------------
# Parameters (deterministic synthetic init; Conv1d(k=1)/Linear weight stored
# as (Cin, Cout), bias as (1, Cout)).
# ----------------------------------------------------------------------------
_LAYER_SPECS = {
    "conv1": (3, 128), "conv2": (128, 128), "conv3": (128, 256), "conv4": (256, 512),
    "fc1": (512, 512), "fc2": (512, 256), "fc3": (256, 3 + 3 + 2 * NH),
}


def init_params(key):
    params = {}
    for i, (name, (cin, cout)) in enumerate(sorted(_LAYER_SPECS.items())):
        kw, kb = jax.random.split(jax.random.fold_in(key, i))
        bound = 1.0 / np.sqrt(cin)
        w = jax.random.uniform(kw, (cin, cout), jnp.float32, -bound, bound)
        b = jax.random.uniform(kb, (1, cout), jnp.float32, -bound, bound)
        params[name] = (w, b)
    return params


# ----------------------------------------------------------------------------
# Pure-JAX reference (independent of the Pallas path)
# ----------------------------------------------------------------------------
def bboxnet_ref(x, params):
    h = jnp.transpose(x, (0, 2, 1))                           # (B, N, 3)
    for name in ("conv1", "conv2", "conv3", "conv4"):
        w, b = params[name]
        h = jnp.maximum(h @ w + b, 0.0)
    gf = jnp.max(h, axis=1)                                   # MaxPool1d(N) -> (B, 512)
    w, b = params["fc1"]
    h = jnp.maximum(gf @ w + b, 0.0)
    w, b = params["fc2"]
    h = jnp.maximum(h @ w + b, 0.0)
    w, b = params["fc3"]
    return h @ w + b


if __name__ == "__main__":
    B = 2
    NUM_SEG_POINTS = 512            # BboxNet default (MaxPool1d window)

    key = jax.random.PRNGKey(0)
    params = init_params(key)
    x = jax.random.normal(jax.random.fold_in(key, 1000),
                          (B, 3, NUM_SEG_POINTS), jnp.float32)

    out = jax.block_until_ready(bboxnet_forward(x, params))
    ref = jax.block_until_ready(bboxnet_ref(x, params))

    assert out.shape == (B, 3 + 3 + 2 * NH)
    assert bool(jnp.all(jnp.isfinite(out)))
    np.testing.assert_allclose(np.asarray(out), np.asarray(ref), atol=5e-2, rtol=5e-2)

    print("KERNEL_OK")
</pallas_src>

<mosaic_0001>
module attributes {stable_mosaic.version = 11 : i64} {
  func.func @_conv_pool_kernel(%arg0: i32, %arg1: i32, %arg2: memref<512x3xf32, #tpu.memory_space<vmem>>, %arg3: memref<3x128xf32, #tpu.memory_space<vmem>>, %arg4: memref<1x128xf32, #tpu.memory_space<vmem>>, %arg5: memref<128x128xf32, #tpu.memory_space<vmem>>, %arg6: memref<1x128xf32, #tpu.memory_space<vmem>>, %arg7: memref<128x256xf32, #tpu.memory_space<vmem>>, %arg8: memref<1x256xf32, #tpu.memory_space<vmem>>, %arg9: memref<256x512xf32, #tpu.memory_space<vmem>>, %arg10: memref<1x512xf32, #tpu.memory_space<vmem>>, %arg11: memref<1x1x512xf32, #tpu.memory_space<vmem>>, %arg12: memref<1x512xf32, #tpu.memory_space<vmem>>) attributes {dimension_semantics = [#tpu.dimension_semantics<parallel>, #tpu.dimension_semantics<arbitrary>], iteration_bounds = array<i64: 2, 1>, scalar_prefetch = 0 : i64, scratch_operands = 1 : i64, tpu.core_type = #tpu.core_type<tc>, window_params = [{transform_indices = @transform_0, window_bounds = array<i64: 512, 3>}, {pipeline_mode = #tpu.pipeline_mode<synchronous>, transform_indices = @transform_1, window_bounds = array<i64: 3, 128>}, {pipeline_mode = #tpu.pipeline_mode<synchronous>, transform_indices = @transform_2, window_bounds = array<i64: 1, 128>}, {pipeline_mode = #tpu.pipeline_mode<synchronous>, transform_indices = @transform_3, window_bounds = array<i64: 128, 128>}, {pipeline_mode = #tpu.pipeline_mode<synchronous>, transform_indices = @transform_4, window_bounds = array<i64: 1, 128>}, {pipeline_mode = #tpu.pipeline_mode<synchronous>, transform_indices = @transform_5, window_bounds = array<i64: 128, 256>}, {pipeline_mode = #tpu.pipeline_mode<synchronous>, transform_indices = @transform_6, window_bounds = array<i64: 1, 256>}, {pipeline_mode = #tpu.pipeline_mode<synchronous>, transform_indices = @transform_7, window_bounds = array<i64: 256, 512>}, {pipeline_mode = #tpu.pipeline_mode<synchronous>, transform_indices = @transform_8, window_bounds = array<i64: 1, 512>}, {transform_indices = @transform_9, window_bounds = array<i64: 1, 1, 512>}]} {
    %c0_i32 = arith.constant 0 : i32
    %0 = arith.cmpi eq, %arg1, %c0_i32 : i32
    %1 = arith.extui %0 : i1 to i32
    %c0_i32_0 = arith.constant 0 : i32
    %2 = arith.cmpi ne, %1, %c0_i32_0 : i32
    scf.if %2 {
      %cst_32 = arith.constant 0xFF800000 : f32
      %40 = vector.broadcast %cst_32 : f32 to vector<1x512xf32>
      %c0_33 = arith.constant 0 : index
      %c0_34 = arith.constant 0 : index
      %41 = vector.load %arg12[%c0_33, %c0_34] : memref<1x512xf32, #tpu.memory_space<vmem>>, vector<1x512xf32>
      tpu.vector_store %arg12[%c0_33, %c0_34], %40 {strides = array<i32>} : memref<1x512xf32, #tpu.memory_space<vmem>>, vector<1x512xf32>,
    } else {
    }
    %c0 = arith.constant 0 : index
    %c0_1 = arith.constant 0 : index
    %3 = vector.load %arg2[%c0, %c0_1] : memref<512x3xf32, #tpu.memory_space<vmem>>, vector<512x3xf32>
    %c0_2 = arith.constant 0 : index
    %c0_3 = arith.constant 0 : index
    %4 = vector.load %arg3[%c0_2, %c0_3] : memref<3x128xf32, #tpu.memory_space<vmem>>, vector<3x128xf32>
    %cst = arith.constant dense<0.000000e+00> : vector<512x128xf32>
    %5 = tpu.matmul %3, %4, %cst {dimension_numbers = #tpu.dot_dimension_numbers<[1], [0], [0], [1], [0, 0, 1, 1], [], []>} : vector<512x3xf32>, vector<3x128xf32>, vector<512x128xf32> -> vector<512x128xf32>
    %c0_4 = arith.constant 0 : index
    %c0_5 = arith.constant 0 : index
    %6 = vector.load %arg4[%c0_4, %c0_5] : memref<1x128xf32, #tpu.memory_space<vmem>>, vector<1x128xf32>
    %7 = vector.broadcast %6 : vector<1x128xf32> to vector<512x128xf32>
    %8 = arith.addf %5, %7 : vector<512x128xf32>
    %cst_6 = arith.constant 0.000000e+00 : f32
    %9 = vector.broadcast %cst_6 : f32 to vector<512x128xf32>
    %10 = arith.maximumf %8, %9 : vector<512x128xf32>
    %c0_7 = arith.constant 0 : index
    %c0_8 = arith.constant 0 : index
    %11 = vector.load %arg5[%c0_7, %c0_8] : memref<128x128xf32, #tpu.memory_space<vmem>>, vector<128x128xf32>
    %cst_9 = arith.constant dense<0.000000e+00> : vector<512x128xf32>
    %12 = tpu.matmul %10, %11, %cst_9 {dimension_numbers = #tpu.dot_dimension_numbers<[1], [0], [0], [1], [0, 0, 1, 1], [], []>} : vector<512x128xf32>, vector<128x128xf32>, vector<512x128xf32> -> vector<512x128xf32>
    %c0_10 = arith.constant 0 : index
    %c0_11 = arith.constant 0 : index
    %13 = vector.load %arg6[%c0_10, %c0_11] : memref<1x128xf32, #tpu.memory_space<vmem>>, vector<1x128xf32>
    %14 = vector.broadcast %13 : vector<1x128xf32> to vector<512x128xf32>
    %15 = arith.addf %12, %14 : vector<512x128xf32>
    %cst_12 = arith.constant 0.000000e+00 : f32
    %16 = vector.broadcast %cst_12 : f32 to vector<512x128xf32>
    %17 = arith.maximumf %15, %16 : vector<512x128xf32>
    %c0_13 = arith.constant 0 : index
    %c0_14 = arith.constant 0 : index
    %18 = vector.load %arg7[%c0_13, %c0_14] : memref<128x256xf32, #tpu.memory_space<vmem>>, vector<128x256xf32>
    %cst_15 = arith.constant dense<0.000000e+00> : vector<512x256xf32>
    %19 = tpu.matmul %17, %18, %cst_15 {dimension_numbers = #tpu.dot_dimension_numbers<[1], [0], [0], [1], [0, 0, 1, 1], [], []>} : vector<512x128xf32>, vector<128x256xf32>, vector<512x256xf32> -> vector<512x256xf32>
    %c0_16 = arith.constant 0 : index
    %c0_17 = arith.constant 0 : index
    %20 = vector.load %arg8[%c0_16, %c0_17] : memref<1x256xf32, #tpu.memory_space<vmem>>, vector<1x256xf32>
    %21 = vector.broadcast %20 : vector<1x256xf32> to vector<512x256xf32>
    %22 = arith.addf %19, %21 : vector<512x256xf32>
    %cst_18 = arith.constant 0.000000e+00 : f32
    %23 = vector.broadcast %cst_18 : f32 to vector<512x256xf32>
    %24 = arith.maximumf %22, %23 : vector<512x256xf32>
    %c0_19 = arith.constant 0 : index
    %c0_20 = arith.constant 0 : index
    %25 = vector.load %arg9[%c0_19, %c0_20] : memref<256x512xf32, #tpu.memory_space<vmem>>, vector<256x512xf32>
    %cst_21 = arith.constant dense<0.000000e+00> : vector<512x512xf32>
    %26 = tpu.matmul %24, %25, %cst_21 {dimension_numbers = #tpu.dot_dimension_numbers<[1], [0], [0], [1], [0, 0, 1, 1], [], []>} : vector<512x256xf32>, vector<256x512xf32>, vector<512x512xf32> -> vector<512x512xf32>
    %c0_22 = arith.constant 0 : index
    %c0_23 = arith.constant 0 : index
    %27 = vector.load %arg10[%c0_22, %c0_23] : memref<1x512xf32, #tpu.memory_space<vmem>>, vector<1x512xf32>
    %28 = vector.broadcast %27 : vector<1x512xf32> to vector<512x512xf32>
    %29 = arith.addf %26, %28 : vector<512x512xf32>
    %cst_24 = arith.constant 0.000000e+00 : f32
    %30 = vector.broadcast %cst_24 : f32 to vector<512x512xf32>
    %31 = arith.maximumf %29, %30 : vector<512x512xf32>
    %c0_25 = arith.constant 0 : index
    %c0_26 = arith.constant 0 : index
    %32 = vector.load %arg12[%c0_25, %c0_26] : memref<1x512xf32, #tpu.memory_space<vmem>>, vector<1x512xf32>
    %cst_27 = arith.constant dense<0xFF800000> : vector<512xf32>
    %33 = vector.multi_reduction <maximumf>, %31, %cst_27 [0] : vector<512x512xf32> to vector<512xf32>
    %34 = vector.shape_cast %33 : vector<512xf32> to vector<1x512xf32>
    %35 = arith.maximumf %32, %34 : vector<1x512xf32>
    %c0_28 = arith.constant 0 : index
    %c0_29 = arith.constant 0 : index
    %36 = vector.load %arg12[%c0_28, %c0_29] : memref<1x512xf32, #tpu.memory_space<vmem>>, vector<1x512xf32>
    tpu.vector_store %arg12[%c0_28, %c0_29], %35 {strides = array<i32>} : memref<1x512xf32, #tpu.memory_space<vmem>>, vector<1x512xf32>,
    %c0_i32_30 = arith.constant 0 : i32
    %37 = arith.cmpi eq, %arg1, %c0_i32_30 : i32
    %38 = arith.extui %37 : i1 to i32
    %c0_i32_31 = arith.constant 0 : i32
    %39 = arith.cmpi ne, %38, %c0_i32_31 : i32
    scf.if %39 {
      %c0_32 = arith.constant 0 : index
      %c0_33 = arith.constant 0 : index
      %40 = vector.load %arg12[%c0_32, %c0_33] : memref<1x512xf32, #tpu.memory_space<vmem>>, vector<1x512xf32>
      %41 = vector.shape_cast %40 : vector<1x512xf32> to vector<1x1x512xf32>
      %c0_34 = arith.constant 0 : index
      %c0_35 = arith.constant 0 : index
      %c0_36 = arith.constant 0 : index
      %42 = vector.load %arg11[%c0_34, %c0_35, %c0_36] : memref<1x1x512xf32, #tpu.memory_space<vmem>>, vector<1x1x512xf32>
      tpu.vector_store %arg11[%c0_34, %c0_35, %c0_36], %41 {strides = array<i32>} : memref<1x1x512xf32, #tpu.memory_space<vmem>>, vector<1x1x512xf32>,
    } else {
    }
    return
  }
  func.func @transform_0(%arg0: i32, %arg1: i32) -> (i32, i32) {
    %c1_i32 = arith.constant 1 : i32
    %0 = arith.muli %arg0, %c1_i32 : i32
    %1 = arith.addi %0, %arg1 : i32
    %c0_i32 = arith.constant 0 : i32
    %c0_i32_0 = arith.constant 0 : i32
    return %1, %c0_i32 : i32, i32
  }
  func.func @transform_1(%arg0: i32, %arg1: i32) -> (i32, i32) {
    %c0_i32 = arith.constant 0 : i32
    %c0_i32_0 = arith.constant 0 : i32
    %c0_i32_1 = arith.constant 0 : i32
    return %c0_i32, %c0_i32_0 : i32, i32
  }
  func.func @transform_2(%arg0: i32, %arg1: i32) -> (i32, i32) {
    %c0_i32 = arith.constant 0 : i32
    %c0_i32_0 = arith.constant 0 : i32
    %c0_i32_1 = arith.constant 0 : i32
    return %c0_i32, %c0_i32_0 : i32, i32
  }
  func.func @transform_3(%arg0: i32, %arg1: i32) -> (i32, i32) {
    %c0_i32 = arith.constant 0 : i32
    %c0_i32_0 = arith.constant 0 : i32
    %c0_i32_1 = arith.constant 0 : i32
    return %c0_i32, %c0_i32_0 : i32, i32
  }
  func.func @transform_4(%arg0: i32, %arg1: i32) -> (i32, i32) {
    %c0_i32 = arith.constant 0 : i32
    %c0_i32_0 = arith.constant 0 : i32
    %c0_i32_1 = arith.constant 0 : i32
    return %c0_i32, %c0_i32_0 : i32, i32
  }
  func.func @transform_5(%arg0: i32, %arg1: i32) -> (i32, i32) {
    %c0_i32 = arith.constant 0 : i32
    %c0_i32_0 = arith.constant 0 : i32
    %c0_i32_1 = arith.constant 0 : i32
    return %c0_i32, %c0_i32_0 : i32, i32
  }
  func.func @transform_6(%arg0: i32, %arg1: i32) -> (i32, i32) {
    %c0_i32 = arith.constant 0 : i32
    %c0_i32_0 = arith.constant 0 : i32
    %c0_i32_1 = arith.constant 0 : i32
    return %c0_i32, %c0_i32_0 : i32, i32
  }
  func.func @transform_7(%arg0: i32, %arg1: i32) -> (i32, i32) {
    %c0_i32 = arith.constant 0 : i32
    %c0_i32_0 = arith.constant 0 : i32
    %c0_i32_1 = arith.constant 0 : i32
    return %c0_i32, %c0_i32_0 : i32, i32
  }
  func.func @transform_8(%arg0: i32, %arg1: i32) -> (i32, i32) {
    %c0_i32 = arith.constant 0 : i32
    %c0_i32_0 = arith.constant 0 : i32
    %c0_i32_1 = arith.constant 0 : i32
    return %c0_i32, %c0_i32_0 : i32, i32
  }
  func.func @transform_9(%arg0: i32, %arg1: i32) -> (i32, i32, i32) {
    %c0_i32 = arith.constant 0 : i32
    %c0_i32_0 = arith.constant 0 : i32
    %c0_i32_1 = arith.constant 0 : i32
    return %arg0, %c0_i32, %c0_i32_0 : i32, i32, i32
  }
}

</mosaic_0001>

<bundles_post_ra>
// kernel: tpu_custom_call.1
= control target key start
LH: loop header
LB: loop body
LE: loop exit
PB: predicated region body
PF: predicated region fallthrough
CT: control target
= control target key end

     0   :  { %14 = vsyncpa [#allocation4], 0  ;;  %s6575_s0 = inlined_call_operand.vmem [shape: f32[1024,3], index: 0, kind: input, shape index: {}]   ;;  %s6576_s1 = inlined_call_operand.vmem [shape: f32[3,128], index: 1, kind: input, shape index: {}]   ;;  %s6577_s2 = inlined_call_operand.vmem [shape: f32[1,128], index: 2, kind: input, shape index: {}]   ;;  %s6578_s3 = inlined_call_operand.hbm [shape: f32[128,128], index: 3, kind: input, shape index: {}]   ;;  %s6579_s4 = inlined_call_operand.vmem [shape: f32[1,128], index: 4, kind: input, shape index: {}]   ;;  %s6580_s5 = inlined_call_operand.hbm [shape: f32[128,256], index: 5, kind: input, shape index: {}]   ;;  %s6581_s6 = inlined_call_operand.vmem [shape: f32[1,256], index: 6, kind: input, shape index: {}]   ;;  %s6582_s7 = inlined_call_operand.vmem [shape: f32[256,512], index: 7, kind: input, shape index: {}]   ;;  %s6583_s8 = inlined_call_operand.vmem [shape: f32[1,512], index: 8, kind: input, shape index: {}]   ;;  %s6584_s9 = inlined_call_operand.hbm [shape: f32[2,1,512], index: 9, kind: output, shape index: {}]  }
   0x1   :  { %15 = vsyncpa [#allocation7], 0 }
   0x2   :  { %16 = vsyncpa [#allocation5], 0 }
   0x3   :  { %18 = vsyncpa [#allocation5 + $0x1], 0  ;;  %s4879_s30 = smov 0   ;;  %s4881_s10 = smov 0  }
   0x4   :  { %s4883_s11 = smov 0   ;;  %s4885_s12 = smov 0  }
   0x5   :  { %s4887_s13 = smov 0   ;;  %s4889_s14 = smov 0  }
   0x6 LB: > { %6593 = sst [smem:[#allocation12_spill]] %s4805_s11  ;;  %s3927_s15 = sadd.s32 4294967295, %s4817_s14   ;;  %s4817_s14 = sphi %s4889_s14, %s24_s14   ;;  %s4813_s13 = sphi %s4887_s13, %s6613_s13   ;;  %s4809_s12 = sphi %s4885_s12, %s6612_s12   ;;  %s4805_s11 = sphi %s4883_s11, %s6611_s11   ;;  %s4801_s10 = sphi %s4881_s10, %s6615_s10   ;;  %s4797_s30 = sphi %s4879_s30, %s6614_s30  }
   0x7   : > { %6594 = sst [smem:[#allocation13_spill]] %s4813_s13  ;;  %s3928_s16 = sadd.s32 4294967294, %s4817_s14  }
   0x8   : > { %s36_s17 = sadd.s32 1, %s4813_s13  ;;  %s239_s18 = sadd.s32 1, %s4805_s11 }
   0x9   : > { %p38_p0 = scmp.ge.s32.totalorder %s36_s17, 2  ;;  %p249_p1 = scmp.ne.s32.totalorder %s4805_s11, %s4801_s10 }
   0xa   : > { %p250_p2 = scmp.eq.s32.totalorder %s3927_s15, 1  ;;  %p255_p3 = scmp.ne.s32.totalorder %s4801_s10, %s4797_s30 }
   0xb   : > { %s6617_s17 = smov (%p38_p0, %s36_s17), 0  ;;  %p256_p5 = scmp.eq.s32.totalorder %s3928_s16, 1 }
   0xc   : > { %6595 = sst [smem:[#allocation14_spill]] %s6617_s17  ;;  %p4919_p4 = por %p250_p2, %p249_p1 }
   0xd   : > { %s236_s20 = ssub.s32 %s4813_s13, %s6617_s17  ;;  %p3929_p6 = scmp.ge.s32.totalorder %s4817_s14, 1 }
   0xe   : > { %s6596_s19 = scalar_select %p4919_p4, 1, 0 }
   0xf   : > { %p237_p7 = scmp.eq.s32.totalorder %s236_s20, 0  ;;  %p4926_p8 = por %p256_p5, %p255_p3 }
  0x10   : > { %p263_p9 = scmp.lt.s32.totalorder %s4817_s14, 3  ;;  %p4938_p11 = scmp.eq.s32.totalorder %s3927_s15, 0 }
  0x11   : > { %s6597_s21 = scalar_select %p4926_p8, 1, 0 }
  0x12   : > { %s4932_s22 = scalar_select %p237_p7, %s4805_s11, %s239_s18  }
  0x13   : > { %6598 = sst [smem:[#allocation15_spill]] %s6597_s21  ;;  %p4934_p10 = pnand %p3929_p6, %p263_p9 }
  0x14   : > { %6599 = sst [smem:[#allocation16_spill]] %s4932_s22  ;;  %s4819_s25 = smov [#allocation3]  }
  0x15   : > { %s6600_s23 = scalar_select %p4934_p10, 1, 0 }
  0x16   : > { %s6601_s24 = scalar_select %p4938_p11, 1, 0 }
  0x17   : > { %p4601_p12 = pneg %p4934_p10  ;;  %s281_s26 = sshll.u32 %s4819_s25, 4  ;;  %s282_s26 = int_to_ptr.vmem [resolvable:$true] %s281_s26 }
  0x18   : > { %s4820_s28 = smov [#allocation6]   ;;  %s4675_s18 = scalar_lea.hbm %s6578_s3, 2048 }
  0x19   : > { %p4946_p13 = pnand %p4938_p11, %p4601_p12  ;;  %s297_s29 = sshll.u32 %s4820_s28, 4  ;;  %s4950_s29 = int_to_ptr.vmem [resolvable:$true] %s297_s29 }
  0x1a   : > { %p4676_p0 = scmp.ne.s32.totalorder %s6578_s3, %s4675_s18  ;;  %p4682_p5 = scmp.lt.u32.totalorder %s4675_s18, %s6578_s3 }
  0x1b   : > { %p4677_p1 = pneg %p4946_p13 }
  0x1d   : > { %p4678_p2 = pnand %p4677_p1, %p4676_p0 }
  0x1f   : > { %p4679_p3 = pneg %p4678_p2 }
  0x21   : > { %p4684_p6 = pnand %p4682_p5, %p4679_p3 }
  0x23   : > { %4687 = shalt.err (!%p4684_p6)
}
  0x24   : > { %s4688_s28 = scalar_lea.vmem %s282_s26, 2048  ;;  %p4696_p8 = scmp.lt.s32.totalorder %s282_s26, %s282_s26 }
  0x25   : > { %p4689_p7 = scmp.ne.s32.totalorder %s282_s26, %s4688_s28  ;;  %p4697_p4 = scmp.lt.s32.totalorder %s4688_s28, %s4688_s28 }
  0x27   : > { %p4691_p9 = pnand %p4689_p7, %p4677_p1  ;;  %p4698_p11 = por %p4697_p4, %p4696_p8 }
  0x29   : > { %p4692_p12 = pneg %p4691_p9 }
  0x2b   : > { %p4699_p10 = pnand %p4698_p11, %p4692_p12 }
  0x2d   : > { %4702 = shalt.err (!%p4699_p10)
}
  0x2e   : > { %s4821_s17 = smov 128   ;;  %s4822_s15 = smov 8  }
  0x2f   : > { %4604 = dma.hbm_to_vmem [thread:$0]  (!%p4946_p13), %s6578_s3, 2048, %s282_s26, [#allocation4], %s4821_s17, %s4821_s17, %s4822_s15  }
  0x30   : > { %s4703_s25 = scalar_lea.hbm %s6580_s5, 4096 }
  0x31   : > { %p4704_p0 = scmp.ne.s32.totalorder %s6580_s5, %s4703_s25  ;;  %p4710_p10 = scmp.lt.u32.totalorder %s4703_s25, %s6580_s5 }
  0x33   : > { %p4706_p4 = pnand %p4704_p0, %p4677_p1 }
  0x35   : > { %p4707_p8 = pneg %p4706_p4 }
  0x37   : > { %p4712_p11 = pnand %p4710_p10, %p4707_p8 }
  0x39   : > { %4715 = shalt.err (!%p4712_p11)
}
  0x3a   : > { %s4716_s26 = scalar_lea.vmem %s4950_s29, 4096  ;;  %p4724_p6 = scmp.lt.s32.totalorder %s4950_s29, %s4950_s29 }
  0x3b   : > { %p4717_p2 = scmp.ne.s32.totalorder %s4950_s29, %s4716_s26  ;;  %p4725_p7 = scmp.lt.s32.totalorder %s4716_s26, %s4716_s26 }
  0x3d   : > { %p4719_p3 = pnand %p4717_p2, %p4677_p1  ;;  %p4726_p9 = por %p4725_p7, %p4724_p6 }
  0x3f   : > { %p4720_p5 = pneg %p4719_p3 }
  0x41   : > { %p4727_p12 = pnand %p4726_p9, %p4720_p5 }
  0x43   : > { %4730 = shalt.err (!%p4727_p12)
}
  0x44   : > { %s4823_s11 = smov 256   ;;  %s4824_s21 = smov 16  }
  0x45   : > { %4607 = dma.hbm_to_vmem [thread:$0]  (!%p4946_p13), %s6580_s5, 4096, %s4950_s29, [#allocation7], %s4823_s11, %s4823_s11, %s4824_s21  }
  0x46   : > { %p6603_p0 = scmp.ne.s32.totalorder %s6600_s23, 0 }
  0x47   : > { %p6604_p1 = scmp.ne.s32.totalorder (!%p6603_p0), %s6601_s24, 0 }
  0x48   : > { %333 = sbr.rel (%p6603_p0) target bundleno = 1260 (0x4ec), region = 56 }
  0x4f   : > { %4784 = dma.done.wait (%p6604_p1), [#allocation4], 2048  }
  0x50   : > { %4786 = vsyncadd (%p6604_p1), [#allocation4], 4294965248 }
  0x51   : > { %4788 = dma.done.wait (%p6604_p1), [#allocation7], 4096  }
  0x52   : > { %4790 = vsyncadd (%p6604_p1), [#allocation7], 4294963200  ;;  %s5010_s27 = sshll.u32 %s4809_s12, 6  ;;  %vm656_vm0 = vcmask 1042432   ;;  %vm463_vm1 = vcmask 23552   ;;  %v1109_v13 = vld [vmem:[#allocation3] sm:$0xff] }
  0x53   : > { %p376_p13 = scmp.lt.s32.totalorder %s5010_s27, 127  ;;  %v455_v0 = vld [vmem:[%s6576_s1] sm:$0x7]  ;;  %v1110_v14 = vld [vmem:[#allocation3 + $0x8] sm:$0xff]  ;;  %v1111_v17 = vld [vmem:[#allocation3 + $0x10] sm:$0xff]  ;;  %s6526_s12 = scalar_lea.hbm %s6584_s9, %s5010_s27 }
  0x54   : > { %4157 = vmatprep.subr.msk.mxu0 %vm656_vm0, %v455_v0  ;;  %v4383_v16 = vpack.c.bf16 %v1110_v14, %v1109_v13  ;;  %v1112_v18 = vld [vmem:[#allocation3 + $0x18] sm:$0xff]  ;;  %v1113_v20 = vld [vmem:[#allocation3 + $0x20] sm:$0xff]  ;;  %v1114_v21 = vld [vmem:[#allocation3 + $0x28] sm:$0xff]  ;;  %p6607_p8 = scmp.ne.s32.totalorder %s6596_s19, 0  ;;  %s4828_s28 = smov [#allocation8]  }
  0x55   : > { %s377_s23 = scalar_select %p376_p13, %s5010_s27, 127  ;;  %4158 = vmatpush3.msk.msra.mxu0 %vm656_vm0, %v455_v0  ;;  %v4387_v19 = vpack.c.bf16 %v1112_v18, %v1111_v17  ;;  %v4391_v24 = vpack.c.bf16 %v1114_v21, %v1113_v20  ;;  %v1115_v25 = vld [vmem:[#allocation3 + $0x30] sm:$0xff]  ;;  %v1116_v26 = vld [vmem:[#allocation3 + $0x38] sm:$0xff]  ;;  %v1117_v30 = vld [vmem:[#allocation3 + $0x40] sm:$0xff] }
  0x56   : > { %4384 = vmatprep.subr.bf16.mxu1 %v4383_v16  ;;  %v4395_v29 = vpack.c.bf16 %v1116_v26, %v1115_v25  ;;  %v1118_v31 = vld [vmem:[#allocation3 + $0x48] sm:$0xff]  ;;  %v1119_v35 = vld [vmem:[#allocation3 + $0x50] sm:$0xff]  ;;  %v1120_v36 = vld [vmem:[#allocation3 + $0x58] sm:$0xff]  ;;  %s4735_s26 = sshll.u32 %s4828_s28, 4  ;;  %s4736_s26 = int_to_ptr.vmem [resolvable:$false] %s4735_s26 }
  0x57   : > { %s3938_s29 = sshll.u32 %s377_s23, 3  ;;  %4386 = vmatpush3.bf16.msra.mxu1 %v4383_v16  ;;  %v4399_v34 = vpack.c.bf16 %v1118_v31, %v1117_v30  ;;  %v4403_v39 = vpack.c.bf16 %v1120_v36, %v1119_v35  ;;  %v1121_v40 = vld [vmem:[#allocation3 + $0x60] sm:$0xff]  ;;  %v1122_v41 = vld [vmem:[#allocation3 + $0x68] sm:$0xff]  ;;  %v1584_v26 = vld [vmem:[#allocation6 + $0x18] sm:$0xff]  ;;  %s4737_s27 = scalar_lea.vmem %s4736_s26, 128 }
  0x58   : > { %s5017_s16 = scalar_lea.vmem %s6575_s0, %s3938_s29  ;;  %4388 = vmatprep.subr.bf16.mxu1 %v4387_v19  ;;  %v4407_v44 = vpack.c.bf16 %v1122_v41, %v1121_v40  ;;  %v1582_v25 = vld [vmem:[#allocation6 + $0x8] sm:$0xff]  ;;  %v1587_v35 = vld [vmem:[#allocation6 + $0x30] sm:$0xff]  ;;  %v1589_v40 = vld [vmem:[#allocation6 + $0x40] sm:$0xff]  ;;  %s371_s29 = sand.u32 1, %s4801_s10  }
  0x59   : > { %v391_v1 = vld [vmem:[%s5017_s16] sm:$0xff]  ;;  %v392_v2 = vld [vmem:[%s5017_s16 + $0x8] sm:$0xff]  ;;  %v393_v3 = vld [vmem:[%s5017_s16 + $0x10] sm:$0xff]  ;;  %s3936_s15 = sshll.u32 %s371_s29, 2  ;;  %s3824_s24 = scalar_lea.sflag [#allocation5], %s371_s29 }
  0x5a   : > { %4159 = vmatprep.mubr.msk.f32.mxu0 %vm463_vm1, %v391_v1  ;;  %v394_v4 = vld [vmem:[%s5017_s16 + $0x18] sm:$0xff]  ;;  %v395_v5 = vld [vmem:[%s5017_s16 + $0x20] sm:$0xff]  ;;  %v396_v6 = vld [vmem:[%s5017_s16 + $0x28] sm:$0xff]  ;;  %s373_s13 = scalar_lea.vmem [#allocation8], %s3936_s15 }
  0x5b   : > { %4160 = vmatmul.mubr.msk.f32.vlgmr.msra.gmra.mrb[0].mxu0 %vm463_vm1, %v392_v2  ;;  %v397_v7 = vld [vmem:[%s5017_s16 + $0x30] sm:$0xff]  ;;  %v398_v8 = vld [vmem:[%s5017_s16 + $0x38] sm:$0xff]  ;;  %v399_v9 = vld [vmem:[%s5017_s16 + $0x40] sm:$0xff]  ;;  %4390 = vmatpush3.bf16.msra.mxu1 %v4387_v19 }
  0x5c   : > { %4162 = vmatprep.mubr.msk.f32.mxu0 %vm463_vm1, %v393_v3  ;;  %v400_v10 = vld [vmem:[%s5017_s16 + $0x48] sm:$0xff]  ;;  %v401_v11 = vld [vmem:[%s5017_s16 + $0x50] sm:$0xff]  ;;  %v402_v12 = vld [vmem:[%s5017_s16 + $0x58] sm:$0xff]  ;;  %4392 = vmatprep.subr.bf16.mxu1 %v4391_v24 }
  0x5d   : > { %v403_v15 = vld [vmem:[%s5017_s16 + $0x60] sm:$0xff]  ;;  %v404_v22 = vld [vmem:[%s5017_s16 + $0x68] sm:$0xff]  ;;  %v405_v23 = vld [vmem:[%s5017_s16 + $0x70] sm:$0xff] }
  0x5e   : > { %v406_v27 = vld [vmem:[%s5017_s16 + $0x78] sm:$0xff]  ;;  %v407_v28 = vld [vmem:[%s5017_s16 + $0x80] sm:$0xff]  ;;  %v408_v32 = vld [vmem:[%s5017_s16 + $0x88] sm:$0xff] }
  0x5f   : > { %4163 = vmatmul.mubr.msk.f32.gmra.mrb[2].mxu0 %vm463_vm1, %v394_v4  ;;  %4394 = vmatpush3.bf16.msra.mxu1 %v4391_v24  ;;  %v409_v33 = vld [vmem:[%s5017_s16 + $0x90] sm:$0xff]  ;;  %v410_v37 = vld [vmem:[%s5017_s16 + $0x98] sm:$0xff]  ;;  %v411_v38 = vld [vmem:[%s5017_s16 + $0xa0] sm:$0xff] }
  0x60   : > { %4165 = vmatprep.mubr.msk.f32.mxu0 %vm463_vm1, %v395_v5  ;;  %4396 = vmatprep.subr.bf16.mxu1 %v4395_v29  ;;  %v412_v42 = vld [vmem:[%s5017_s16 + $0xa8] sm:$0xff]  ;;  %v413_v43 = vld [vmem:[%s5017_s16 + $0xb0] sm:$0xff]  ;;  %v414_v45 = vld [vmem:[%s5017_s16 + $0xb8] sm:$0xff] }
  0x61   : > { %v415_v46 = vld [vmem:[%s5017_s16 + $0xc0] sm:$0xff]  ;;  %v416_v47 = vld [vmem:[%s5017_s16 + $0xc8] sm:$0xff]  ;;  %v417_v48 = vld [vmem:[%s5017_s16 + $0xd0] sm:$0xff] }
  0x62   : > { %v418_v49 = vld [vmem:[%s5017_s16 + $0xd8] sm:$0xff]  ;;  %v419_v50 = vld [vmem:[%s5017_s16 + $0xe0] sm:$0xff]  ;;  %v420_v51 = vld [vmem:[%s5017_s16 + $0xe8] sm:$0xff] }
  0x63   : > { %4166 = vmatmul.mubr.msk.f32.gmra.mrb[4].mxu0 %vm463_vm1, %v396_v6  ;;  %4398 = vmatpush3.bf16.msra.mxu1 %v4395_v29  ;;  %v421_v52 = vld [vmem:[%s5017_s16 + $0xf0] sm:$0xff]  ;;  %v422_v53 = vld [vmem:[%s5017_s16 + $0xf8] sm:$0xff]  ;;  %v423_v54 = vld [vmem:[%s5017_s16 + $0x100] sm:$0xff] }
  0x64   : > { %4168 = vmatprep.mubr.msk.f32.mxu0 %vm463_vm1, %v397_v7  ;;  %4400 = vmatprep.subr.bf16.mxu1 %v4399_v34  ;;  %v424_v55 = vld [vmem:[%s5017_s16 + $0x108] sm:$0xff]  ;;  %v425_v56 = vld [vmem:[%s5017_s16 + $0x110] sm:$0xff]  ;;  %v426_v57 = vld [vmem:[%s5017_s16 + $0x118] sm:$0xff] }
  0x65   : > { %v427_v58 = vld [vmem:[%s5017_s16 + $0x120] sm:$0xff]  ;;  %v428_v59 = vld [vmem:[%s5017_s16 + $0x128] sm:$0xff]  ;;  %v429_v60 = vld [vmem:[%s5017_s16 + $0x130] sm:$0xff] }
  0x66   : > { %v430_v61 = vld [vmem:[%s5017_s16 + $0x138] sm:$0xff]  ;;  %v431_v62 = vld [vmem:[%s5017_s16 + $0x140] sm:$0xff]  ;;  %v432_v63 = vld [vmem:[%s5017_s16 + $0x148] sm:$0xff] }
  0x67   : > { %4169 = vmatmul.mubr.msk.f32.gmra.mrb[6].mxu0 %vm463_vm1, %v398_v8  ;;  %4402 = vmatpush3.bf16.msra.mxu1 %v4399_v34  ;;  %v433_v0 = vld [vmem:[%s5017_s16 + $0x150] sm:$0xff]  ;;  %v434_v1 = vld [vmem:[%s5017_s16 + $0x158] sm:$0xff]  ;;  %v435_v2 = vld [vmem:[%s5017_s16 + $0x160] sm:$0xff] }
  0x68   : > { %4171 = vmatprep.mubr.msk.f32.mxu0 %vm463_vm1, %v399_v9  ;;  %4404 = vmatprep.subr.bf16.mxu1 %v4403_v39  ;;  %v1123_v3 = vld [vmem:[#allocation3 + $0x70] sm:$0xff]  ;;  %v1124_v4 = vld [vmem:[#allocation3 + $0x78] sm:$0xff]  ;;  %v436_v6 = vld [vmem:[%s5017_s16 + $0x168] sm:$0xff] }
  0x69   : > { %v4411_v5 = vpack.c.bf16 %v1124_v4, %v1123_v3  ;;  %v437_v7 = vld [vmem:[%s5017_s16 + $0x170] sm:$0xff]  ;;  %v438_v8 = vld [vmem:[%s5017_s16 + $0x178] sm:$0xff]  ;;  %v439_v9 = vld [vmem:[%s5017_s16 + $0x180] sm:$0xff] }
  0x6a   : > { %v443_v13 = vld [vmem:[%s5017_s16 + $0x1a0] sm:$0xff]  ;;  %v444_v14 = vld [vmem:[%s5017_s16 + $0x1a8] sm:$0xff]  ;;  %v446_v16 = vld [vmem:[%s5017_s16 + $0x1b8] sm:$0xff] }
  0x6b   : > { %4172 = vmatmul.mubr.msk.f32.gmra.mrb[8].mxu0 %vm463_vm1, %v400_v10  ;;  %4406 = vmatpush3.bf16.msra.mxu1 %v4403_v39  ;;  %v440_v10 = vld [vmem:[%s5017_s16 + $0x188] sm:$0xff]  ;;  %v447_v17 = vld [vmem:[%s5017_s16 + $0x1c0] sm:$0xff]  ;;  %v449_v19 = vld [vmem:[%s5017_s16 + $0x1d0] sm:$0xff] }
  0x6c   : > { %4174 = vmatprep.mubr.msk.f32.mxu0 %vm463_vm1, %v401_v11  ;;  %4408 = vmatprep.subr.bf16.mxu1 %v4407_v44  ;;  %v441_v11 = vld [vmem:[%s5017_s16 + $0x190] sm:$0xff]  ;;  %v448_v18 = vld [vmem:[%s5017_s16 + $0x1c8] sm:$0xff]  ;;  %v450_v20 = vld [vmem:[%s5017_s16 + $0x1d8] sm:$0xff] }
  0x6d   : > { %v451_v21 = vld [vmem:[%s5017_s16 + $0x1e0] sm:$0xff]  ;;  %v454_v24 = vld [vmem:[%s5017_s16 + $0x1f8] sm:$0xff]  ;;  %v1586_v31 = vld [vmem:[#allocation6 + $0x28] sm:$0xff] }
  0x6e   : > { %v1583_v29 = vld [vmem:[#allocation6 + $0x10] sm:$0xff]  ;;  %v1585_v34 = vld [vmem:[#allocation6 + $0x20] sm:$0xff]  ;;  %v5192_v3 = vld [vmem:[%s6577_s2] ss:$0 sm:$0xff] }
  0x6f   : > { %4175 = vmatmul.mubr.msk.f32.gmra.mrb[10].mxu0 %vm463_vm1, %v402_v12  ;;  %4410 = vmatpush3.bf16.msra.mxu1 %v4407_v44  ;;  %v442_v12 = vld [vmem:[%s5017_s16 + $0x198] sm:$0xff]  ;;  %v5156_v36 = vpack.c.bf16 %v1587_v35, %v1585_v34 }
  0x70   : > { %4177 = vmatprep.mubr.msk.f32.mxu0 %vm463_vm1, %v403_v15  ;;  %4412 = vmatprep.subr.bf16.mxu1 %v4411_v5  ;;  %v445_v15 = vld [vmem:[%s5017_s16 + $0x1b0] sm:$0xff]  ;;  %v1596_v44 = vld [vmem:[#allocation6 + $0x78] sm:$0xff] }
  0x71   : > { %v1591_v41 = vld [vmem:[#allocation6 + $0x50] sm:$0xff] }
  0x73   : > { %4178 = vmatmul.mubr.msk.f32.gmra.mrb[12].mxu0 %vm463_vm1, %v404_v22  ;;  %4414 = vmatpush3.bf16.msra.mxu1 %v4411_v5  ;;  %v452_v22 = vld [vmem:[%s5017_s16 + $0x1e8] sm:$0xff] }
  0x74   : > { %4180 = vmatprep.mubr.msk.f32.mxu0 %vm463_vm1, %v405_v23  ;;  %v453_v23 = vld [vmem:[%s5017_s16 + $0x1f0] sm:$0xff]  ;;  %s3838_s16 = sshll.u32 %s373_s13, 4  ;;  %s6528_s16 = int_to_ptr.vmem [resolvable:$true] %s3838_s16 }
  0x75   : > { %v1610_v5 = vld [vmem:[#allocation6 + $0xe8] sm:$0xff]  ;;  %s4731_s25 = scalar_lea.vmem %s6528_s16, 64  ;;  %p4738_p2 = scmp.lt.s32.totalorder %s6528_s16, %s4736_s26 }
  0x76   : > { %p4732_p4 = scmp.ne.s32.totalorder %s6528_s16, %s4731_s25  ;;  %p4739_p3 = scmp.lt.s32.totalorder %s4737_s27, %s4731_s25 }
  0x77   : > { %4181 = vmatmul.mubr.msk.f32.gmra.mrb[14].mxu0 %vm463_vm1, %v406_v27  ;;  %v1581_v27 = vld [vmem:[#allocation6] sm:$0xff] }
  0x78   : > { %4183 = vmatprep.mubr.msk.f32.mxu0 %vm463_vm1, %v407_v28  ;;  %v4415_v28 = vpack.c.bf16 %v1584_v26, %v1582_v25  ;;  %v5150_v30 = vpack.c.bf16 %v1583_v29, %v1581_v27  ;;  %p4733_p10 = pnand %p4732_p4, %p6607_p8  ;;  %p4740_p5 = por %p4739_p3, %p4738_p2 }
  0x7a   : > { %4416 = vmatprep.subr.bf16.mxu0 %v4415_v28  ;;  %4575 = vmatprep.subr.bf16.mxu1 %v4415_v28  ;;  %p4734_p11 = pneg %p4733_p10 }
  0x7b   : > { %4184 = vmatmul.mubr.msk.f32.gmra.mrb[16].mxu0 %vm463_vm1, %v408_v32  ;;  %v1588_v32 = vld [vmem:[#allocation6 + $0x38] sm:$0xff] }
  0x7c   : > { %4186 = vmatprep.mubr.msk.f32.mxu0 %vm463_vm1, %v409_v33  ;;  %4418 = vmatpush1.bf16.msra.mxu0 %v5150_v30  ;;  %v5153_v33 = vpack.c.bf16 %v1588_v32, %v1586_v31  ;;  %p4741_p6 = pnand %p4740_p5, %p4734_p11 }
  0x7e   : > { %4420 = vmatprep.subr.bf16.mxu0 %v5153_v33 }
  0x7f   : > { %4187 = vmatmul.mubr.msk.f32.gmra.mrb[18].mxu0 %vm463_vm1, %v410_v37  ;;  %v1590_v37 = vld [vmem:[#allocation6 + $0x48] sm:$0xff] }
  0x80   : > { %4189 = vmatprep.mubr.msk.f32.mxu0 %vm463_vm1, %v411_v38  ;;  %4422 = vmatpush1.bf16.msra.mxu0 %v5156_v36  ;;  %v1592_v38 = vld [vmem:[#allocation6 + $0x58] sm:$0xff] }
  0x81   : > { %v5159_v39 = vpack.c.bf16 %v1592_v38, %v1590_v37 }
  0x83   : > { %4190 = vmatmul.mubr.msk.f32.gmra.mrb[20].mxu0 %vm463_vm1, %v412_v42  ;;  %4424 = vmatprep.subr.bf16.mxu0 %v5159_v39  ;;  %v5162_v42 = vpack.c.bf16 %v1591_v41, %v1589_v40 }
  0x84   : > { %4192 = vmatprep.mubr.msk.f32.mxu0 %vm463_vm1, %v413_v43  ;;  %v1594_v43 = vld [vmem:[#allocation6 + $0x68] sm:$0xff] }
  0x85   : > { %4426 = vmatpush1.bf16.msra.mxu0 %v5162_v42 }
  0x87   : > { %4193 = vmatmul.mubr.msk.f32.gmra.mrb[22].mxu0 %vm463_vm1, %v414_v45  ;;  %v5165_v45 = vpack.c.bf16 %v1596_v44, %v1594_v43 }
  0x88   : > { %4195 = vmatprep.mubr.msk.f32.mxu0 %vm463_vm1, %v415_v46  ;;  %v1593_v46 = vld [vmem:[#allocation6 + $0x60] sm:$0xff] }
  0x89   : > { %4428 = vmatprep.subr.bf16.mxu0 %v5165_v45 }
  0x8b   : > { %4196 = vmatmul.mubr.msk.f32.gmra.mrb[24].mxu0 %vm463_vm1, %v416_v47  ;;  %v1595_v47 = vld [vmem:[#allocation6 + $0x70] sm:$0xff] }
  0x8c   : > { %4198 = vmatprep.mubr.msk.f32.mxu0 %vm463_vm1, %v417_v48  ;;  %v5168_v48 = vpack.c.bf16 %v1595_v47, %v1593_v46 }
  0x8e   : > { %4430 = vmatpush1.bf16.msra.mxu0 %v5168_v48 }
  0x8f   : > { %4199 = vmatmul.mubr.msk.f32.gmra.mrb[26].mxu0 %vm463_vm1, %v418_v49  ;;  %v1598_v49 = vld [vmem:[#allocation6 + $0x88] sm:$0xff] }
  0x90   : > { %4201 = vmatprep.mubr.msk.f32.mxu0 %vm463_vm1, %v419_v50  ;;  %v1600_v50 = vld [vmem:[#allocation6 + $0x98] sm:$0xff] }
  0x93   : > { %4202 = vmatmul.mubr.msk.f32.gmra.mrb[28].mxu0 %vm463_vm1, %v420_v51  ;;  %v5171_v51 = vpack.c.bf16 %v1600_v50, %v1598_v49 }
  0x94   : > { %4204 = vmatprep.mubr.msk.f32.mxu0 %vm463_vm1, %v421_v52  ;;  %v1597_v52 = vld [vmem:[#allocation6 + $0x80] sm:$0xff] }
  0x95   : > { %4432 = vmatprep.subr.bf16.mxu0 %v5171_v51 }
  0x97   : > { %4205 = vmatmul.mubr.msk.f32.gmra.mrb[30].mxu0 %vm463_vm1, %v422_v53  ;;  %v1599_v53 = vld [vmem:[#allocation6 + $0x90] sm:$0xff] }
  0x98   : > { %4207 = vmatprep.mubr.msk.f32.mxu0 %vm463_vm1, %v423_v54  ;;  %v5174_v54 = vpack.c.bf16 %v1599_v53, %v1597_v52 }
  0x9a   : > { %4434 = vmatpush1.bf16.msra.mxu0 %v5174_v54 }
  0x9b   : > { %4208 = vmatmul.mubr.msk.f32.gmra.mrb[32].mxu0 %vm463_vm1, %v424_v55  ;;  %v1602_v55 = vld [vmem:[#allocation6 + $0xa8] sm:$0xff] }
  0x9c   : > { %4210 = vmatprep.mubr.msk.f32.mxu0 %vm463_vm1, %v425_v56  ;;  %v1604_v56 = vld [vmem:[#allocation6 + $0xb8] sm:$0xff] }
  0x9f   : > { %4211 = vmatmul.mubr.msk.f32.gmra.mrb[34].mxu0 %vm463_vm1, %v426_v57  ;;  %v5177_v57 = vpack.c.bf16 %v1604_v56, %v1602_v55 }
  0xa0   : > { %4213 = vmatprep.mubr.msk.f32.mxu0 %vm463_vm1, %v427_v58  ;;  %v1601_v58 = vld [vmem:[#allocation6 + $0xa0] sm:$0xff] }
  0xa1   : > { %4436 = vmatprep.subr.bf16.mxu0 %v5177_v57 }
  0xa3   : > { %4214 = vmatmul.mubr.msk.f32.gmra.mrb[36].mxu0 %vm463_vm1, %v428_v59  ;;  %v1603_v59 = vld [vmem:[#allocation6 + $0xb0] sm:$0xff] }
  0xa4   : > { %4216 = vmatprep.mubr.msk.f32.mxu0 %vm463_vm1, %v429_v60  ;;  %v5180_v60 = vpack.c.bf16 %v1603_v59, %v1601_v58 }
  0xa6   : > { %4438 = vmatpush1.bf16.msra.mxu0 %v5180_v60 }
  0xa7   : > { %4217 = vmatmul.mubr.msk.f32.gmra.mrb[38].mxu0 %vm463_vm1, %v430_v61  ;;  %v1606_v61 = vld [vmem:[#allocation6 + $0xc8] sm:$0xff] }
  0xa8   : > { %4219 = vmatprep.mubr.msk.f32.mxu0 %vm463_vm1, %v431_v62  ;;  %v1608_v62 = vld [vmem:[#allocation6 + $0xd8] sm:$0xff] }
  0xab   : > { %4220 = vmatmul.mubr.msk.f32.gmra.mrb[40].mxu0 %vm463_vm1, %v432_v63  ;;  %v5183_v63 = vpack.c.bf16 %v1608_v62, %v1606_v61 }
  0xac   : > { %4222 = vmatprep.mubr.msk.f32.mxu0 %vm463_vm1, %v433_v0  ;;  %v1605_v0 = vld [vmem:[#allocation6 + $0xc0] sm:$0xff] }
  0xad   : > { %4440 = vmatprep.subr.bf16.mxu0 %v5183_v63 }
  0xaf   : > { %4223 = vmatmul.mubr.msk.f32.gmra.mrb[42].mxu0 %vm463_vm1, %v434_v1  ;;  %v1607_v1 = vld [vmem:[#allocation6 + $0xd0] sm:$0xff] }
  0xb0   : > { %4225 = vmatprep.mubr.msk.f32.mxu0 %vm463_vm1, %v435_v2  ;;  %v5186_v2 = vpack.c.bf16 %v1607_v1, %v1605_v0 }
  0xb2   : > { %4442 = vmatpush1.bf16.msra.mxu0 %v5186_v2 }
  0xb3   : > { %4226 = vmatmul.mubr.msk.f32.gmra.mrb[44].mxu0 %vm463_vm1, %v436_v6  ;;  %v1612_v6 = vld [vmem:[#allocation6 + $0xf8] sm:$0xff] }
  0xb4   : > { %4228 = vmatprep.mubr.msk.f32.mxu0 %vm463_vm1, %v437_v7 }
  0xb7   : > { %4229 = vmatmul.mubr.msk.f32.gmra.mrb[46].mxu0 %vm463_vm1, %v438_v8 }
  0xb8   : > { %4231 = vmatprep.mubr.msk.f32.mxu0 %vm463_vm1, %v439_v9  ;;  %v5195_v9 = vpack.c.bf16 %v1612_v6, %v1610_v5 }
  0xba   : > { %4444 = vmatprep.subr.bf16.mxu0 %v5195_v9 }
  0xbb   : > { %4232 = vmatmul.mubr.msk.f32.gmra.mrb[48].mxu0 %vm463_vm1, %v440_v10 }
  0xbc   : > { %4234 = vmatprep.mubr.msk.f32.mxu0 %vm463_vm1, %v441_v11  ;;  %v1609_v11 = vld [vmem:[#allocation6 + $0xe0] sm:$0xff] }
  0xbf   : > { %4235 = vmatmul.mubr.msk.f32.gmra.mrb[50].mxu0 %vm463_vm1, %v442_v12  ;;  %v1611_v12 = vld [vmem:[#allocation6 + $0xf0] sm:$0xff] }
  0xc0   : > { %4237 = vmatprep.mubr.msk.f32.mxu0 %vm463_vm1, %v443_v13  ;;  %v5199_v13 = vpack.c.bf16 %v1611_v12, %v1609_v11 }
  0xc2   : > { %4446 = vmatpush1.bf16.msra.mxu0 %v5199_v13 }
  0xc3   : > { %4238 = vmatmul.mubr.msk.f32.gmra.mrb[52].mxu0 %vm463_vm1, %v444_v14 }
  0xc4   : > { %4240 = vmatprep.mubr.msk.f32.mxu0 %vm463_vm1, %v445_v15 }
  0xc7   : > { %4241 = vmatmul.mubr.msk.f32.gmra.mrb[54].mxu0 %vm463_vm1, %v446_v16 }
  0xc8   : > { %4243 = vmatprep.mubr.msk.f32.mxu0 %vm463_vm1, %v447_v17 }
  0xcb   : > { %4244 = vmatmul.mubr.msk.f32.gmra.mrb[56].mxu0 %vm463_vm1, %v448_v18 }
  0xcc   : > { %4246 = vmatprep.mubr.msk.f32.mxu0 %vm463_vm1, %v449_v19 }
  0xcf   : > { %4247 = vmatmul.mubr.msk.f32.gmra.mrb[58].mxu0 %vm463_vm1, %v450_v20 }
  0xd0   : > { %4249 = vmatprep.mubr.msk.f32.mxu0 %vm463_vm1, %v451_v21 }
  0xd3   : > { %4250 = vmatmul.mubr.msk.f32.gmra.mrb[60].mxu0 %vm463_vm1, %v452_v22 }
  0xd4   : > { %4252 = vmatprep.mubr.msk.f32.mxu0 %vm463_vm1, %v453_v23 }
  0xd7   : > { %4253 = vmatmul.mubr.msk.f32.gmra.mrb[62].mxu0 %vm463_vm1, %v454_v24 }
 0x12e   : > { %v4161_v4 = vpop.f32.mrb[0].mxu0 }
 0x12f   : > { %v732_v7 = vadd.f32 %v4161_v4, %v5192_v3  ;;  %v726_v8 = vpop.f32.mrb[1].mxu0 }
 0x130   : > { %v727_v10 = vadd.f32 %v5192_v3, %v726_v8 }
 0x131   : > { %v1046_v18 = vmax.f32 %v732_v7, 0.0 }
 0x132   : > { %v4164_v14 = vpop.f32.mrb[2].mxu0  ;;  %v1045_v15 = vmax.f32 %v727_v10, 0.0 }
 0x133   : > { %v742_v16 = vadd.f32 %v4164_v14, %v5192_v3  ;;  %v736_v17 = vpop.f32.mrb[3].mxu0 }
 0x134   : > { %v737_v19 = vadd.f32 %v5192_v3, %v736_v17  ;;  %4287 = vmatprep.mubr.f32.mxu1 %v1045_v15 }
 0x135   : > { %4288 = vmatmul.mubr.f32.vlgmr.msra.gmra.mrb[0].mxu1 %v1046_v18  ;;  %v1048_v20 = vmax.f32 %v742_v16, 0.0 }
 0x136   : > { %v1047_v21 = vmax.f32 %v737_v19, 0.0  ;;  %v4167_v22 = vpop.f32.mrb[4].mxu0  ;;  %4583 = vmatpush1.bf16.msra.mxu1 %v5150_v30 }
 0x137   : > { %v752_v23 = vadd.f32 %v4167_v22, %v5192_v3  ;;  %v746_v24 = vpop.f32.mrb[5].mxu0  ;;  %4576 = vmatprep.subr.bf16.mxu1 %v5153_v33 }
 0x138   : > { %4290 = vmatprep.mubr.f32.mxu1 %v1047_v21  ;;  %v747_v25 = vadd.f32 %v5192_v3, %v746_v24 }
 0x139   : > { %4291 = vmatmul.mubr.f32.gmra.mrb[2].mxu1 %v1048_v20  ;;  %v1050_v26 = vmax.f32 %v752_v23, 0.0 }
 0x13a   : > { %v1049_v27 = vmax.f32 %v747_v25, 0.0  ;;  %v4170_v28 = vpop.f32.mrb[6].mxu0  ;;  %4584 = vmatpush1.bf16.msra.mxu1 %v5156_v36 }
 0x13b   : > { %v762_v29 = vadd.f32 %v4170_v28, %v5192_v3  ;;  %v756_v31 = vpop.f32.mrb[7].mxu0  ;;  %4577 = vmatprep.subr.bf16.mxu1 %v5159_v39 }
 0x13c   : > { %4293 = vmatprep.mubr.f32.mxu1 %v1049_v27  ;;  %v757_v30 = vadd.f32 %v5192_v3, %v756_v31 }
 0x13d   : > { %4294 = vmatmul.mubr.f32.gmra.mrb[4].mxu1 %v1050_v26  ;;  %v1052_v32 = vmax.f32 %v762_v29, 0.0 }
 0x13e   : > { %v1051_v33 = vmax.f32 %v757_v30, 0.0  ;;  %v4173_v34 = vpop.f32.mrb[8].mxu0  ;;  %4585 = vmatpush1.bf16.msra.mxu1 %v5162_v42 }
 0x13f   : > { %v772_v35 = vadd.f32 %v4173_v34, %v5192_v3  ;;  %v766_v37 = vpop.f32.mrb[9].mxu0  ;;  %4578 = vmatprep.subr.bf16.mxu1 %v5165_v45 }
 0x140   : > { %4296 = vmatprep.mubr.f32.mxu1 %v1051_v33  ;;  %v767_v36 = vadd.f32 %v5192_v3, %v766_v37 }
 0x141   : > { %4297 = vmatmul.mubr.f32.gmra.mrb[6].mxu1 %v1052_v32  ;;  %v1054_v38 = vmax.f32 %v772_v35, 0.0 }
 0x142   : > { %v1053_v39 = vmax.f32 %v767_v36, 0.0  ;;  %v4176_v40 = vpop.f32.mrb[10].mxu0  ;;  %4586 = vmatpush1.bf16.msra.mxu1 %v5168_v48 }
 0x143   : > { %v782_v41 = vadd.f32 %v4176_v40, %v5192_v3  ;;  %v776_v43 = vpop.f32.mrb[11].mxu0  ;;  %4579 = vmatprep.subr.bf16.mxu1 %v5171_v51 }
 0x144   : > { %4299 = vmatprep.mubr.f32.mxu1 %v1053_v39  ;;  %v777_v42 = vadd.f32 %v5192_v3, %v776_v43 }
 0x145   : > { %4300 = vmatmul.mubr.f32.gmra.mrb[8].mxu1 %v1054_v38  ;;  %v1056_v44 = vmax.f32 %v782_v41, 0.0 }
 0x146   : > { %v1055_v45 = vmax.f32 %v777_v42, 0.0  ;;  %v4179_v46 = vpop.f32.mrb[12].mxu0  ;;  %4587 = vmatpush1.bf16.msra.mxu1 %v5174_v54 }
 0x147   : > { %v792_v47 = vadd.f32 %v4179_v46, %v5192_v3  ;;  %v786_v49 = vpop.f32.mrb[13].mxu0  ;;  %4580 = vmatprep.subr.bf16.mxu1 %v5177_v57 }
 0x148   : > { %4302 = vmatprep.mubr.f32.mxu1 %v1055_v45  ;;  %v787_v48 = vadd.f32 %v5192_v3, %v786_v49 }
 0x149   : > { %4303 = vmatmul.mubr.f32.gmra.mrb[10].mxu1 %v1056_v44  ;;  %v1058_v50 = vmax.f32 %v792_v47, 0.0 }
 0x14a   : > { %v1057_v51 = vmax.f32 %v787_v48, 0.0  ;;  %v4182_v52 = vpop.f32.mrb[14].mxu0  ;;  %4588 = vmatpush1.bf16.msra.mxu1 %v5180_v60 }
 0x14b   : > { %v802_v53 = vadd.f32 %v4182_v52, %v5192_v3  ;;  %v796_v55 = vpop.f32.mrb[15].mxu0  ;;  %4581 = vmatprep.subr.bf16.mxu1 %v5183_v63 }
 0x14c   : > { %4305 = vmatprep.mubr.f32.mxu1 %v1057_v51  ;;  %v797_v54 = vadd.f32 %v5192_v3, %v796_v55 }
 0x14d   : > { %4306 = vmatmul.mubr.f32.gmra.mrb[12].mxu1 %v1058_v50  ;;  %v1060_v56 = vmax.f32 %v802_v53, 0.0 }
 0x14e   : > { %v1059_v57 = vmax.f32 %v797_v54, 0.0  ;;  %v4185_v58 = vpop.f32.mrb[16].mxu0  ;;  %4589 = vmatpush1.bf16.msra.mxu1 %v5186_v2 }
 0x14f   : > { %v812_v59 = vadd.f32 %v4185_v58, %v5192_v3  ;;  %v806_v61 = vpop.f32.mrb[17].mxu0  ;;  %4582 = vmatprep.subr.bf16.mxu1 %v5195_v9 }
 0x150   : > { %v807_v60 = vadd.f32 %v5192_v3, %v806_v61  ;;  %4308 = vmatprep.mubr.f32.mxu1 %v1059_v57 }
 0x151   : > { %v1062_v62 = vmax.f32 %v812_v59, 0.0  ;;  %4309 = vmatmul.mubr.f32.gmra.mrb[14].mxu1 %v1060_v56 }
 0x152   : > { %v1061_v63 = vmax.f32 %v807_v60, 0.0  ;;  %v4188_v0 = vpop.f32.mrb[18].mxu0  ;;  %4590 = vmatpush1.bf16.msra.mxu1 %v5199_v13 }
 0x153   : > { %v822_v1 = vadd.f32 %v4188_v0, %v5192_v3  ;;  %v816_v4 = vpop.f32.mrb[19].mxu0 }
 0x154   : > { %v817_v5 = vadd.f32 %v5192_v3, %v816_v4  ;;  %4311 = vmatprep.mubr.f32.mxu1 %v1061_v63 }
 0x155   : > { %v1064_v2 = vmax.f32 %v822_v1, 0.0  ;;  %4312 = vmatmul.mubr.f32.gmra.mrb[16].mxu1 %v1062_v62 }
 0x156   : > { %v1063_v6 = vmax.f32 %v817_v5, 0.0  ;;  %v4191_v7 = vpop.f32.mrb[20].mxu0 }
 0x157   : > { %v832_v8 = vadd.f32 %v4191_v7, %v5192_v3  ;;  %v826_v9 = vpop.f32.mrb[21].mxu0 }
 0x158   : > { %v827_v10 = vadd.f32 %v5192_v3, %v826_v9  ;;  %4314 = vmatprep.mubr.f32.mxu1 %v1063_v6 }
 0x159   : > { %v1066_v11 = vmax.f32 %v832_v8, 0.0  ;;  %4315 = vmatmul.mubr.f32.gmra.mrb[18].mxu1 %v1064_v2 }
 0x15a   : > { %v1065_v12 = vmax.f32 %v827_v10, 0.0  ;;  %v4194_v13 = vpop.f32.mrb[22].mxu0 }
 0x15b   : > { %v842_v14 = vadd.f32 %v4194_v13, %v5192_v3  ;;  %v836_v15 = vpop.f32.mrb[23].mxu0 }
 0x15c   : > { %v837_v16 = vadd.f32 %v5192_v3, %v836_v15  ;;  %4317 = vmatprep.mubr.f32.mxu1 %v1065_v12 }
 0x15d   : > { %v1068_v17 = vmax.f32 %v842_v14, 0.0  ;;  %4318 = vmatmul.mubr.f32.gmra.mrb[20].mxu1 %v1066_v11 }
 0x15e   : > { %v1067_v18 = vmax.f32 %v837_v16, 0.0  ;;  %v4197_v19 = vpop.f32.mrb[24].mxu0 }
 0x15f   : > { %v852_v20 = vadd.f32 %v4197_v19, %v5192_v3  ;;  %v846_v21 = vpop.f32.mrb[25].mxu0 }
 0x160   : > { %v847_v22 = vadd.f32 %v5192_v3, %v846_v21  ;;  %4320 = vmatprep.mubr.f32.mxu1 %v1067_v18 }
 0x161   : > { %v1070_v23 = vmax.f32 %v852_v20, 0.0  ;;  %4321 = vmatmul.mubr.f32.gmra.mrb[22].mxu1 %v1068_v17 }
 0x162   : > { %v1069_v24 = vmax.f32 %v847_v22, 0.0  ;;  %v4200_v25 = vpop.f32.mrb[26].mxu0 }
 0x163   : > { %v862_v26 = vadd.f32 %v4200_v25, %v5192_v3  ;;  %v856_v27 = vpop.f32.mrb[27].mxu0 }
 0x164   : > { %v857_v28 = vadd.f32 %v5192_v3, %v856_v27  ;;  %4323 = vmatprep.mubr.f32.mxu1 %v1069_v24  ;;  %v4825_v27 = vmov 0.0  }
 0x165   : > { %v1072_v29 = vmax.f32 %v862_v26, 0.0  ;;  %4324 = vmatmul.mubr.f32.gmra.mrb[24].mxu1 %v1070_v23  ;;  %1689 = vmatprep.mubr.f32.mxu0 %v4825_v27 }
 0x166   : > { %v1071_v31 = vmax.f32 %v857_v28, 0.0  ;;  %v4203_v30 = vpop.f32.mrb[28].mxu0 }
 0x167   : > { %v872_v32 = vadd.f32 %v4203_v30, %v5192_v3  ;;  %v866_v33 = vpop.f32.mrb[29].mxu0 }
 0x168   : > { %v867_v34 = vadd.f32 %v5192_v3, %v866_v33  ;;  %4326 = vmatprep.mubr.f32.mxu1 %v1071_v31 }
 0x169   : > { %v1074_v35 = vmax.f32 %v872_v32, 0.0  ;;  %4327 = vmatmul.mubr.f32.gmra.mrb[26].mxu1 %v1072_v29 }
 0x16a   : > { %v1073_v37 = vmax.f32 %v867_v34, 0.0  ;;  %v4206_v36 = vpop.f32.mrb[30].mxu0 }
 0x16b   : > { %v882_v38 = vadd.f32 %v4206_v36, %v5192_v3  ;;  %v876_v39 = vpop.f32.mrb[31].mxu0 }
 0x16c   : > { %v877_v40 = vadd.f32 %v5192_v3, %v876_v39  ;;  %4329 = vmatprep.mubr.f32.mxu1 %v1073_v37 }
 0x16d   : > { %v1076_v41 = vmax.f32 %v882_v38, 0.0  ;;  %4330 = vmatmul.mubr.f32.gmra.mrb[28].mxu1 %v1074_v35 }
 0x16e   : > { %v1075_v43 = vmax.f32 %v877_v40, 0.0  ;;  %v4209_v42 = vpop.f32.mrb[32].mxu0 }
 0x16f   : > { %v892_v44 = vadd.f32 %v4209_v42, %v5192_v3  ;;  %v886_v45 = vpop.f32.mrb[33].mxu0 }
 0x170   : > { %v887_v46 = vadd.f32 %v5192_v3, %v886_v45  ;;  %4332 = vmatprep.mubr.f32.mxu1 %v1075_v43 }
 0x171   : > { %v1078_v47 = vmax.f32 %v892_v44, 0.0  ;;  %4333 = vmatmul.mubr.f32.gmra.mrb[30].mxu1 %v1076_v41 }
 0x172   : > { %v1077_v49 = vmax.f32 %v887_v46, 0.0  ;;  %v4212_v48 = vpop.f32.mrb[34].mxu0 }
 0x173   : > { %v902_v50 = vadd.f32 %v4212_v48, %v5192_v3  ;;  %v896_v51 = vpop.f32.mrb[35].mxu0 }
 0x174   : > { %v897_v52 = vadd.f32 %v5192_v3, %v896_v51  ;;  %4335 = vmatprep.mubr.f32.mxu1 %v1077_v49 }
 0x175   : > { %v1080_v53 = vmax.f32 %v902_v50, 0.0  ;;  %4336 = vmatmul.mubr.f32.gmra.mrb[32].mxu1 %v1078_v47 }
 0x176   : > { %v1079_v55 = vmax.f32 %v897_v52, 0.0  ;;  %v4215_v54 = vpop.f32.mrb[36].mxu0 }
 0x177   : > { %v912_v56 = vadd.f32 %v4215_v54, %v5192_v3  ;;  %v906_v57 = vpop.f32.mrb[37].mxu0 }
 0x178   : > { %v907_v58 = vadd.f32 %v5192_v3, %v906_v57  ;;  %4338 = vmatprep.mubr.f32.mxu1 %v1079_v55 }
 0x179   : > { %v1082_v59 = vmax.f32 %v912_v56, 0.0  ;;  %4339 = vmatmul.mubr.f32.gmra.mrb[34].mxu1 %v1080_v53 }
 0x17a   : > { %v1081_v61 = vmax.f32 %v907_v58, 0.0  ;;  %v4218_v60 = vpop.f32.mrb[38].mxu0 }
 0x17b   : > { %v922_v62 = vadd.f32 %v4218_v60, %v5192_v3  ;;  %v916_v63 = vpop.f32.mrb[39].mxu0 }
 0x17c   : > { %4341 = vmatprep.mubr.f32.mxu1 %v1081_v61  ;;  %v917_v0 = vadd.f32 %v5192_v3, %v916_v63 }
 0x17d   : > { %4342 = vmatmul.mubr.f32.gmra.mrb[36].mxu1 %v1082_v59  ;;  %v1084_v1 = vmax.f32 %v922_v62, 0.0 }
 0x17e   : > { %v1083_v4 = vmax.f32 %v917_v0, 0.0  ;;  %v4221_v5 = vpop.f32.mrb[40].mxu0 }
 0x17f   : > { %v932_v2 = vadd.f32 %v4221_v5, %v5192_v3  ;;  %v926_v6 = vpop.f32.mrb[41].mxu0 }
 0x180   : > { %4344 = vmatprep.mubr.f32.mxu1 %v1083_v4  ;;  %v927_v7 = vadd.f32 %v5192_v3, %v926_v6 }
 0x181   : > { %4345 = vmatmul.mubr.f32.gmra.mrb[38].mxu1 %v1084_v1  ;;  %v1086_v8 = vmax.f32 %v932_v2, 0.0 }
 0x182   : > { %v1085_v9 = vmax.f32 %v927_v7, 0.0  ;;  %v4224_v10 = vpop.f32.mrb[42].mxu0 }
 0x183   : > { %v942_v11 = vadd.f32 %v4224_v10, %v5192_v3  ;;  %v936_v12 = vpop.f32.mrb[43].mxu0 }
 0x184   : > { %4347 = vmatprep.mubr.f32.mxu1 %v1085_v9  ;;  %v937_v13 = vadd.f32 %v5192_v3, %v936_v12 }
 0x185   : > { %4348 = vmatmul.mubr.f32.gmra.mrb[40].mxu1 %v1086_v8  ;;  %v1088_v14 = vmax.f32 %v942_v11, 0.0 }
 0x186   : > { %v1087_v15 = vmax.f32 %v937_v13, 0.0  ;;  %v4227_v16 = vpop.f32.mrb[44].mxu0 }
 0x187   : > { %v952_v17 = vadd.f32 %v4227_v16, %v5192_v3  ;;  %v946_v18 = vpop.f32.mrb[45].mxu0 }
 0x188   : > { %4350 = vmatprep.mubr.f32.mxu1 %v1087_v15  ;;  %v947_v19 = vadd.f32 %v5192_v3, %v946_v18  ;;  %v2209_v15 = vld [vmem:[%s6582_s7 + $0x38] sm:$0xff] }
 0x189   : > { %4351 = vmatmul.mubr.f32.gmra.mrb[42].mxu1 %v1088_v14  ;;  %v1090_v20 = vmax.f32 %v952_v17, 0.0  ;;  %v2205_v14 = vld [vmem:[%s6582_s7 + $0x18] sm:$0xff]  ;;  %v2207_v17 = vld [vmem:[%s6582_s7 + $0x28] sm:$0xff] }
 0x18a   : > { %v1089_v21 = vmax.f32 %v947_v19, 0.0  ;;  %v4230_v22 = vpop.f32.mrb[46].mxu0  ;;  %v4511_v16 = vpack.c.bf16 %v2209_v15, %v2205_v14  ;;  %v5296_v19 = vld [vmem:[%s6579_s4] ss:$0 sm:$0xff]  ;;  %v2257_v14 = vld [vmem:[%s6582_s7 + $0x1b8] sm:$0xff] }
 0x18b   : > { %v962_v23 = vadd.f32 %v4230_v22, %v5192_v3  ;;  %v956_v24 = vpop.f32.mrb[47].mxu0  ;;  %v2208_v22 = vld [vmem:[%s6582_s7 + $0x30] sm:$0xff] }
 0x18c   : > { %4353 = vmatprep.mubr.f32.mxu1 %v1089_v21  ;;  %v957_v25 = vadd.f32 %v5192_v3, %v956_v24  ;;  %4512 = vmatprep.subr.bf16.mxu0 %v4511_v16  ;;  %v2204_v21 = vld [vmem:[%s6582_s7 + $0x10] sm:$0xff]  ;;  %v2213_v24 = vld [vmem:[%s6582_s7 + $0x58] sm:$0xff] }
 0x18d   : > { %4354 = vmatmul.mubr.f32.gmra.mrb[44].mxu1 %v1090_v20  ;;  %v1092_v26 = vmax.f32 %v962_v23, 0.0 }
 0x18e   : > { %v1091_v28 = vmax.f32 %v957_v25, 0.0  ;;  %v4233_v29 = vpop.f32.mrb[48].mxu0  ;;  %v2217_v25 = vld [vmem:[%s6582_s7 + $0x78] sm:$0xff] }
 0x18f   : > { %v972_v31 = vadd.f32 %v4233_v29, %v5192_v3  ;;  %v966_v30 = vpop.f32.mrb[49].mxu0 }
 0x190   : > { %4356 = vmatprep.mubr.f32.mxu1 %v1091_v28  ;;  %v967_v32 = vadd.f32 %v5192_v3, %v966_v30  ;;  %v4513_v28 = vpack.c.bf16 %v2208_v22, %v2204_v21  ;;  %v2256_v21 = vld [vmem:[%s6582_s7 + $0x1b0] sm:$0xff] }
 0x191   : > { %4357 = vmatmul.mubr.f32.gmra.mrb[46].mxu1 %v1092_v26  ;;  %v1094_v33 = vmax.f32 %v972_v31, 0.0 }
 0x192   : > { %v1093_v34 = vmax.f32 %v967_v32, 0.0  ;;  %v4236_v35 = vpop.f32.mrb[50].mxu0  ;;  %v4515_v32 = vpack.c.bf16 %v2217_v25, %v2213_v24  ;;  %v2265_v24 = vld [vmem:[%s6582_s7 + $0x1f8] sm:$0xff] }
 0x193   : > { %v982_v37 = vadd.f32 %v4236_v35, %v5192_v3  ;;  %v976_v36 = vpop.f32.mrb[51].mxu0 }
 0x194   : > { %4359 = vmatprep.mubr.f32.mxu1 %v1093_v34  ;;  %v977_v38 = vadd.f32 %v5192_v3, %v976_v36  ;;  %v2216_v34 = vld [vmem:[%s6582_s7 + $0x70] sm:$0xff]  ;;  %v2225_v36 = vld [vmem:[%s6582_s7 + $0xb8] sm:$0xff] }
 0x195   : > { %4360 = vmatmul.mubr.f32.gmra.mrb[48].mxu1 %v1094_v33  ;;  %v1096_v39 = vmax.f32 %v982_v37, 0.0  ;;  %v2212_v33 = vld [vmem:[%s6582_s7 + $0x50] sm:$0xff]  ;;  %v2221_v37 = vld [vmem:[%s6582_s7 + $0x98] sm:$0xff] }
 0x196   : > { %v1095_v40 = vmax.f32 %v977_v38, 0.0  ;;  %v4239_v41 = vpop.f32.mrb[52].mxu0  ;;  %v4517_v38 = vpack.c.bf16 %v2216_v34, %v2212_v33  ;;  %v2269_v34 = vld [vmem:[%s6582_s7 + $0x218] sm:$0xff] }
 0x197   : > { %v992_v43 = vadd.f32 %v4239_v41, %v5192_v3  ;;  %v986_v42 = vpop.f32.mrb[53].mxu0 }
 0x198   : > { %4362 = vmatprep.mubr.f32.mxu1 %v1095_v40  ;;  %v987_v44 = vadd.f32 %v5192_v3, %v986_v42  ;;  %v2220_v42 = vld [vmem:[%s6582_s7 + $0x90] sm:$0xff] }
 0x199   : > { %4363 = vmatmul.mubr.f32.gmra.mrb[50].mxu1 %v1096_v39  ;;  %v1098_v45 = vmax.f32 %v992_v43, 0.0  ;;  %v4519_v43 = vpack.c.bf16 %v2225_v36, %v2221_v37 }
 0x19a   : > { %v1097_v46 = vmax.f32 %v987_v44, 0.0  ;;  %v4242_v47 = vpop.f32.mrb[54].mxu0  ;;  %v2224_v44 = vld [vmem:[%s6582_s7 + $0xb0] sm:$0xff] }
 0x19b   : > { %v1002_v49 = vadd.f32 %v4242_v47, %v5192_v3  ;;  %v996_v48 = vpop.f32.mrb[55].mxu0  ;;  %v2233_v47 = vld [vmem:[%s6582_s7 + $0xf8] sm:$0xff] }
 0x19c   : > { %4365 = vmatprep.mubr.f32.mxu1 %v1097_v46  ;;  %v997_v50 = vadd.f32 %v5192_v3, %v996_v48  ;;  %v2229_v46 = vld [vmem:[%s6582_s7 + $0xd8] sm:$0xff] }
 0x19d   : > { %4366 = vmatmul.mubr.f32.gmra.mrb[52].mxu1 %v1098_v45  ;;  %v1100_v51 = vmax.f32 %v1002_v49, 0.0  ;;  %v4521_v49 = vpack.c.bf16 %v2224_v44, %v2220_v42  ;;  %v2277_v44 = vld [vmem:[%s6582_s7 + $0x258] sm:$0xff] }
 0x19e   : > { %v1099_v52 = vmax.f32 %v997_v50, 0.0  ;;  %v4245_v53 = vpop.f32.mrb[56].mxu0 }
 0x19f   : > { %v1012_v55 = vadd.f32 %v4245_v53, %v5192_v3  ;;  %v1006_v54 = vpop.f32.mrb[57].mxu0  ;;  %v2228_v53 = vld [vmem:[%s6582_s7 + $0xd0] sm:$0xff] }
 0x1a0   : > { %4368 = vmatprep.mubr.f32.mxu1 %v1099_v52  ;;  %v1007_v56 = vadd.f32 %v5192_v3, %v1006_v54  ;;  %v4523_v52 = vpack.c.bf16 %v2233_v47, %v2229_v46 }
 0x1a1   : > { %4369 = vmatmul.mubr.f32.gmra.mrb[54].mxu1 %v1100_v51  ;;  %v1102_v57 = vmax.f32 %v1012_v55, 0.0  ;;  %v2232_v55 = vld [vmem:[%s6582_s7 + $0xf0] sm:$0xff] }
 0x1a2   : > { %v1101_v58 = vmax.f32 %v1007_v56, 0.0  ;;  %v4248_v59 = vpop.f32.mrb[58].mxu0  ;;  %v2237_v56 = vld [vmem:[%s6582_s7 + $0x118] sm:$0xff] }
 0x1a3   : > { %v1022_v61 = vadd.f32 %v4248_v59, %v5192_v3  ;;  %v1016_v60 = vpop.f32.mrb[59].mxu0 }
 0x1a4   : > { %4371 = vmatprep.mubr.f32.mxu1 %v1101_v58  ;;  %v1017_v62 = vadd.f32 %v5192_v3, %v1016_v60  ;;  %v4525_v58 = vpack.c.bf16 %v2232_v55, %v2228_v53  ;;  %v2285_v55 = vld [vmem:[%s6582_s7 + $0x298] sm:$0xff] }
 0x1a5   : > { %4372 = vmatmul.mubr.f32.gmra.mrb[56].mxu1 %v1102_v57  ;;  %v1104_v63 = vmax.f32 %v1022_v61, 0.0  ;;  %v2241_v57 = vld [vmem:[%s6582_s7 + $0x138] sm:$0xff] }
 0x1a6   : > { %v1103_v0 = vmax.f32 %v1017_v62, 0.0  ;;  %v4251_v1 = vpop.f32.mrb[60].mxu0  ;;  %v4527_v62 = vpack.c.bf16 %v2241_v57, %v2237_v56 }
 0x1a7   : > { %v1032_v4 = vadd.f32 %v4251_v1, %v5192_v3  ;;  %v1026_v5 = vpop.f32.mrb[61].mxu0 }
 0x1a8   : > { %4374 = vmatprep.mubr.f32.mxu1 %v1103_v0  ;;  %v1027_v2 = vadd.f32 %v5192_v3, %v1026_v5  ;;  %v2240_v0 = vld [vmem:[%s6582_s7 + $0x130] sm:$0xff]  ;;  %v2249_v5 = vld [vmem:[%s6582_s7 + $0x178] sm:$0xff] }
 0x1a9   : > { %4375 = vmatmul.mubr.f32.gmra.mrb[58].mxu1 %v1104_v63  ;;  %v1106_v6 = vmax.f32 %v1032_v4, 0.0  ;;  %v2236_v63 = vld [vmem:[%s6582_s7 + $0x110] sm:$0xff]  ;;  %v2245_v4 = vld [vmem:[%s6582_s7 + $0x158] sm:$0xff] }
 0x1aa   : > { %v1105_v7 = vmax.f32 %v1027_v2, 0.0  ;;  %v4254_v8 = vpop.f32.mrb[62].mxu0  ;;  %v4529_v2 = vpack.c.bf16 %v2240_v0, %v2236_v63  ;;  %v2293_v0 = vld [vmem:[%s6582_s7 + $0x2d8] sm:$0xff] }
 0x1ab   : > { %v1042_v9 = vadd.f32 %v4254_v8, %v5192_v3  ;;  %v1036_v10 = vpop.f32.mrb[63].mxu0 }
 0x1ac   : > { %4377 = vmatprep.mubr.f32.mxu1 %v1105_v7  ;;  %v1037_v11 = vadd.f32 %v5192_v3, %v1036_v10  ;;  %v2203_v3 = vld [vmem:[%s6582_s7 + $0x8] sm:$0xff]  ;;  %v2244_v10 = vld [vmem:[%s6582_s7 + $0x150] sm:$0xff] }
 0x1ad   : > { %4378 = vmatmul.mubr.f32.gmra.mrb[60].mxu1 %v1106_v6  ;;  %v1108_v12 = vmax.f32 %v1042_v9, 0.0  ;;  %v4447_v18 = vpack.c.bf16 %v2207_v17, %v2203_v3  ;;  %v4531_v9 = vpack.c.bf16 %v2249_v5, %v2245_v4 }
 0x1ae   : > { %v1107_v13 = vmax.f32 %v1037_v11, 0.0  ;;  %v2248_v11 = vld [vmem:[%s6582_s7 + $0x170] sm:$0xff] }
 0x1af   : > { %4448 = vmatprep.subr.bf16.mxu1 %v4447_v18  ;;  %v4533_v15 = vpack.c.bf16 %v2248_v11, %v2244_v10  ;;  %v2296_v10 = vld [vmem:[%s6582_s7 + $0x2f0] sm:$0xff] }
 0x1b0   : > { %4380 = vmatprep.mubr.f32.mxu1 %v1107_v13  ;;  %v2253_v13 = vld [vmem:[%s6582_s7 + $0x198] sm:$0xff] }
 0x1b1   : > { %4381 = vmatmul.mubr.f32.gmra.mrb[62].mxu1 %v1108_v12  ;;  %v4535_v18 = vpack.c.bf16 %v2257_v14, %v2253_v13 }
 0x1b2   : > { %1905 = vmatprep.mubr.f32.mxu1 %v4825_v27 }
 0x208   : > { %v4289_v20 = vpop.f32.mrb[0].mxu1 }
 0x209   : > { %v1198_v23 = vpop.f32.mrb[1].mxu1  ;;  %v1204_v29 = vadd.f32 %v4289_v20, %v5296_v19  ;;  %v2252_v20 = vld [vmem:[%s6582_s7 + $0x190] sm:$0xff] }
 0x20a   : > { %v1199_v26 = vadd.f32 %v5296_v19, %v1198_v23  ;;  %v2261_v23 = vld [vmem:[%s6582_s7 + $0x1d8] sm:$0xff]  ;;  %v4537_v25 = vpack.c.bf16 %v2256_v21, %v2252_v20  ;;  %v2304_v20 = vld [vmem:[%s6582_s7 + $0x330] sm:$0xff] }
 0x20b   : > { %v1518_v39 = vmax.f32 %v1204_v29, 0.0 }
 0x20c   : > { %v1517_v31 = vmax.f32 %v1199_v26, 0.0  ;;  %v4292_v30 = vpop.f32.mrb[2].mxu1 }
 0x20d   : > { %v1208_v35 = vpop.f32.mrb[3].mxu1  ;;  %v1214_v48 = vadd.f32 %v4292_v30, %v5296_v19  ;;  %v2260_v30 = vld [vmem:[%s6582_s7 + $0x1d0] sm:$0xff] }
 0x20e   : > { %1690 = vmatmul.mubr.f32.vlgmr.msra.gmra.mrb[64].mxu0 %v1517_v31  ;;  %v1209_v40 = vadd.f32 %v5296_v19, %v1208_v35  ;;  %v4539_v31 = vpack.c.bf16 %v2265_v24, %v2261_v23  ;;  %v2273_v35 = vld [vmem:[%s6582_s7 + $0x238] sm:$0xff] }
 0x20f   : > { %1695 = vmatprep.mubr.f32.mxu0 %v4825_v27  ;;  %4514 = vmatpush1.bf16.msra.mxu0 %v4513_v28  ;;  %v1520_v59 = vmax.f32 %v1214_v48, 0.0  ;;  %v2309_v23 = vld [vmem:[%s6582_s7 + $0x358] sm:$0xff] }
 0x210   : > { %v4295_v41 = vpop.f32.mrb[4].mxu1  ;;  %4516 = vmatprep.subr.bf16.mxu0 %v4515_v32  ;;  %v1519_v50 = vmax.f32 %v1209_v40, 0.0  ;;  %v2264_v32 = vld [vmem:[%s6582_s7 + $0x1f0] sm:$0xff]  ;;  %v4543_v40 = vpack.c.bf16 %v2273_v35, %v2269_v34  ;;  %v2317_v35 = vld [vmem:[%s6582_s7 + $0x398] sm:$0xff] }
 0x211   : > { %v1218_v45 = vpop.f32.mrb[5].mxu1  ;;  %v1224_v6 = vadd.f32 %v4295_v41, %v5296_v19  ;;  %v4541_v37 = vpack.c.bf16 %v2264_v32, %v2260_v30  ;;  %v2268_v41 = vld [vmem:[%s6582_s7 + $0x210] sm:$0xff] }
 0x212   : > { %1696 = vmatmul.mubr.f32.gmra.mrb[66].mxu0 %v1518_v39  ;;  %v1219_v61 = vadd.f32 %v5296_v19, %v1218_v45  ;;  %v2281_v45 = vld [vmem:[%s6582_s7 + $0x278] sm:$0xff]  ;;  %v2308_v30 = vld [vmem:[%s6582_s7 + $0x350] sm:$0xff] }
 0x213   : > { %1701 = vmatprep.mubr.f32.mxu0 %v4825_v27  ;;  %4518 = vmatpush1.bf16.msra.mxu0 %v4517_v38  ;;  %v1522_v16 = vmax.f32 %v1224_v6, 0.0  ;;  %v2312_v32 = vld [vmem:[%s6582_s7 + $0x370] sm:$0xff] }
 0x214   : > { %v4298_v51 = vpop.f32.mrb[6].mxu1  ;;  %4520 = vmatprep.subr.bf16.mxu0 %v4519_v43  ;;  %v1521_v7 = vmax.f32 %v1219_v61, 0.0  ;;  %v2272_v43 = vld [vmem:[%s6582_s7 + $0x230] sm:$0xff] }
 0x215   : > { %v1228_v54 = vpop.f32.mrb[7].mxu1  ;;  %v1234_v26 = vadd.f32 %v4298_v51, %v5296_v19  ;;  %v4545_v46 = vpack.c.bf16 %v2272_v43, %v2268_v41  ;;  %v2276_v51 = vld [vmem:[%s6582_s7 + $0x250] sm:$0xff] }
 0x216   : > { %1702 = vmatmul.mubr.f32.gmra.mrb[68].mxu0 %v1519_v50  ;;  %v1229_v3 = vadd.f32 %v5296_v19, %v1228_v54  ;;  %v4547_v50 = vpack.c.bf16 %v2281_v45, %v2277_v44  ;;  %v2289_v54 = vld [vmem:[%s6582_s7 + $0x2b8] sm:$0xff]  ;;  %v2316_v43 = vld [vmem:[%s6582_s7 + $0x390] sm:$0xff] }
 0x217   : > { %1707 = vmatprep.mubr.f32.mxu0 %v4825_v27  ;;  %4522 = vmatpush1.bf16.msra.mxu0 %v4521_v49  ;;  %v1524_v36 = vmax.f32 %v1234_v26, 0.0  ;;  %v4551_v61 = vpack.c.bf16 %v2289_v54, %v2285_v55  ;;  %v2320_v44 = vld [vmem:[%s6582_s7 + $0x3b0] sm:$0xff] }
 0x218   : > { %v5354_v60 = vpop.f32.mrb[8].mxu1  ;;  %4524 = vmatprep.subr.bf16.mxu0 %v4523_v52  ;;  %v1523_v28 = vmax.f32 %v1229_v3, 0.0  ;;  %v2280_v52 = vld [vmem:[%s6582_s7 + $0x270] sm:$0xff] }
 0x219   : > { %v1238_v1 = vpop.f32.mrb[9].mxu1  ;;  %v1244_v47 = vadd.f32 %v5354_v60, %v5296_v19  ;;  %v4549_v56 = vpack.c.bf16 %v2280_v52, %v2276_v51  ;;  %v2284_v60 = vld [vmem:[%s6582_s7 + $0x290] sm:$0xff] }
 0x21a   : > { %1708 = vmatmul.mubr.f32.gmra.mrb[70].mxu0 %v1520_v59  ;;  %v1239_v38 = vadd.f32 %v5296_v19, %v1238_v1  ;;  %v2297_v1 = vld [vmem:[%s6582_s7 + $0x2f8] sm:$0xff]  ;;  %v2324_v55 = vld [vmem:[%s6582_s7 + $0x3d0] sm:$0xff] }
 0x21b   : > { %1713 = vmatprep.mubr.f32.mxu0 %v4825_v27  ;;  %4526 = vmatpush1.bf16.msra.mxu0 %v4525_v58  ;;  %v1526_v57 = vmax.f32 %v1244_v47, 0.0  ;;  %v4569_v47 = vpack.c.bf16 %v2320_v44, %v2316_v43  ;;  %v2328_v54 = vld [vmem:[%s6582_s7 + $0x3f0] sm:$0xff] }
 0x21c   : > { %v5370_v8 = vpop.f32.mrb[10].mxu1  ;;  %4528 = vmatprep.subr.bf16.mxu0 %v4527_v62  ;;  %v1525_v49 = vmax.f32 %v1239_v38, 0.0  ;;  %v2288_v62 = vld [vmem:[%s6582_s7 + $0x2b0] sm:$0xff] }
 0x21d   : > { %v5378_v12 = vpop.f32.mrb[11].mxu1  ;;  %v4553_v4 = vpack.c.bf16 %v2288_v62, %v2284_v60  ;;  %v1254_v5 = vadd.f32 %v5370_v8, %v5296_v19  ;;  %v2305_v8 = vld [vmem:[%s6582_s7 + $0x338] sm:$0xff] }
 0x21e   : > { %1714 = vmatmul.mubr.f32.gmra.mrb[72].mxu0 %v1521_v7  ;;  %v1249_v58 = vadd.f32 %v5296_v19, %v5378_v12  ;;  %v4555_v7 = vpack.c.bf16 %v2297_v1, %v2293_v0  ;;  %v2301_v12 = vld [vmem:[%s6582_s7 + $0x318] sm:$0xff] }
 0x21f   : > { %1719 = vmatprep.mubr.f32.mxu0 %v4825_v27  ;;  %4530 = vmatpush1.bf16.msra.mxu0 %v4529_v2  ;;  %v1528_v14 = vmax.f32 %v1254_v5, 0.0  ;;  %v4559_v3 = vpack.c.bf16 %v2305_v8, %v2301_v12  ;;  %v2211_v8 = vld [vmem:[%s6582_s7 + $0x48] sm:$0xff] }
 0x220   : > { %v5388_v17 = vpop.f32.mrb[12].mxu1  ;;  %4532 = vmatprep.subr.bf16.mxu0 %v4531_v9  ;;  %v1527_v2 = vmax.f32 %v1249_v58, 0.0  ;;  %v2292_v9 = vld [vmem:[%s6582_s7 + $0x2d0] sm:$0xff] }
 0x221   : > { %v5396_v22 = vpop.f32.mrb[13].mxu1  ;;  %v4557_v13 = vpack.c.bf16 %v2296_v10, %v2292_v9  ;;  %v2202_v9 = vld [vmem:[%s6582_s7] sm:$0xff] }
 0x222   : > { %1720 = vmatmul.mubr.f32.gmra.mrb[74].mxu0 %v1522_v16 }
 0x223   : > { %1725 = vmatprep.mubr.f32.mxu0 %v4825_v27  ;;  %4534 = vmatpush1.bf16.msra.mxu0 %v4533_v15  ;;  %v1259_v15 = vadd.f32 %v5296_v19, %v5396_v22  ;;  %v2313_v22 = vld [vmem:[%s6582_s7 + $0x378] sm:$0xff] }
 0x224   : > { %v5406_v29 = vpop.f32.mrb[14].mxu1  ;;  %4536 = vmatprep.subr.bf16.mxu0 %v4535_v18  ;;  %v2300_v18 = vld [vmem:[%s6582_s7 + $0x310] sm:$0xff] }
 0x225   : > { %v5414_v33 = vpop.f32.mrb[15].mxu1  ;;  %v4561_v24 = vpack.c.bf16 %v2304_v20, %v2300_v18  ;;  %v1529_v26 = vmax.f32 %v1259_v15, 0.0 }
 0x226   : > { %1726 = vmatmul.mubr.f32.gmra.mrb[76].mxu0 %v1523_v28  ;;  %v1269_v38 = vadd.f32 %v5296_v19, %v5414_v33  ;;  %v2329_v33 = vld [vmem:[%s6582_s7 + $0x3f8] sm:$0xff] }
 0x227   : > { %1731 = vmatprep.mubr.f32.mxu0 %v4825_v27  ;;  %4538 = vmatpush1.bf16.msra.mxu0 %v4537_v25  ;;  %v1264_v25 = vadd.f32 %v5388_v17, %v5296_v19  ;;  %v2321_v17 = vld [vmem:[%s6582_s7 + $0x3b8] sm:$0xff] }
 0x228   : > { %v5424_v39 = vpop.f32.mrb[16].mxu1  ;;  %4540 = vmatprep.subr.bf16.mxu0 %v4539_v31  ;;  %v4563_v31 = vpack.c.bf16 %v2313_v22, %v2309_v23  ;;  %v4567_v41 = vpack.c.bf16 %v2321_v17, %v2317_v35  ;;  %v2210_v22 = vld [vmem:[%s6582_s7 + $0x40] sm:$0xff] }
 0x229   : > { %v5432_v42 = vpop.f32.mrb[17].mxu1  ;;  %v1284_v62 = vadd.f32 %v5424_v39, %v5296_v19  ;;  %v2206_v39 = vld [vmem:[%s6582_s7 + $0x20] sm:$0xff] }
 0x22a   : > { %1732 = vmatmul.mubr.f32.gmra.mrb[78].mxu0 %v1524_v36  ;;  %v1530_v36 = vmax.f32 %v1264_v25, 0.0  ;;  %v1279_v58 = vadd.f32 %v5296_v19, %v5432_v42  ;;  %v4449_v18 = vpack.c.bf16 %v2206_v39, %v2202_v9  ;;  %v2234_v39 = vld [vmem:[%s6582_s7 + $0x100] sm:$0xff] }
 0x22b   : > { %1737 = vmatprep.mubr.f32.mxu0 %v4825_v27  ;;  %4542 = vmatpush1.bf16.msra.mxu0 %v4541_v37  ;;  %v4565_v37 = vpack.c.bf16 %v2312_v32, %v2308_v30  ;;  %v1534_v42 = vmax.f32 %v1284_v62, 0.0  ;;  %v2239_v62 = vld [vmem:[%s6582_s7 + $0x128] sm:$0xff] }
 0x22c   : > { %v5443_v48 = vpop.f32.mrb[18].mxu1  ;;  %4544 = vmatprep.subr.bf16.mxu0 %v4543_v40  ;;  %v1533_v0 = vmax.f32 %v1279_v58, 0.0  ;;  %v2235_v58 = vld [vmem:[%s6582_s7 + $0x108] sm:$0xff] }
 0x22d   : > { %v5451_v53 = vpop.f32.mrb[19].mxu1  ;;  %v4463_v9 = vpack.c.bf16 %v2239_v62, %v2235_v58 }
 0x22e   : > { %1738 = vmatmul.mubr.f32.gmra.mrb[80].mxu0 %v1525_v49  ;;  %v1274_v49 = vadd.f32 %v5406_v29, %v5296_v19  ;;  %v4573_v29 = vpack.c.bf16 %v2328_v54, %v2324_v55  ;;  %v1289_v5 = vadd.f32 %v5296_v19, %v5451_v53  ;;  %v2215_v53 = vld [vmem:[%s6582_s7 + $0x68] sm:$0xff]  ;;  %v2226_v54 = vld [vmem:[%s6582_s7 + $0xc0] sm:$0xff] }
 0x22f   : > { %1743 = vmatprep.mubr.f32.mxu0 %v4825_v27  ;;  %4546 = vmatpush1.bf16.msra.mxu0 %v4545_v46  ;;  %v2325_v46 = vld [vmem:[%s6582_s7 + $0x3d8] sm:$0xff]  ;;  %v4451_v23 = vpack.c.bf16 %v2215_v53, %v2211_v8  ;;  %v2247_v53 = vld [vmem:[%s6582_s7 + $0x168] sm:$0xff] }
 0x230   : > { %v5462_v59 = vpop.f32.mrb[20].mxu1  ;;  %4548 = vmatprep.subr.bf16.mxu0 %v4547_v50  ;;  %v1531_v50 = vmax.f32 %v1269_v38, 0.0  ;;  %v4571_v52 = vpack.c.bf16 %v2329_v33, %v2325_v46  ;;  %v2218_v38 = vld [vmem:[%s6582_s7 + $0x80] sm:$0xff]  ;;  %v2231_v46 = vld [vmem:[%s6582_s7 + $0xe8] sm:$0xff] }
 0x231   : > { %v5470_v63 = vpop.f32.mrb[21].mxu1  ;;  %v1304_v33 = vadd.f32 %v5462_v59, %v5296_v19 }
 0x232   : > { %1744 = vmatmul.mubr.f32.gmra.mrb[82].mxu0 %v1526_v57  ;;  %v1532_v57 = vmax.f32 %v1274_v49, 0.0  ;;  %v1299_v32 = vadd.f32 %v5296_v19, %v5470_v63  ;;  %v2227_v63 = vld [vmem:[%s6582_s7 + $0xc8] sm:$0xff] }
 0x233   : > { %1749 = vmatprep.mubr.f32.mxu0 %v4825_v27  ;;  %4550 = vmatpush1.bf16.msra.mxu0 %v4549_v56  ;;  %v4459_v55 = vpack.c.bf16 %v2231_v46, %v2227_v63 }
 0x234   : > { %v5481_v6 = vpop.f32.mrb[22].mxu1  ;;  %4552 = vmatprep.subr.bf16.mxu0 %v4551_v61 }
 0x235   : > { %v5489_v11 = vpop.f32.mrb[23].mxu1 }
 0x236   : > { %1750 = vmatmul.mubr.f32.gmra.mrb[84].mxu0 %v1527_v2 }
 0x237   : > { %1755 = vmatprep.mubr.f32.mxu0 %v4825_v27  ;;  %4554 = vmatpush1.bf16.msra.mxu0 %v4553_v4 }
 0x238   : > { %v5500_v16 = vpop.f32.mrb[24].mxu1  ;;  %4556 = vmatprep.subr.bf16.mxu0 %v4555_v7 }
 0x239   : > { %v5508_v21 = vpop.f32.mrb[25].mxu1 }
 0x23a   : > { %1756 = vmatmul.mubr.f32.gmra.mrb[86].mxu0 %v1528_v14  ;;  %v1535_v14 = vmax.f32 %v1289_v5, 0.0 }
 0x23b   : > { %1761 = vmatprep.mubr.f32.mxu0 %v4825_v27  ;;  %4558 = vmatpush1.bf16.msra.mxu0 %v4557_v13  ;;  %v1294_v13 = vadd.f32 %v5443_v48, %v5296_v19  ;;  %v2219_v48 = vld [vmem:[%s6582_s7 + $0x88] sm:$0xff] }
 0x23c   : > { %v5519_v28 = vpop.f32.mrb[26].mxu1  ;;  %4560 = vmatprep.subr.bf16.mxu0 %v4559_v3 }
 0x23d   : > { %v5527_v34 = vpop.f32.mrb[27].mxu1  ;;  %v1536_v30 = vmax.f32 %v1294_v13, 0.0  ;;  %v1314_v13 = vadd.f32 %v5481_v6, %v5296_v19 }
 0x23e   : > { %1762 = vmatmul.mubr.f32.gmra.mrb[88].mxu0 %v1529_v26 }
 0x23f   : > { %1767 = vmatprep.mubr.f32.mxu0 %v4825_v27  ;;  %4562 = vmatpush1.bf16.msra.mxu0 %v4561_v24  ;;  %v2214_v24 = vld [vmem:[%s6582_s7 + $0x60] sm:$0xff] }
 0x240   : > { %v5538_v40 = vpop.f32.mrb[28].mxu1  ;;  %4564 = vmatprep.subr.bf16.mxu0 %v4563_v31  ;;  %v2223_v31 = vld [vmem:[%s6582_s7 + $0xa8] sm:$0xff]  ;;  %v4453_v17 = vpack.c.bf16 %v2214_v24, %v2210_v22  ;;  %v2246_v22 = vld [vmem:[%s6582_s7 + $0x160] sm:$0xff] }
 0x241   : > { %v5546_v45 = vpop.f32.mrb[29].mxu1 }
 0x242   : > { %1768 = vmatmul.mubr.f32.gmra.mrb[90].mxu0 %v1530_v36  ;;  %v4455_v36 = vpack.c.bf16 %v2223_v31, %v2219_v48  ;;  %v1540_v48 = vmax.f32 %v1314_v13, 0.0  ;;  %v1319_v31 = vadd.f32 %v5296_v19, %v5508_v21 }
 0x243   : > { %1773 = vmatprep.mubr.f32.mxu0 %v4825_v27  ;;  %4566 = vmatpush1.bf16.msra.mxu0 %v4565_v37 }
 0x244   : > { %v5557_v51 = vpop.f32.mrb[30].mxu1  ;;  %4568 = vmatprep.subr.bf16.mxu0 %v4567_v41  ;;  %v2222_v41 = vld [vmem:[%s6582_s7 + $0xa0] sm:$0xff]  ;;  %v1541_v63 = vmax.f32 %v1319_v31, 0.0 }
 0x245   : > { %v5565_v56 = vpop.f32.mrb[31].mxu1  ;;  %v2282_v31 = vld [vmem:[%s6582_s7 + $0x280] sm:$0xff] }
 0x246   : > { %1774 = vmatmul.mubr.f32.gmra.mrb[92].mxu0 %v1531_v50  ;;  %v4457_v50 = vpack.c.bf16 %v2222_v41, %v2218_v38  ;;  %v2259_v41 = vld [vmem:[%s6582_s7 + $0x1c8] sm:$0xff] }
 0x247   : > { %1779 = vmatprep.mubr.f32.mxu0 %v4825_v27  ;;  %4570 = vmatpush1.bf16.msra.mxu0 %v4569_v47  ;;  %v1537_v47 = vmax.f32 %v1299_v32, 0.0 }
 0x248   : > { %v5570_v61 = vpop.f32.mrb[32].mxu1  ;;  %4572 = vmatprep.subr.bf16.mxu0 %v4571_v52 }
 0x249   : > { %v5572_v60 = vpop.f32.mrb[33].mxu1 }
 0x24a   : > { %1780 = vmatmul.mubr.f32.gmra.mrb[94].mxu0 %v1532_v57 }
 0x24b   : > { %1785 = vmatprep.mubr.f32.mxu0 %v4825_v27  ;;  %4574 = vmatpush1.bf16.msra.mxu0 %v4573_v29  ;;  %v2230_v29 = vld [vmem:[%s6582_s7 + $0xe0] sm:$0xff] }
 0x24c   : > { %v5577_v1 = vpop.f32.mrb[34].mxu1 }
 0x24d   : > { %v5579_v4 = vpop.f32.mrb[35].mxu1 }
 0x24e   : > { %1786 = vmatmul.mubr.f32.gmra.mrb[96].mxu0 %v1533_v0  ;;  %v1538_v0 = vmax.f32 %v1304_v33, 0.0 }
 0x24f   : > { %1791 = vmatprep.mubr.f32.mxu0 %v4825_v27 }
 0x250   : > { %v4343_v2 = vpop.f32.mrb[36].mxu1 }
 0x251   : > { %v1378_v7 = vpop.f32.mrb[37].mxu1  ;;  %v1384_v10 = vadd.f32 %v4343_v2, %v5296_v19  ;;  %v4461_v2 = vpack.c.bf16 %v2230_v29, %v2226_v54  ;;  %v2267_v54 = vld [vmem:[%s6582_s7 + $0x208] sm:$0xff] }
 0x252   : > { %1792 = vmatmul.mubr.f32.gmra.mrb[98].mxu0 %v1534_v42  ;;  %v1379_v12 = vadd.f32 %v5296_v19, %v1378_v7  ;;  %v1309_v42 = vadd.f32 %v5296_v19, %v5489_v11  ;;  %v2243_v11 = vld [vmem:[%s6582_s7 + $0x148] sm:$0xff] }
 0x253   : > { %1797 = vmatprep.mubr.f32.mxu0 %v4825_v27  ;;  %v1554_v25 = vmax.f32 %v1384_v10, 0.0  ;;  %v2238_v10 = vld [vmem:[%s6582_s7 + $0x120] sm:$0xff]  ;;  %v2271_v29 = vld [vmem:[%s6582_s7 + $0x228] sm:$0xff] }
 0x254   : > { %v1553_v15 = vmax.f32 %v1379_v12, 0.0  ;;  %v4346_v3 = vpop.f32.mrb[38].mxu1 }
 0x255   : > { %v1388_v20 = vpop.f32.mrb[39].mxu1  ;;  %v1394_v43 = vadd.f32 %v4346_v3, %v5296_v19  ;;  %v4465_v3 = vpack.c.bf16 %v2238_v10, %v2234_v39  ;;  %v2275_v39 = vld [vmem:[%s6582_s7 + $0x248] sm:$0xff] }
 0x256   : > { %1798 = vmatmul.mubr.f32.gmra.mrb[100].mxu0 %v1535_v14  ;;  %1906 = vmatmul.mubr.f32.vlgmr.msra.gmra.mrb[64].mxu1 %v1553_v15  ;;  %v1389_v26 = vadd.f32 %v5296_v19, %v1388_v20  ;;  %v1539_v14 = vmax.f32 %v1309_v42, 0.0  ;;  %v4467_v20 = vpack.c.bf16 %v2247_v53, %v2243_v11  ;;  %v4479_v42 = vpack.c.bf16 %v2271_v29, %v2267_v54  ;;  %v2279_v10 = vld [vmem:[%s6582_s7 + $0x268] sm:$0xff] }
 0x257   : > { %1803 = vmatprep.mubr.f32.mxu0 %v4825_v27  ;;  %1911 = vmatprep.mubr.f32.mxu1 %v4825_v27  ;;  %v1556_v57 = vmax.f32 %v1394_v43, 0.0  ;;  %v2263_v43 = vld [vmem:[%s6582_s7 + $0x1e8] sm:$0xff]  ;;  %v4483_v13 = vpack.c.bf16 %v2279_v10, %v2275_v39 }
 0x258   : > { %4450 = vmatpush1.bf16.msra.mxu1 %v4449_v18  ;;  %v4349_v35 = vpop.f32.mrb[40].mxu1  ;;  %v1555_v44 = vmax.f32 %v1389_v26, 0.0  ;;  %v2255_v26 = vld [vmem:[%s6582_s7 + $0x1a8] sm:$0xff] }
 0x259   : > { %v1398_v37 = vpop.f32.mrb[41].mxu1  ;;  %4452 = vmatprep.subr.bf16.mxu1 %v4451_v23  ;;  %v1404_v12 = vadd.f32 %v4349_v35, %v5296_v19  ;;  %v2242_v23 = vld [vmem:[%s6582_s7 + $0x140] sm:$0xff] }
 0x25a   : > { %1804 = vmatmul.mubr.f32.gmra.mrb[102].mxu0 %v1536_v30  ;;  %1912 = vmatmul.mubr.f32.gmra.mrb[66].mxu1 %v1554_v25  ;;  %v1399_v59 = vadd.f32 %v5296_v19, %v1398_v37  ;;  %v2251_v25 = vld [vmem:[%s6582_s7 + $0x188] sm:$0xff]  ;;  %v4469_v32 = vpack.c.bf16 %v2246_v22, %v2242_v23  ;;  %v2250_v37 = vld [vmem:[%s6582_s7 + $0x180] sm:$0xff] }
 0x25b   : > { %1809 = vmatprep.mubr.f32.mxu0 %v4825_v27  ;;  %1917 = vmatprep.mubr.f32.mxu1 %v4825_v27  ;;  %v1558_v24 = vmax.f32 %v1404_v12, 0.0  ;;  %v1334_v12 = vadd.f32 %v5519_v28, %v5296_v19  ;;  %v2283_v23 = vld [vmem:[%s6582_s7 + $0x288] sm:$0xff] }
 0x25c   : > { %4454 = vmatpush1.bf16.msra.mxu1 %v4453_v17  ;;  %v4352_v49 = vpop.f32.mrb[42].mxu1  ;;  %v1557_v8 = vmax.f32 %v1399_v59, 0.0  ;;  %v4471_v17 = vpack.c.bf16 %v2255_v26, %v2251_v25  ;;  %v1329_v59 = vadd.f32 %v5296_v19, %v5527_v34  ;;  %v2287_v22 = vld [vmem:[%s6582_s7 + $0x2a8] sm:$0xff] }
 0x25d   : > { %v1408_v52 = vpop.f32.mrb[43].mxu1  ;;  %4456 = vmatprep.subr.bf16.mxu1 %v4455_v36  ;;  %v2254_v36 = vld [vmem:[%s6582_s7 + $0x1a0] sm:$0xff]  ;;  %v1414_v38 = vadd.f32 %v4352_v49, %v5296_v19  ;;  %v4475_v49 = vpack.c.bf16 %v2263_v43, %v2259_v41 }
 0x25e   : > { %1810 = vmatmul.mubr.f32.gmra.mrb[104].mxu0 %v1537_v47  ;;  %1918 = vmatmul.mubr.f32.gmra.mrb[68].mxu1 %v1555_v44  ;;  %v1409_v6 = vadd.f32 %v5296_v19, %v1408_v52  ;;  %v1324_v44 = vadd.f32 %v5500_v16, %v5296_v19  ;;  %v4473_v33 = vpack.c.bf16 %v2254_v36, %v2250_v37  ;;  %v2262_v52 = vld [vmem:[%s6582_s7 + $0x1e0] sm:$0xff]  ;;  %v2291_v37 = vld [vmem:[%s6582_s7 + $0x2c8] sm:$0xff] }
 0x25f   : > { %1815 = vmatprep.mubr.f32.mxu0 %v4825_v27  ;;  %1923 = vmatprep.mubr.f32.mxu1 %v4825_v27  ;;  %v2295_v36 = vld [vmem:[%s6582_s7 + $0x2e8] sm:$0xff] }
 0x260   : > { %4458 = vmatpush1.bf16.msra.mxu1 %v4457_v50  ;;  %v5652_v5 = vpop.f32.mrb[44].mxu1  ;;  %v1559_v21 = vmax.f32 %v1409_v6, 0.0  ;;  %v2258_v50 = vld [vmem:[%s6582_s7 + $0x1c0] sm:$0xff]  ;;  %v1339_v6 = vadd.f32 %v5296_v19, %v5546_v45 }
 0x261   : > { %v1418_v7 = vpop.f32.mrb[45].mxu1  ;;  %4460 = vmatprep.subr.bf16.mxu1 %v4459_v55  ;;  %v1560_v55 = vmax.f32 %v1414_v38, 0.0  ;;  %v4477_v58 = vpack.c.bf16 %v2262_v52, %v2258_v50  ;;  %v1424_v34 = vadd.f32 %v5652_v5, %v5296_v19  ;;  %v1344_v38 = vadd.f32 %v5538_v40, %v5296_v19  ;;  %v2299_v50 = vld [vmem:[%s6582_s7 + $0x308] sm:$0xff] }
 0x262   : > { %1816 = vmatmul.mubr.f32.gmra.mrb[106].mxu0 %v1538_v0  ;;  %1924 = vmatmul.mubr.f32.gmra.mrb[70].mxu1 %v1556_v57  ;;  %v1419_v16 = vadd.f32 %v5296_v19, %v1418_v7  ;;  %v1542_v57 = vmax.f32 %v1324_v44, 0.0  ;;  %v2270_v7 = vld [vmem:[%s6582_s7 + $0x220] sm:$0xff]  ;;  %v4491_v44 = vpack.c.bf16 %v2295_v36, %v2291_v37  ;;  %v2303_v52 = vld [vmem:[%s6582_s7 + $0x328] sm:$0xff] }
 0x263   : > { %1821 = vmatprep.mubr.f32.mxu0 %v4825_v27  ;;  %1929 = vmatprep.mubr.f32.mxu1 %v4825_v27  ;;  %v2326_v37 = vld [vmem:[%s6582_s7 + $0x3e0] sm:$0xff] }
 0x264   : > { %4462 = vmatpush1.bf16.msra.mxu1 %v4461_v2  ;;  %v5671_v15 = vpop.f32.mrb[46].mxu1  ;;  %v2266_v2 = vld [vmem:[%s6582_s7 + $0x200] sm:$0xff] }
 0x265   : > { %v5673_v18 = vpop.f32.mrb[47].mxu1  ;;  %4464 = vmatprep.subr.bf16.mxu1 %v4463_v9  ;;  %v1561_v9 = vmax.f32 %v1419_v16, 0.0  ;;  %v4481_v5 = vpack.c.bf16 %v2270_v7, %v2266_v2  ;;  %v1434_v45 = vadd.f32 %v5671_v15, %v5296_v19  ;;  %v1349_v16 = vadd.f32 %v5296_v19, %v5565_v56  ;;  %v2307_v2 = vld [vmem:[%s6582_s7 + $0x348] sm:$0xff] }
 0x266   : > { %1822 = vmatmul.mubr.f32.gmra.mrb[108].mxu0 %v1539_v14  ;;  %1930 = vmatmul.mubr.f32.gmra.mrb[72].mxu1 %v1557_v8  ;;  %v1543_v8 = vmax.f32 %v1329_v59, 0.0  ;;  %v2274_v14 = vld [vmem:[%s6582_s7 + $0x240] sm:$0xff]  ;;  %v1429_v28 = vadd.f32 %v5296_v19, %v5673_v18  ;;  %v2311_v7 = vld [vmem:[%s6582_s7 + $0x368] sm:$0xff] }
 0x267   : > { %1827 = vmatprep.mubr.f32.mxu0 %v4825_v27  ;;  %1935 = vmatprep.mubr.f32.mxu1 %v4825_v27  ;;  %v2298_v59 = vld [vmem:[%s6582_s7 + $0x300] sm:$0xff]  ;;  %v4499_v10 = vpack.c.bf16 %v2311_v7, %v2307_v2 }
 0x268   : > { %4466 = vmatpush1.bf16.msra.mxu1 %v4465_v3  ;;  %v5692_v30 = vpop.f32.mrb[48].mxu1  ;;  %v2278_v3 = vld [vmem:[%s6582_s7 + $0x260] sm:$0xff] }
 0x269   : > { %4468 = vmatprep.subr.bf16.mxu1 %v4467_v20  ;;  %v5694_v35 = vpop.f32.mrb[49].mxu1  ;;  %v1562_v20 = vmax.f32 %v1424_v34, 0.0  ;;  %v4485_v25 = vpack.c.bf16 %v2278_v3, %v2274_v14  ;;  %v1444_v56 = vadd.f32 %v5692_v30, %v5296_v19  ;;  %v1354_v34 = vadd.f32 %v5557_v51, %v5296_v19  ;;  %v2315_v14 = vld [vmem:[%s6582_s7 + $0x388] sm:$0xff] }
 0x26a   : > { %1828 = vmatmul.mubr.f32.gmra.mrb[110].mxu0 %v1540_v48  ;;  %1936 = vmatmul.mubr.f32.gmra.mrb[74].mxu1 %v1558_v24  ;;  %v1544_v24 = vmax.f32 %v1334_v12, 0.0  ;;  %v4487_v48 = vpack.c.bf16 %v2287_v22, %v2283_v23  ;;  %v1439_v40 = vadd.f32 %v5296_v19, %v5694_v35  ;;  %v2319_v3 = vld [vmem:[%s6582_s7 + $0x3a8] sm:$0xff]  ;;  %v2314_v22 = vld [vmem:[%s6582_s7 + $0x380] sm:$0xff] }
 0x26b   : > { %1833 = vmatprep.mubr.f32.mxu0 %v4825_v27  ;;  %1941 = vmatprep.mubr.f32.mxu1 %v4825_v27 }
 0x26c   : > { %4470 = vmatpush1.bf16.msra.mxu1 %v4469_v32  ;;  %v5713_v46 = vpop.f32.mrb[50].mxu1  ;;  %v2286_v32 = vld [vmem:[%s6582_s7 + $0x2a0] sm:$0xff] }
 0x26d   : > { %4472 = vmatprep.subr.bf16.mxu1 %v4471_v17  ;;  %v5715_v47 = vpop.f32.mrb[51].mxu1  ;;  %v1563_v17 = vmax.f32 %v1429_v28, 0.0  ;;  %v4489_v15 = vpack.c.bf16 %v2286_v32, %v2282_v31  ;;  %v1359_v28 = vadd.f32 %v5296_v19, %v5572_v60  ;;  %v2323_v60 = vld [vmem:[%s6582_s7 + $0x3c8] sm:$0xff]  ;;  %v1364_v31 = vadd.f32 %v5570_v61, %v5296_v19 }
 0x26e   : > { %1834 = vmatmul.mubr.f32.gmra.mrb[112].mxu0 %v1541_v63  ;;  %1942 = vmatmul.mubr.f32.gmra.mrb[76].mxu1 %v1559_v21  ;;  %v1545_v21 = vmax.f32 %v1339_v6, 0.0  ;;  %v2290_v63 = vld [vmem:[%s6582_s7 + $0x2c0] sm:$0xff]  ;;  %v1449_v51 = vadd.f32 %v5296_v19, %v5715_v47  ;;  %v4503_v47 = vpack.c.bf16 %v2319_v3, %v2315_v14  ;;  %v1454_v6 = vadd.f32 %v5713_v46, %v5296_v19 }
 0x26f   : > { %1839 = vmatprep.mubr.f32.mxu0 %v4825_v27  ;;  %1947 = vmatprep.mubr.f32.mxu1 %v4825_v27  ;;  %v1549_v32 = vmax.f32 %v1359_v28, 0.0  ;;  %v1550_v61 = vmax.f32 %v1364_v31, 0.0 }
 0x270   : > { %4474 = vmatpush1.bf16.msra.mxu1 %v4473_v33  ;;  %v5734_v62 = vpop.f32.mrb[52].mxu1  ;;  %v2294_v33 = vld [vmem:[%s6582_s7 + $0x2e0] sm:$0xff]  ;;  %v1568_v36 = vmax.f32 %v1454_v6, 0.0 }
 0x271   : > { %4476 = vmatprep.subr.bf16.mxu1 %v4475_v49  ;;  %v5736_v0 = vpop.f32.mrb[53].mxu1  ;;  %v1564_v49 = vmax.f32 %v1434_v45, 0.0  ;;  %v4493_v54 = vpack.c.bf16 %v2294_v33, %v2290_v63 }
 0x272   : > { %1840 = vmatmul.mubr.f32.gmra.mrb[114].mxu0 %v1542_v57  ;;  %1948 = vmatmul.mubr.f32.gmra.mrb[78].mxu1 %v1560_v55  ;;  %v1546_v55 = vmax.f32 %v1344_v38, 0.0  ;;  %v4495_v57 = vpack.c.bf16 %v2303_v52, %v2299_v50  ;;  %v1459_v38 = vadd.f32 %v5296_v19, %v5736_v0  ;;  %v4674_v0 = vld [vmem:[%s6579_s4] ss:$0 sm:$0xff] }
 0x273   : > { %1845 = vmatprep.mubr.f32.mxu0 %v4825_v27  ;;  %1953 = vmatprep.mubr.f32.mxu1 %v4825_v27  ;;  %v1374_v33 = vadd.f32 %v4674_v0, %v5577_v1 }
 0x274   : > { %4478 = vmatpush1.bf16.msra.mxu1 %v4477_v58  ;;  %v5756_v11 = vpop.f32.mrb[54].mxu1  ;;  %v2302_v58 = vld [vmem:[%s6582_s7 + $0x320] sm:$0xff]  ;;  %v1569_v63 = vmax.f32 %v1459_v38, 0.0 }
 0x275   : > { %4480 = vmatprep.subr.bf16.mxu1 %v4479_v42  ;;  %v5758_v53 = vpop.f32.mrb[55].mxu1  ;;  %v1565_v42 = vmax.f32 %v1439_v40, 0.0  ;;  %v4497_v30 = vpack.c.bf16 %v2302_v58, %v2298_v59 }
 0x276   : > { %1846 = vmatmul.mubr.f32.gmra.mrb[116].mxu0 %v1543_v8  ;;  %1954 = vmatmul.mubr.f32.gmra.mrb[80].mxu1 %v1561_v9  ;;  %v1547_v9 = vmax.f32 %v1349_v16, 0.0  ;;  %v2306_v8 = vld [vmem:[%s6582_s7 + $0x340] sm:$0xff]  ;;  %v1469_v40 = vadd.f32 %v4674_v0, %v5758_v53 }
 0x277   : > { %1851 = vmatprep.mubr.f32.mxu0 %v4825_v27  ;;  %1959 = vmatprep.mubr.f32.mxu1 %v4825_v27 }
 0x278   : > { %4482 = vmatpush1.bf16.msra.mxu1 %v4481_v5  ;;  %v5778_v26 = vpop.f32.mrb[56].mxu1  ;;  %v2310_v5 = vld [vmem:[%s6582_s7 + $0x360] sm:$0xff]  ;;  %v1571_v50 = vmax.f32 %v1469_v40, 0.0 }
 0x279   : > { %4484 = vmatprep.subr.bf16.mxu1 %v4483_v13  ;;  %v5780_v18 = vpop.f32.mrb[57].mxu1  ;;  %v1566_v13 = vmax.f32 %v1444_v56, 0.0  ;;  %v4501_v23 = vpack.c.bf16 %v2310_v5, %v2306_v8  ;;  %v1484_v53 = vadd.f32 %v4674_v0, %v5778_v26 }
 0x27a   : > { %1852 = vmatmul.mubr.f32.gmra.mrb[118].mxu0 %v1544_v24  ;;  %1960 = vmatmul.mubr.f32.gmra.mrb[82].mxu1 %v1562_v20  ;;  %v1548_v20 = vmax.f32 %v1354_v34, 0.0  ;;  %v2318_v24 = vld [vmem:[%s6582_s7 + $0x3a0] sm:$0xff]  ;;  %v1479_v52 = vadd.f32 %v4674_v0, %v5780_v18 }
 0x27b   : > { %1857 = vmatprep.mubr.f32.mxu0 %v4825_v27  ;;  %1965 = vmatprep.mubr.f32.mxu1 %v4825_v27  ;;  %v4505_v46 = vpack.c.bf16 %v2318_v24, %v2314_v22  ;;  %v1574_v16 = vmax.f32 %v1484_v53, 0.0  ;;  %v1613_v34 = vld [vmem:[%s6581_s6] sm:$0x3] }
 0x27c   : > { %4486 = vmatpush1.bf16.msra.mxu1 %v4485_v25  ;;  %v5800_v41 = vpop.f32.mrb[58].mxu1  ;;  %v1567_v25 = vmax.f32 %v1449_v51, 0.0 }
 0x27d   : > { %4488 = vmatprep.subr.bf16.mxu1 %v4487_v48  ;;  %v5802_v43 = vpop.f32.mrb[59].mxu1  ;;  %v2327_v48 = vld [vmem:[%s6582_s7 + $0x3e8] sm:$0xff] }
 0x27e   : > { %1858 = vmatmul.mubr.f32.gmra.mrb[120].mxu0 %v1545_v21  ;;  %1966 = vmatmul.mubr.f32.gmra.mrb[84].mxu1 %v1563_v17  ;;  %v4507_v45 = vpack.c.bf16 %v2327_v48, %v2323_v60  ;;  %v2322_v17 = vld [vmem:[%s6582_s7 + $0x3c0] sm:$0xff]  ;;  %v1369_v21 = vadd.f32 %v5296_v19, %v5579_v4 }
 0x27f   : > { %1863 = vmatprep.mubr.f32.mxu0 %v4825_v27  ;;  %1971 = vmatprep.mubr.f32.mxu1 %v4825_v27 }
 0x280   : > { %4490 = vmatpush1.bf16.msra.mxu1 %v4489_v15  ;;  %v5822_v29 = vpop.f32.mrb[60].mxu1  ;;  %v4509_v15 = vpack.c.bf16 %v2326_v37, %v2322_v17  ;;  %v1551_v4 = vmax.f32 %v1369_v21, 0.0 }
 0x281   : > { %4492 = vmatprep.subr.bf16.mxu1 %v4491_v44  ;;  %v5824_v35 = vpop.f32.mrb[61].mxu1  ;;  %v1464_v44 = vadd.f32 %v5734_v62, %v5296_v19  ;;  %v1552_v19 = vmax.f32 %v1374_v33, 0.0  ;;  %v1474_v62 = vadd.f32 %v4674_v0, %v5756_v11  ;;  %v1489_v11 = vadd.f32 %v4674_v0, %v5802_v43 }
 0x282   : > { %1864 = vmatmul.mubr.f32.gmra.mrb[122].mxu0 %v1546_v55  ;;  %1972 = vmatmul.mubr.f32.gmra.mrb[86].mxu1 %v1564_v49  ;;  %v1573_v55 = vmax.f32 %v1479_v52, 0.0  ;;  %v1499_v26 = vadd.f32 %v4674_v0, %v5824_v35  ;;  %v1504_v59 = vadd.f32 %v4674_v0, %v5822_v29  ;;  %v386_v29 = vlaneseq }
 0x283   : > { %1869 = vmatprep.mubr.f32.mxu0 %v4825_v27  ;;  %1977 = vmatprep.mubr.f32.mxu1 %v4825_v27  ;;  %v1570_v49 = vmax.f32 %v1464_v44, 0.0  ;;  %v1572_v1 = vmax.f32 %v1474_v62, 0.0 }
 0x284   : > { %4494 = vmatpush1.bf16.msra.mxu1 %v4493_v54  ;;  %v5844_v39 = vpop.f32.mrb[62].mxu1  ;;  %v1494_v54 = vadd.f32 %v4674_v0, %v5800_v41  ;;  %v1577_v58 = vmax.f32 %v1499_v26, 0.0  ;;  %v1578_v43 = vmax.f32 %v1504_v59, 0.0  ;;  %v5927_v2 = vshrl.u32 %v386_v29, 7 }
 0x285   : > { %4496 = vmatprep.subr.bf16.mxu1 %v4495_v57  ;;  %v5846_v12 = vpop.f32.mrb[63].mxu1  ;;  %v1575_v57 = vmax.f32 %v1489_v11, 0.0  ;;  %v1514_v56 = vadd.f32 %v4674_v0, %v5844_v39  ;;  %vm6400_vm2 = vcmp.lt.s32.totalorder %v386_v29, 512 }
 0x286   : > { %1870 = vmatmul.mubr.f32.gmra.mrb[124].mxu0 %v1547_v9  ;;  %1978 = vmatmul.mubr.f32.gmra.mrb[88].mxu1 %v1565_v42  ;;  %v1576_v18 = vmax.f32 %v1494_v54, 0.0  ;;  %v1509_v41 = vadd.f32 %v4674_v0, %v5846_v12  ;;  %v1617_v7 = vsub.s32 0, %v5927_v2  ;;  %v1621_v9 = vsub.s32 1, %v5927_v2 }
 0x287   : > { %1875 = vmatprep.mubr.f32.mxu0 %v4825_v27  ;;  %1983 = vmatprep.mubr.f32.mxu1 %v4825_v27  ;;  %v1580_v35 = vmax.f32 %v1514_v56, 0.0 }
 0x288   : > { %4498 = vmatpush1.bf16.msra.mxu1 %v4497_v30  ;;  %v1579_v42 = vmax.f32 %v1509_v41, 0.0  ;;  %v5936_v30 = vrot.slane %v1613_v34, %v1617_v7 }
 0x289   : > { %4500 = vmatprep.subr.bf16.mxu1 %v4499_v10 }
 0x28a   : > { %1876 = vmatmul.mubr.f32.gmra.mrb[126].mxu0 %v1548_v20  ;;  %1984 = vmatmul.mubr.f32.gmra.mrb[90].mxu1 %v1566_v13 }
 0x28b   : > { %1881 = vmatprep.mubr.f32.mxu0 %v4825_v27  ;;  %1989 = vmatprep.mubr.f32.mxu1 %v4825_v27 }
 0x28c   : > { %4502 = vmatpush1.bf16.msra.mxu1 %v4501_v23 }
 0x28d   : > { %4504 = vmatprep.subr.bf16.mxu1 %v4503_v47 }
 0x28e   : > { %1882 = vmatmul.mubr.f32.gmra.mrb[128].mxu0 %v1549_v32  ;;  %1990 = vmatmul.mubr.f32.gmra.mrb[92].mxu1 %v1567_v25 }
 0x28f   : > { %1887 = vmatprep.mubr.f32.mxu0 %v4825_v27  ;;  %1995 = vmatprep.mubr.f32.mxu1 %v4825_v27 }
 0x290   : > { %4506 = vmatpush1.bf16.msra.mxu1 %v4505_v46 }
 0x291   : > { %4508 = vmatprep.subr.bf16.mxu1 %v4507_v45 }
 0x292   : > { %1888 = vmatmul.mubr.f32.gmra.mrb[130].mxu0 %v1550_v61  ;;  %1996 = vmatmul.mubr.f32.gmra.mrb[94].mxu1 %v1568_v36 }
 0x293   : > { %1893 = vmatprep.mubr.f32.mxu0 %v4825_v27  ;;  %2001 = vmatprep.mubr.f32.mxu1 %v4825_v27 }
 0x294   : > { %4510 = vmatpush1.bf16.msra.mxu1 %v4509_v15 }
 0x296   : > { %1894 = vmatmul.mubr.f32.gmra.mrb[132].mxu0 %v1551_v4  ;;  %2002 = vmatmul.mubr.f32.gmra.mrb[96].mxu1 %v1569_v63 }
 0x297   : > { %1899 = vmatprep.mubr.f32.mxu0 %v4825_v27  ;;  %2007 = vmatprep.mubr.f32.mxu1 %v4825_v27 }
 0x29a   : > { %1900 = vmatmul.mubr.f32.gmra.mrb[134].mxu0 %v1552_v19  ;;  %2008 = vmatmul.mubr.f32.gmra.mrb[98].mxu1 %v1570_v49 }
 0x29b   : > { %2013 = vmatprep.mubr.f32.mxu1 %v4825_v27 }
 0x29e   : > { %2014 = vmatmul.mubr.f32.gmra.mrb[100].mxu1 %v1571_v50 }
 0x29f   : > { %2019 = vmatprep.mubr.f32.mxu1 %v4825_v27 }
 0x2a2   : > { %2020 = vmatmul.mubr.f32.gmra.mrb[102].mxu1 %v1572_v1 }
 0x2a3   : > { %2025 = vmatprep.mubr.f32.mxu1 %v4825_v27 }
 0x2a6   : > { %2026 = vmatmul.mubr.f32.gmra.mrb[104].mxu1 %v1573_v55 }
 0x2a7   : > { %2031 = vmatprep.mubr.f32.mxu1 %v4825_v27 }
 0x2aa   : > { %2032 = vmatmul.mubr.f32.gmra.mrb[106].mxu1 %v1574_v16 }
 0x2ab   : > { %2037 = vmatprep.mubr.f32.mxu1 %v4825_v27 }
 0x2ae   : > { %2038 = vmatmul.mubr.f32.gmra.mrb[108].mxu1 %v1575_v57 }
 0x2af   : > { %2043 = vmatprep.mubr.f32.mxu1 %v4825_v27 }
 0x2b2   : > { %2044 = vmatmul.mubr.f32.gmra.mrb[110].mxu1 %v1576_v18 }
 0x2b3   : > { %2049 = vmatprep.mubr.f32.mxu1 %v4825_v27 }
 0x2b6   : > { %2050 = vmatmul.mubr.f32.gmra.mrb[112].mxu1 %v1577_v58 }
 0x2b7   : > { %2055 = vmatprep.mubr.f32.mxu1 %v4825_v27 }
 0x2ba   : > { %2056 = vmatmul.mubr.f32.gmra.mrb[114].mxu1 %v1578_v43 }
 0x2bb   : > { %2061 = vmatprep.mubr.f32.mxu1 %v4825_v27 }
 0x2be   : > { %2062 = vmatmul.mubr.f32.gmra.mrb[116].mxu1 %v1579_v42 }
 0x2bf   : > { %2067 = vmatprep.mubr.f32.mxu1 %v4825_v27  ;;  %v5940_v27 = vrot.slane %v1613_v34, %v1621_v9 }
 0x2c2   : > { %2068 = vmatmul.mubr.f32.gmra.mrb[118].mxu1 %v1580_v35 }
 0x2e1   : > { %v1691_v39 = vpop.f32.mrb[64].mxu0 }
 0x2e2   : > { %v1692_v10 = vadd.f32 %v1691_v39, %v5936_v30  ;;  %v1693_v12 = vpop.f32.mrb[65].mxu0 }
 0x2e3   : > { %v1694_v8 = vadd.f32 %v1693_v12, %v5940_v27 }
 0x2e4   : > { %v2074_v51 = vmax.f32 %v1692_v10, 0.0 }
 0x2e5   : > { %v2075_v5 = vmax.f32 %v1694_v8, 0.0  ;;  %v1697_v13 = vpop.f32.mrb[66].mxu0 }
 0x2e6   : > { %v1698_v14 = vadd.f32 %v1697_v13, %v5936_v30  ;;  %v1699_v3 = vpop.f32.mrb[67].mxu0 }
 0x2e7   : > { %v1700_v20 = vadd.f32 %v1699_v3, %v5940_v27  ;;  %2416 = vmatprep.mubr.f32.mxu1 %v2075_v5  ;;  %2865 = vmatprep.mubr.f32.mxu0 %v2075_v5 }
 0x2e8   : > { %2417 = vmatmul.mubr.f32.vlgmr.msra.gmra.mrb[120].mxu1 %v2074_v51  ;;  %2866 = vmatmul.mubr.f32.vlgmr.msra.gmra.mrb[136].mxu0 %v2074_v51  ;;  %v2076_v47 = vmax.f32 %v1698_v14, 0.0 }
 0x2e9   : > { %v2077_v28 = vmax.f32 %v1700_v20, 0.0  ;;  %v1703_v23 = vpop.f32.mrb[68].mxu0 }
 0x2ea   : > { %v1704_v22 = vadd.f32 %v1703_v23, %v5936_v30  ;;  %v1705_v24 = vpop.f32.mrb[69].mxu0 }
 0x2eb   : > { %v1706_v6 = vadd.f32 %v1705_v24, %v5940_v27  ;;  %2422 = vmatprep.mubr.f32.mxu1 %v2077_v28  ;;  %2871 = vmatprep.mubr.f32.mxu0 %v2077_v28 }
 0x2ec   : > { %2423 = vmatmul.mubr.f32.gmra.mrb[122].mxu1 %v2076_v47  ;;  %2872 = vmatmul.mubr.f32.gmra.mrb[138].mxu0 %v2076_v47  ;;  %v2078_v48 = vmax.f32 %v1704_v22, 0.0 }
 0x2ed   : > { %v2079_v25 = vmax.f32 %v1706_v6, 0.0  ;;  %v1709_v60 = vpop.f32.mrb[70].mxu0 }
 0x2ee   : > { %v1710_v31 = vadd.f32 %v1709_v60, %v5936_v30  ;;  %v1711_v32 = vpop.f32.mrb[71].mxu0 }
 0x2ef   : > { %v1712_v46 = vadd.f32 %v1711_v32, %v5940_v27  ;;  %2428 = vmatprep.mubr.f32.mxu1 %v2079_v25  ;;  %2877 = vmatprep.mubr.f32.mxu0 %v2079_v25 }
 0x2f0   : > { %2429 = vmatmul.mubr.f32.gmra.mrb[124].mxu1 %v2078_v48  ;;  %2878 = vmatmul.mubr.f32.gmra.mrb[140].mxu0 %v2078_v48  ;;  %v2080_v37 = vmax.f32 %v1710_v31, 0.0 }
 0x2f1   : > { %v2081_v45 = vmax.f32 %v1712_v46, 0.0  ;;  %v1715_v17 = vpop.f32.mrb[72].mxu0 }
 0x2f2   : > { %v1716_v36 = vadd.f32 %v1715_v17, %v5936_v30  ;;  %v1717_v38 = vpop.f32.mrb[73].mxu0 }
 0x2f3   : > { %v1718_v61 = vadd.f32 %v1717_v38, %v5940_v27  ;;  %2434 = vmatprep.mubr.f32.mxu1 %v2081_v45  ;;  %2883 = vmatprep.mubr.f32.mxu0 %v2081_v45 }
 0x2f4   : > { %2435 = vmatmul.mubr.f32.gmra.mrb[126].mxu1 %v2080_v37  ;;  %2884 = vmatmul.mubr.f32.gmra.mrb[142].mxu0 %v2080_v37  ;;  %v2082_v44 = vmax.f32 %v1716_v36, 0.0 }
 0x2f5   : > { %v2083_v21 = vmax.f32 %v1718_v61, 0.0  ;;  %v1721_v15 = vpop.f32.mrb[74].mxu0 }
 0x2f6   : > { %v1722_v63 = vadd.f32 %v1721_v15, %v5936_v30  ;;  %v1723_v0 = vpop.f32.mrb[75].mxu0 }
 0x2f7   : > { %v1724_v33 = vadd.f32 %v1723_v0, %v5940_v27  ;;  %2440 = vmatprep.mubr.f32.mxu1 %v2083_v21  ;;  %2889 = vmatprep.mubr.f32.mxu0 %v2083_v21 }
 0x2f8   : > { %2441 = vmatmul.mubr.f32.gmra.mrb[128].mxu1 %v2082_v44  ;;  %2890 = vmatmul.mubr.f32.gmra.mrb[144].mxu0 %v2082_v44  ;;  %v2084_v40 = vmax.f32 %v1722_v63, 0.0 }
 0x2f9   : > { %v2085_v4 = vmax.f32 %v1724_v33, 0.0  ;;  %v1727_v49 = vpop.f32.mrb[76].mxu0 }
 0x2fa   : > { %v1728_v19 = vadd.f32 %v1727_v49, %v5936_v30  ;;  %v1729_v62 = vpop.f32.mrb[77].mxu0 }
 0x2fb   : > { %v1730_v50 = vadd.f32 %v1729_v62, %v5940_v27  ;;  %2446 = vmatprep.mubr.f32.mxu1 %v2085_v4  ;;  %2895 = vmatprep.mubr.f32.mxu0 %v2085_v4 }
 0x2fc   : > { %2447 = vmatmul.mubr.f32.gmra.mrb[130].mxu1 %v2084_v40  ;;  %2896 = vmatmul.mubr.f32.gmra.mrb[146].mxu0 %v2084_v40  ;;  %v2086_v53 = vmax.f32 %v1728_v19, 0.0 }
 0x2fd   : > { %v2087_v1 = vmax.f32 %v1730_v50, 0.0  ;;  %v1733_v52 = vpop.f32.mrb[78].mxu0 }
 0x2fe   : > { %v1734_v55 = vadd.f32 %v1733_v52, %v5936_v30  ;;  %v1735_v16 = vpop.f32.mrb[79].mxu0 }
 0x2ff   : > { %v1736_v11 = vadd.f32 %v1735_v16, %v5940_v27  ;;  %2452 = vmatprep.mubr.f32.mxu1 %v2087_v1  ;;  %2901 = vmatprep.mubr.f32.mxu0 %v2087_v1 }
 0x300   : > { %2453 = vmatmul.mubr.f32.gmra.mrb[132].mxu1 %v2086_v53  ;;  %2902 = vmatmul.mubr.f32.gmra.mrb[148].mxu0 %v2086_v53  ;;  %v2088_v18 = vmax.f32 %v1734_v55, 0.0 }
 0x301   : > { %v2089_v54 = vmax.f32 %v1736_v11, 0.0  ;;  %v1739_v57 = vpop.f32.mrb[80].mxu0 }
 0x302   : > { %v1740_v26 = vadd.f32 %v1739_v57, %v5936_v30  ;;  %v1741_v59 = vpop.f32.mrb[81].mxu0 }
 0x303   : > { %v1742_v58 = vadd.f32 %v1741_v59, %v5940_v27  ;;  %2458 = vmatprep.mubr.f32.mxu1 %v2089_v54  ;;  %2907 = vmatprep.mubr.f32.mxu0 %v2089_v54 }
 0x304   : > { %2459 = vmatmul.mubr.f32.gmra.mrb[134].mxu1 %v2088_v18  ;;  %2908 = vmatmul.mubr.f32.gmra.mrb[150].mxu0 %v2088_v18  ;;  %v2090_v56 = vmax.f32 %v1740_v26, 0.0 }
 0x305   : > { %v2091_v43 = vmax.f32 %v1742_v58, 0.0  ;;  %v1745_v41 = vpop.f32.mrb[82].mxu0 }
 0x306   : > { %v1746_v42 = vadd.f32 %v1745_v41, %v5936_v30  ;;  %v1747_v35 = vpop.f32.mrb[83].mxu0 }
 0x307   : > { %v1748_v34 = vadd.f32 %v1747_v35, %v5940_v27  ;;  %2464 = vmatprep.mubr.f32.mxu1 %v2091_v43  ;;  %2913 = vmatprep.mubr.f32.mxu0 %v2091_v43 }
 0x308   : > { %2465 = vmatmul.mubr.f32.gmra.mrb[136].mxu1 %v2090_v56  ;;  %2914 = vmatmul.mubr.f32.gmra.mrb[152].mxu0 %v2090_v56  ;;  %v2092_v12 = vmax.f32 %v1746_v42, 0.0 }
 0x309   : > { %v2093_v39 = vmax.f32 %v1748_v34, 0.0  ;;  %v1751_v10 = vpop.f32.mrb[84].mxu0 }
 0x30a   : > { %v1752_v8 = vadd.f32 %v1751_v10, %v5936_v30  ;;  %v1753_v5 = vpop.f32.mrb[85].mxu0 }
 0x30b   : > { %v1754_v13 = vadd.f32 %v1753_v5, %v5940_v27  ;;  %2470 = vmatprep.mubr.f32.mxu1 %v2093_v39  ;;  %2919 = vmatprep.mubr.f32.mxu0 %v2093_v39 }
 0x30c   : > { %2471 = vmatmul.mubr.f32.gmra.mrb[138].mxu1 %v2092_v12  ;;  %2920 = vmatmul.mubr.f32.gmra.mrb[154].mxu0 %v2092_v12  ;;  %v2094_v3 = vmax.f32 %v1752_v8, 0.0 }
 0x30d   : > { %v2095_v51 = vmax.f32 %v1754_v13, 0.0  ;;  %v1757_v14 = vpop.f32.mrb[86].mxu0 }
 0x30e   : > { %v1758_v20 = vadd.f32 %v1757_v14, %v5936_v30  ;;  %v1759_v28 = vpop.f32.mrb[87].mxu0 }
 0x30f   : > { %v1760_v23 = vadd.f32 %v1759_v28, %v5940_v27  ;;  %2476 = vmatprep.mubr.f32.mxu1 %v2095_v51  ;;  %2925 = vmatprep.mubr.f32.mxu0 %v2095_v51 }
 0x310   : > { %2477 = vmatmul.mubr.f32.gmra.mrb[140].mxu1 %v2094_v3  ;;  %2926 = vmatmul.mubr.f32.gmra.mrb[156].mxu0 %v2094_v3  ;;  %v2096_v24 = vmax.f32 %v1758_v20, 0.0 }
 0x311   : > { %v2097_v47 = vmax.f32 %v1760_v23, 0.0  ;;  %v1763_v22 = vpop.f32.mrb[88].mxu0 }
 0x312   : > { %v1764_v6 = vadd.f32 %v1763_v22, %v5936_v30  ;;  %v1765_v25 = vpop.f32.mrb[89].mxu0 }
 0x313   : > { %v1766_v60 = vadd.f32 %v1765_v25, %v5940_v27  ;;  %2482 = vmatprep.mubr.f32.mxu1 %v2097_v47  ;;  %2931 = vmatprep.mubr.f32.mxu0 %v2097_v47 }
 0x314   : > { %2483 = vmatmul.mubr.f32.gmra.mrb[142].mxu1 %v2096_v24  ;;  %2932 = vmatmul.mubr.f32.gmra.mrb[158].mxu0 %v2096_v24  ;;  %v2098_v32 = vmax.f32 %v1764_v6, 0.0 }
 0x315   : > { %v2099_v48 = vmax.f32 %v1766_v60, 0.0  ;;  %v1769_v31 = vpop.f32.mrb[90].mxu0 }
 0x316   : > { %v1770_v46 = vadd.f32 %v1769_v31, %v5936_v30  ;;  %v1771_v45 = vpop.f32.mrb[91].mxu0 }
 0x317   : > { %v1772_v17 = vadd.f32 %v1771_v45, %v5940_v27  ;;  %2488 = vmatprep.mubr.f32.mxu1 %v2099_v48  ;;  %2937 = vmatprep.mubr.f32.mxu0 %v2099_v48 }
 0x318   : > { %2489 = vmatmul.mubr.f32.gmra.mrb[144].mxu1 %v2098_v32  ;;  %2938 = vmatmul.mubr.f32.gmra.mrb[160].mxu0 %v2098_v32  ;;  %v2100_v38 = vmax.f32 %v1770_v46, 0.0 }
 0x319   : > { %v2101_v37 = vmax.f32 %v1772_v17, 0.0  ;;  %v1775_v36 = vpop.f32.mrb[92].mxu0 }
 0x31a   : > { %v1776_v61 = vadd.f32 %v1775_v36, %v5936_v30  ;;  %v1777_v21 = vpop.f32.mrb[93].mxu0 }
 0x31b   : > { %v1778_v15 = vadd.f32 %v1777_v21, %v5940_v27  ;;  %2494 = vmatprep.mubr.f32.mxu1 %v2101_v37  ;;  %2943 = vmatprep.mubr.f32.mxu0 %v2101_v37 }
 0x31c   : > { %2495 = vmatmul.mubr.f32.gmra.mrb[146].mxu1 %v2100_v38  ;;  %2944 = vmatmul.mubr.f32.gmra.mrb[162].mxu0 %v2100_v38  ;;  %v2102_v0 = vmax.f32 %v1776_v61, 0.0 }
 0x31d   : > { %v2103_v44 = vmax.f32 %v1778_v15, 0.0  ;;  %v1781_v63 = vpop.f32.mrb[94].mxu0 }
 0x31e   : > { %v1782_v33 = vadd.f32 %v1781_v63, %v5936_v30  ;;  %v1783_v4 = vpop.f32.mrb[95].mxu0 }
 0x31f   : > { %v1784_v49 = vadd.f32 %v1783_v4, %v5940_v27  ;;  %2500 = vmatprep.mubr.f32.mxu1 %v2103_v44  ;;  %2949 = vmatprep.mubr.f32.mxu0 %v2103_v44 }
 0x320   : > { %2501 = vmatmul.mubr.f32.gmra.mrb[148].mxu1 %v2102_v0  ;;  %2950 = vmatmul.mubr.f32.gmra.mrb[164].mxu0 %v2102_v0  ;;  %v2104_v62 = vmax.f32 %v1782_v33, 0.0 }
 0x321   : > { %v2105_v40 = vmax.f32 %v1784_v49, 0.0  ;;  %v1787_v19 = vpop.f32.mrb[96].mxu0 }
 0x322   : > { %v1788_v50 = vadd.f32 %v1787_v19, %v5936_v30  ;;  %v1789_v1 = vpop.f32.mrb[97].mxu0 }
 0x323   : > { %v1790_v52 = vadd.f32 %v1789_v1, %v5940_v27  ;;  %2506 = vmatprep.mubr.f32.mxu1 %v2105_v40  ;;  %2955 = vmatprep.mubr.f32.mxu0 %v2105_v40 }
 0x324   : > { %2507 = vmatmul.mubr.f32.gmra.mrb[150].mxu1 %v2104_v62  ;;  %2956 = vmatmul.mubr.f32.gmra.mrb[166].mxu0 %v2104_v62  ;;  %v2106_v16 = vmax.f32 %v1788_v50, 0.0 }
 0x325   : > { %v2107_v53 = vmax.f32 %v1790_v52, 0.0  ;;  %v1793_v55 = vpop.f32.mrb[98].mxu0 }
 0x326   : > { %v1794_v11 = vadd.f32 %v1793_v55, %v5936_v30  ;;  %v1795_v54 = vpop.f32.mrb[99].mxu0 }
 0x327   : > { %v1796_v57 = vadd.f32 %v1795_v54, %v5940_v27  ;;  %2512 = vmatprep.mubr.f32.mxu1 %v2107_v53  ;;  %2961 = vmatprep.mubr.f32.mxu0 %v2107_v53 }
 0x328   : > { %2513 = vmatmul.mubr.f32.gmra.mrb[152].mxu1 %v2106_v16  ;;  %2962 = vmatmul.mubr.f32.gmra.mrb[168].mxu0 %v2106_v16  ;;  %v2108_v58 = vmax.f32 %v1794_v11, 0.0 }
 0x329   : > { %v2109_v18 = vmax.f32 %v1796_v57, 0.0  ;;  %v1799_v26 = vpop.f32.mrb[100].mxu0  ;;  %v5978_v59 = vpop.f32.mrb[64].mxu1 }
 0x32a   : > { %v1800_v43 = vadd.f32 %v1799_v26, %v5936_v30  ;;  %v1801_v41 = vpop.f32.mrb[101].mxu0  ;;  %v5981_v56 = vpop.f32.mrb[65].mxu1 }
 0x32b   : > { %v1802_v42 = vadd.f32 %v1801_v41, %v5940_v27  ;;  %2518 = vmatprep.mubr.f32.mxu1 %v2109_v18  ;;  %2967 = vmatprep.mubr.f32.mxu0 %v2109_v18 }
 0x32c   : > { %2519 = vmatmul.mubr.f32.gmra.mrb[154].mxu1 %v2108_v58  ;;  %2968 = vmatmul.mubr.f32.gmra.mrb[170].mxu0 %v2108_v58  ;;  %v2110_v10 = vmax.f32 %v1800_v43, 0.0 }
 0x32d   : > { %v2111_v35 = vmax.f32 %v1802_v42, 0.0  ;;  %v1805_v34 = vpop.f32.mrb[102].mxu0  ;;  %v5984_v39 = vpop.f32.mrb[66].mxu1 }
 0x32e   : > { %v1806_v12 = vadd.f32 %v1805_v34, %v5936_v30  ;;  %v1807_v8 = vpop.f32.mrb[103].mxu0  ;;  %v5987_v5 = vpop.f32.mrb[67].mxu1 }
 0x32f   : > { %v1808_v13 = vadd.f32 %v1807_v8, %v5940_v27  ;;  %2524 = vmatprep.mubr.f32.mxu1 %v2111_v35  ;;  %2973 = vmatprep.mubr.f32.mxu0 %v2111_v35 }
 0x330   : > { %2525 = vmatmul.mubr.f32.gmra.mrb[156].mxu1 %v2110_v10  ;;  %2974 = vmatmul.mubr.f32.gmra.mrb[172].mxu0 %v2110_v10  ;;  %v2112_v20 = vmax.f32 %v1806_v12, 0.0 }
 0x331   : > { %v2113_v51 = vmax.f32 %v1808_v13, 0.0  ;;  %v1811_v14 = vpop.f32.mrb[104].mxu0  ;;  %v5990_v3 = vpop.f32.mrb[68].mxu1 }
 0x332   : > { %v1812_v28 = vadd.f32 %v1811_v14, %v5936_v30  ;;  %v1813_v23 = vpop.f32.mrb[105].mxu0  ;;  %v5993_v47 = vpop.f32.mrb[69].mxu1 }
 0x333   : > { %v1814_v22 = vadd.f32 %v1813_v23, %v5940_v27  ;;  %2530 = vmatprep.mubr.f32.mxu1 %v2113_v51  ;;  %2979 = vmatprep.mubr.f32.mxu0 %v2113_v51 }
 0x334   : > { %2531 = vmatmul.mubr.f32.gmra.mrb[158].mxu1 %v2112_v20  ;;  %2980 = vmatmul.mubr.f32.gmra.mrb[174].mxu0 %v2112_v20  ;;  %v2114_v60 = vmax.f32 %v1812_v28, 0.0 }
 0x335   : > { %v2115_v24 = vmax.f32 %v1814_v22, 0.0  ;;  %v1817_v6 = vpop.f32.mrb[106].mxu0  ;;  %v5996_v25 = vpop.f32.mrb[70].mxu1 }
 0x336   : > { %v1818_v48 = vadd.f32 %v1817_v6, %v5936_v30  ;;  %v1819_v31 = vpop.f32.mrb[107].mxu0  ;;  %v5999_v32 = vpop.f32.mrb[71].mxu1 }
 0x337   : > { %v1820_v46 = vadd.f32 %v1819_v31, %v5940_v27  ;;  %2536 = vmatprep.mubr.f32.mxu1 %v2115_v24  ;;  %2985 = vmatprep.mubr.f32.mxu0 %v2115_v24 }
 0x338   : > { %2537 = vmatmul.mubr.f32.gmra.mrb[160].mxu1 %v2114_v60  ;;  %2986 = vmatmul.mubr.f32.gmra.mrb[176].mxu0 %v2114_v60  ;;  %v2116_v36 = vmax.f32 %v1818_v48, 0.0 }
 0x339   : > { %v2117_v45 = vmax.f32 %v1820_v46, 0.0  ;;  %v1823_v17 = vpop.f32.mrb[108].mxu0  ;;  %v6002_v37 = vpop.f32.mrb[72].mxu1 }
 0x33a   : > { %v1824_v38 = vadd.f32 %v1823_v17, %v5936_v30  ;;  %v1825_v61 = vpop.f32.mrb[109].mxu0  ;;  %v6005_v21 = vpop.f32.mrb[73].mxu1 }
 0x33b   : > { %v1826_v15 = vadd.f32 %v1825_v61, %v5940_v27  ;;  %2542 = vmatprep.mubr.f32.mxu1 %v2117_v45  ;;  %2991 = vmatprep.mubr.f32.mxu0 %v2117_v45 }
 0x33c   : > { %2543 = vmatmul.mubr.f32.gmra.mrb[162].mxu1 %v2116_v36  ;;  %2992 = vmatmul.mubr.f32.gmra.mrb[178].mxu0 %v2116_v36  ;;  %v2118_v33 = vmax.f32 %v1824_v38, 0.0 }
 0x33d   : > { %v2119_v44 = vmax.f32 %v1826_v15, 0.0  ;;  %v1829_v63 = vpop.f32.mrb[110].mxu0  ;;  %v6008_v0 = vpop.f32.mrb[74].mxu1 }
 0x33e   : > { %v1830_v4 = vadd.f32 %v1829_v63, %v5936_v30  ;;  %v1831_v49 = vpop.f32.mrb[111].mxu0  ;;  %v6011_v40 = vpop.f32.mrb[75].mxu1 }
 0x33f   : > { %v1832_v19 = vadd.f32 %v1831_v49, %v5940_v27  ;;  %2548 = vmatprep.mubr.f32.mxu1 %v2119_v44  ;;  %2997 = vmatprep.mubr.f32.mxu0 %v2119_v44 }
 0x340   : > { %2549 = vmatmul.mubr.f32.gmra.mrb[164].mxu1 %v2118_v33  ;;  %2998 = vmatmul.mubr.f32.gmra.mrb[180].mxu0 %v2118_v33  ;;  %v2120_v52 = vmax.f32 %v1830_v4, 0.0 }
 0x341   : > { %v2121_v62 = vmax.f32 %v1832_v19, 0.0  ;;  %v1835_v50 = vpop.f32.mrb[112].mxu0  ;;  %v6014_v1 = vpop.f32.mrb[76].mxu1 }
 0x342   : > { %v1836_v53 = vadd.f32 %v1835_v50, %v5936_v30  ;;  %v1837_v55 = vpop.f32.mrb[113].mxu0  ;;  %v6017_v16 = vpop.f32.mrb[77].mxu1 }
 0x343   : > { %v1838_v11 = vadd.f32 %v1837_v55, %v5940_v27  ;;  %2554 = vmatprep.mubr.f32.mxu1 %v2121_v62  ;;  %3003 = vmatprep.mubr.f32.mxu0 %v2121_v62 }
 0x344   : > { %2555 = vmatmul.mubr.f32.gmra.mrb[166].mxu1 %v2120_v52  ;;  %3004 = vmatmul.mubr.f32.gmra.mrb[182].mxu0 %v2120_v52  ;;  %v2122_v26 = vmax.f32 %v1836_v53, 0.0 }
 0x345   : > { %v2123_v54 = vmax.f32 %v1838_v11, 0.0  ;;  %v1841_v57 = vpop.f32.mrb[114].mxu0  ;;  %v6020_v18 = vpop.f32.mrb[78].mxu1 }
 0x346   : > { %v1842_v58 = vadd.f32 %v1841_v57, %v5936_v30  ;;  %v1843_v43 = vpop.f32.mrb[115].mxu0  ;;  %v6023_v41 = vpop.f32.mrb[79].mxu1 }
 0x347   : > { %v1844_v42 = vadd.f32 %v1843_v43, %v5940_v27  ;;  %2560 = vmatprep.mubr.f32.mxu1 %v2123_v54  ;;  %3009 = vmatprep.mubr.f32.mxu0 %v2123_v54 }
 0x348   : > { %2561 = vmatmul.mubr.f32.gmra.mrb[168].mxu1 %v2122_v26  ;;  %3010 = vmatmul.mubr.f32.gmra.mrb[184].mxu0 %v2122_v26  ;;  %v2124_v12 = vmax.f32 %v1842_v58, 0.0 }
 0x349   : > { %v2125_v35 = vmax.f32 %v1844_v42, 0.0  ;;  %v1847_v34 = vpop.f32.mrb[116].mxu0  ;;  %v6026_v10 = vpop.f32.mrb[80].mxu1 }
 0x34a   : > { %v1848_v8 = vadd.f32 %v1847_v34, %v5936_v30  ;;  %v1849_v13 = vpop.f32.mrb[117].mxu0  ;;  %v6029_v51 = vpop.f32.mrb[81].mxu1 }
 0x34b   : > { %v1850_v14 = vadd.f32 %v1849_v13, %v5940_v27  ;;  %2566 = vmatprep.mubr.f32.mxu1 %v2125_v35  ;;  %3015 = vmatprep.mubr.f32.mxu0 %v2125_v35 }
 0x34c   : > { %2567 = vmatmul.mubr.f32.gmra.mrb[170].mxu1 %v2124_v12  ;;  %3016 = vmatmul.mubr.f32.gmra.mrb[186].mxu0 %v2124_v12  ;;  %v2126_v22 = vmax.f32 %v1848_v8, 0.0 }
 0x34d   : > { %v2127_v20 = vmax.f32 %v1850_v14, 0.0  ;;  %v1853_v28 = vpop.f32.mrb[118].mxu0  ;;  %v6032_v23 = vpop.f32.mrb[82].mxu1 }
 0x34e   : > { %v1854_v24 = vadd.f32 %v1853_v28, %v5936_v30  ;;  %v1855_v6 = vpop.f32.mrb[119].mxu0  ;;  %v6035_v60 = vpop.f32.mrb[83].mxu1 }
 0x34f   : > { %v1856_v48 = vadd.f32 %v1855_v6, %v5940_v27  ;;  %2572 = vmatprep.mubr.f32.mxu1 %v2127_v20  ;;  %3021 = vmatprep.mubr.f32.mxu0 %v2127_v20 }
 0x350   : > { %2573 = vmatmul.mubr.f32.gmra.mrb[172].mxu1 %v2126_v22  ;;  %3022 = vmatmul.mubr.f32.gmra.mrb[188].mxu0 %v2126_v22  ;;  %v2128_v17 = vmax.f32 %v1854_v24, 0.0 }
 0x351   : > { %v2129_v31 = vmax.f32 %v1856_v48, 0.0  ;;  %v1859_v46 = vpop.f32.mrb[120].mxu0  ;;  %v6038_v45 = vpop.f32.mrb[84].mxu1 }
 0x352   : > { %v1860_v36 = vadd.f32 %v1859_v46, %v5936_v30  ;;  %v1861_v38 = vpop.f32.mrb[121].mxu0  ;;  %v6041_v61 = vpop.f32.mrb[85].mxu1 }
 0x353   : > { %v1862_v15 = vadd.f32 %v1861_v38, %v5940_v27  ;;  %2578 = vmatprep.mubr.f32.mxu1 %v2129_v31  ;;  %3027 = vmatprep.mubr.f32.mxu0 %v2129_v31 }
 0x354   : > { %2579 = vmatmul.mubr.f32.gmra.mrb[174].mxu1 %v2128_v17  ;;  %3028 = vmatmul.mubr.f32.gmra.mrb[190].mxu0 %v2128_v17  ;;  %v2130_v4 = vmax.f32 %v1860_v36, 0.0 }
 0x355   : > { %v2131_v44 = vmax.f32 %v1862_v15, 0.0  ;;  %v1865_v63 = vpop.f32.mrb[122].mxu0  ;;  %v6044_v33 = vpop.f32.mrb[86].mxu1 }
 0x356   : > { %v1866_v49 = vadd.f32 %v1865_v63, %v5936_v30  ;;  %v1867_v19 = vpop.f32.mrb[123].mxu0  ;;  %v6047_v62 = vpop.f32.mrb[87].mxu1 }
 0x357   : > { %v1868_v50 = vadd.f32 %v1867_v19, %v5940_v27  ;;  %2584 = vmatprep.mubr.f32.mxu1 %v2131_v44  ;;  %3033 = vmatprep.mubr.f32.mxu0 %v2131_v44 }
 0x358   : > { %2585 = vmatmul.mubr.f32.gmra.mrb[176].mxu1 %v2130_v4  ;;  %3034 = vmatmul.mubr.f32.gmra.mrb[192].mxu0 %v2130_v4  ;;  %v2132_v11 = vmax.f32 %v1866_v49, 0.0 }
 0x359   : > { %v2133_v52 = vmax.f32 %v1868_v50, 0.0  ;;  %v1871_v53 = vpop.f32.mrb[124].mxu0  ;;  %v6050_v55 = vpop.f32.mrb[88].mxu1 }
 0x35a   : > { %v1872_v54 = vadd.f32 %v1871_v53, %v5936_v30  ;;  %v1873_v57 = vpop.f32.mrb[125].mxu0  ;;  %v6053_v26 = vpop.f32.mrb[89].mxu1 }
 0x35b   : > { %v1874_v58 = vadd.f32 %v1873_v57, %v5940_v27  ;;  %2590 = vmatprep.mubr.f32.mxu1 %v2133_v52  ;;  %3039 = vmatprep.mubr.f32.mxu0 %v2133_v52 }
 0x35c   : > { %2591 = vmatmul.mubr.f32.gmra.mrb[178].mxu1 %v2132_v11  ;;  %3040 = vmatmul.mubr.f32.gmra.mrb[194].mxu0 %v2132_v11  ;;  %v2134_v34 = vmax.f32 %v1872_v54, 0.0 }
 0x35d   : > { %v2135_v43 = vmax.f32 %v1874_v58, 0.0  ;;  %v1877_v42 = vpop.f32.mrb[126].mxu0  ;;  %v6056_v35 = vpop.f32.mrb[90].mxu1 }
 0x35e   : > { %v1878_v12 = vadd.f32 %v1877_v42, %v5936_v30  ;;  %v1879_v8 = vpop.f32.mrb[127].mxu0  ;;  %v6059_v13 = vpop.f32.mrb[91].mxu1 }
 0x35f   : > { %v1880_v14 = vadd.f32 %v1879_v8, %v5940_v27  ;;  %2596 = vmatprep.mubr.f32.mxu1 %v2135_v43  ;;  %3045 = vmatprep.mubr.f32.mxu0 %v2135_v43 }
 0x360   : > { %2597 = vmatmul.mubr.f32.gmra.mrb[180].mxu1 %v2134_v34  ;;  %3046 = vmatmul.mubr.f32.gmra.mrb[196].mxu0 %v2134_v34  ;;  %v2136_v24 = vmax.f32 %v1878_v12, 0.0 }
 0x361   : > { %v2137_v20 = vmax.f32 %v1880_v14, 0.0  ;;  %v1883_v28 = vpop.f32.mrb[128].mxu0  ;;  %v6062_v22 = vpop.f32.mrb[92].mxu1 }
 0x362   : > { %v1884_v6 = vadd.f32 %v1883_v28, %v5936_v30  ;;  %v1885_v48 = vpop.f32.mrb[129].mxu0  ;;  %v6065_v31 = vpop.f32.mrb[93].mxu1  ;;  %v1910_v28 = vadd.f32 %v5981_v56, %v5940_v27 }
 0x363   : > { %v1886_v46 = vadd.f32 %v1885_v48, %v5940_v27  ;;  %2602 = vmatprep.mubr.f32.mxu1 %v2137_v20  ;;  %3051 = vmatprep.mubr.f32.mxu0 %v2137_v20 }
 0x364   : > { %2603 = vmatmul.mubr.f32.gmra.mrb[182].mxu1 %v2136_v24  ;;  %3052 = vmatmul.mubr.f32.gmra.mrb[198].mxu0 %v2136_v24  ;;  %v2138_v15 = vmax.f32 %v1884_v6, 0.0 }
 0x365   : > { %v2139_v17 = vmax.f32 %v1886_v46, 0.0  ;;  %v1889_v36 = vpop.f32.mrb[130].mxu0  ;;  %v6068_v38 = vpop.f32.mrb[94].mxu1  ;;  %v1908_v46 = vadd.f32 %v5978_v59, %v5936_v30 }
 0x366   : > { %v1890_v44 = vadd.f32 %v1889_v36, %v5936_v30  ;;  %v1891_v63 = vpop.f32.mrb[131].mxu0  ;;  %v6071_v4 = vpop.f32.mrb[95].mxu1 }
 0x367   : > { %v1892_v49 = vadd.f32 %v1891_v63, %v5940_v27  ;;  %2608 = vmatprep.mubr.f32.mxu1 %v2139_v17  ;;  %3057 = vmatprep.mubr.f32.mxu0 %v2139_v17  ;;  %v2146_v63 = vmax.f32 %v1908_v46, 0.0 }
 0x368   : > { %2609 = vmatmul.mubr.f32.gmra.mrb[184].mxu1 %v2138_v15  ;;  %3058 = vmatmul.mubr.f32.gmra.mrb[200].mxu0 %v2138_v15  ;;  %v2140_v53 = vmax.f32 %v1890_v44, 0.0  ;;  %v2147_v15 = vmax.f32 %v1910_v28, 0.0  ;;  %v1916_v44 = vadd.f32 %v5987_v5, %v5940_v27  ;;  %v1932_v28 = vadd.f32 %v6002_v37, %v5936_v30 }
 0x369   : > { %v2141_v19 = vmax.f32 %v1892_v49, 0.0  ;;  %v1895_v50 = vpop.f32.mrb[132].mxu0  ;;  %v6074_v52 = vpop.f32.mrb[96].mxu1  ;;  %v1914_v49 = vadd.f32 %v5984_v39, %v5936_v30  ;;  %v1928_v39 = vadd.f32 %v5999_v32, %v5940_v27  ;;  %v1946_v37 = vadd.f32 %v6017_v16, %v5940_v27 }
 0x36a   : > { %v1896_v11 = vadd.f32 %v1895_v50, %v5936_v30  ;;  %v1897_v54 = vpop.f32.mrb[133].mxu0  ;;  %v6077_v57 = vpop.f32.mrb[97].mxu1  ;;  %v1922_v50 = vadd.f32 %v5993_v47, %v5940_v27  ;;  %v2154_v46 = vmax.f32 %v1932_v28, 0.0  ;;  %v1962_v28 = vadd.f32 %v6032_v23, %v5936_v30 }
 0x36b   : > { %v1898_v58 = vadd.f32 %v1897_v54, %v5940_v27  ;;  %2614 = vmatprep.mubr.f32.mxu1 %v2141_v19  ;;  %3063 = vmatprep.mubr.f32.mxu0 %v2141_v19  ;;  %v2149_v19 = vmax.f32 %v1916_v44, 0.0 }
 0x36c   : > { %2615 = vmatmul.mubr.f32.gmra.mrb[186].mxu1 %v2140_v53  ;;  %3064 = vmatmul.mubr.f32.gmra.mrb[202].mxu0 %v2140_v53  ;;  %v2142_v12 = vmax.f32 %v1896_v11, 0.0  ;;  %v2148_v53 = vmax.f32 %v1914_v49, 0.0  ;;  %v1920_v11 = vadd.f32 %v5990_v3, %v5936_v30  ;;  %v1934_v3 = vadd.f32 %v6005_v21, %v5940_v27 }
 0x36d   : > { %v2143_v43 = vmax.f32 %v1898_v58, 0.0  ;;  %v1901_v42 = vpop.f32.mrb[134].mxu0  ;;  %v6080_v34 = vpop.f32.mrb[98].mxu1  ;;  %v2151_v58 = vmax.f32 %v1922_v50, 0.0  ;;  %v1944_v49 = vadd.f32 %v6014_v1, %v5936_v30  ;;  %v2159_v50 = vmax.f32 %v1946_v37, 0.0 }
 0x36e   : > { %v1902_v8 = vadd.f32 %v1901_v42, %v5936_v30  ;;  %v1903_v14 = vpop.f32.mrb[135].mxu0  ;;  %v6083_v20 = vpop.f32.mrb[99].mxu1  ;;  %v1926_v42 = vadd.f32 %v5996_v25, %v5936_v30  ;;  %v1940_v25 = vadd.f32 %v6011_v40, %v5940_v27  ;;  %v1958_v1 = vadd.f32 %v6029_v51, %v5940_v27 }
 0x36f   : > { %v1904_v24 = vadd.f32 %v1903_v14, %v5940_v27  ;;  %2620 = vmatprep.mubr.f32.mxu1 %v2143_v43  ;;  %3069 = vmatprep.mubr.f32.mxu0 %v2143_v43  ;;  %v2150_v43 = vmax.f32 %v1920_v11, 0.0  ;;  %v1950_v11 = vadd.f32 %v6020_v18, %v5936_v30  ;;  %v1964_v18 = vadd.f32 %v6035_v60, %v5940_v27 }
 0x370   : > { %2621 = vmatmul.mubr.f32.gmra.mrb[188].mxu1 %v2142_v12  ;;  %3070 = vmatmul.mubr.f32.gmra.mrb[204].mxu0 %v2142_v12  ;;  %v2144_v17 = vmax.f32 %v1902_v8, 0.0  ;;  %v2153_v8 = vmax.f32 %v1928_v39, 0.0  ;;  %v2152_v14 = vmax.f32 %v1926_v42, 0.0  ;;  %v2157_v44 = vmax.f32 %v1940_v25, 0.0 }
 0x371   : > { %v2145_v6 = vmax.f32 %v1904_v24, 0.0  ;;  %v6088_v48 = vpop.f32.mrb[100].mxu1  ;;  %v1956_v42 = vadd.f32 %v6026_v10, %v5936_v30  ;;  %v2165_v25 = vmax.f32 %v1964_v18, 0.0  ;;  %v1970_v10 = vadd.f32 %v6041_v61, %v5940_v27 }
 0x372   : > { %v6092_v36 = vpop.f32.mrb[101].mxu1  ;;  %v2164_v60 = vmax.f32 %v1962_v28, 0.0  ;;  %v1974_v61 = vadd.f32 %v6044_v33, %v5936_v30 }
 0x373   : > { %2626 = vmatprep.mubr.f32.mxu1 %v2145_v6  ;;  %3075 = vmatprep.mubr.f32.mxu0 %v2145_v6  ;;  %v2155_v6 = vmax.f32 %v1934_v3, 0.0  ;;  %v2163_v3 = vmax.f32 %v1958_v1, 0.0 }
 0x374   : > { %2627 = vmatmul.mubr.f32.gmra.mrb[190].mxu1 %v2144_v17  ;;  %3076 = vmatmul.mubr.f32.gmra.mrb[206].mxu0 %v2144_v17  ;;  %v1938_v17 = vadd.f32 %v6008_v0, %v5936_v30  ;;  %v1952_v0 = vadd.f32 %v6023_v41, %v5940_v27 }
 0x375   : > { %2632 = vmatprep.mubr.f32.mxu1 %v2147_v15  ;;  %3081 = vmatprep.mubr.f32.mxu0 %v2147_v15  ;;  %v6096_v56 = vpop.f32.mrb[102].mxu1 }
 0x376   : > { %v6100_v59 = vpop.f32.mrb[103].mxu1  ;;  %v2161_v39 = vmax.f32 %v1952_v0, 0.0 }
 0x378   : > { %2633 = vmatmul.mubr.f32.gmra.mrb[192].mxu1 %v2146_v63  ;;  %3082 = vmatmul.mubr.f32.gmra.mrb[208].mxu0 %v2146_v63  ;;  %v2156_v63 = vmax.f32 %v1938_v17, 0.0  ;;  %v2167_v17 = vmax.f32 %v1970_v10, 0.0  ;;  %v2016_v10 = vadd.f32 %v6088_v48, %v5936_v30  ;;  %v2022_v48 = vadd.f32 %v6096_v56, %v5936_v30 }
 0x379   : > { %2638 = vmatprep.mubr.f32.mxu1 %v2149_v19  ;;  %3087 = vmatprep.mubr.f32.mxu0 %v2149_v19  ;;  %v6104_v5 = vpop.f32.mrb[104].mxu1 }
 0x37a   : > { %v6108_v54 = vpop.f32.mrb[105].mxu1 }
 0x37c   : > { %2639 = vmatmul.mubr.f32.gmra.mrb[194].mxu1 %v2148_v53  ;;  %3088 = vmatmul.mubr.f32.gmra.mrb[210].mxu0 %v2148_v53  ;;  %v2158_v53 = vmax.f32 %v1944_v49, 0.0 }
 0x37d   : > { %2644 = vmatprep.mubr.f32.mxu1 %v2151_v58  ;;  %3093 = vmatprep.mubr.f32.mxu0 %v2151_v58  ;;  %v6112_v47 = vpop.f32.mrb[106].mxu1 }
 0x37e   : > { %v6116_v12 = vpop.f32.mrb[107].mxu1 }
 0x380   : > { %2645 = vmatmul.mubr.f32.gmra.mrb[196].mxu1 %v2150_v43  ;;  %3094 = vmatmul.mubr.f32.gmra.mrb[212].mxu0 %v2150_v43  ;;  %v2160_v43 = vmax.f32 %v1950_v11, 0.0 }
 0x381   : > { %2650 = vmatprep.mubr.f32.mxu1 %v2153_v8  ;;  %3099 = vmatprep.mubr.f32.mxu0 %v2153_v8  ;;  %v6120_v32 = vpop.f32.mrb[108].mxu1 }
 0x382   : > { %v6124_v24 = vpop.f32.mrb[109].mxu1 }
 0x384   : > { %2651 = vmatmul.mubr.f32.gmra.mrb[198].mxu1 %v2152_v14  ;;  %3100 = vmatmul.mubr.f32.gmra.mrb[214].mxu0 %v2152_v14  ;;  %v2162_v14 = vmax.f32 %v1956_v42, 0.0 }
 0x385   : > { %2656 = vmatprep.mubr.f32.mxu1 %v2155_v6  ;;  %3105 = vmatprep.mubr.f32.mxu0 %v2155_v6  ;;  %v6128_v21 = vpop.f32.mrb[110].mxu1 }
 0x386   : > { %v6132_v15 = vpop.f32.mrb[111].mxu1 }
 0x388   : > { %2657 = vmatmul.mubr.f32.gmra.mrb[200].mxu1 %v2154_v46  ;;  %3106 = vmatmul.mubr.f32.gmra.mrb[216].mxu0 %v2154_v46  ;;  %v1968_v46 = vadd.f32 %v6038_v45, %v5936_v30  ;;  %v2168_v45 = vmax.f32 %v1974_v61, 0.0 }
 0x389   : > { %2662 = vmatprep.mubr.f32.mxu1 %v2157_v44  ;;  %3111 = vmatprep.mubr.f32.mxu0 %v2157_v44  ;;  %v6136_v40 = vpop.f32.mrb[112].mxu1  ;;  %v1976_v44 = vadd.f32 %v6047_v62, %v5940_v27  ;;  %v1980_v62 = vadd.f32 %v6050_v55, %v5936_v30 }
 0x38a   : > { %v6140_v19 = vpop.f32.mrb[113].mxu1  ;;  %v2166_v23 = vmax.f32 %v1968_v46, 0.0 }
 0x38b   : > { %v2169_v37 = vmax.f32 %v1976_v44, 0.0  ;;  %v2170_v33 = vmax.f32 %v1980_v62, 0.0 }
 0x38c   : > { %2663 = vmatmul.mubr.f32.gmra.mrb[202].mxu1 %v2156_v63  ;;  %3112 = vmatmul.mubr.f32.gmra.mrb[218].mxu0 %v2156_v63  ;;  %v1982_v63 = vadd.f32 %v6053_v26, %v5940_v27  ;;  %v1986_v26 = vadd.f32 %v6056_v35, %v5936_v30 }
 0x38d   : > { %2668 = vmatprep.mubr.f32.mxu1 %v2159_v50  ;;  %3117 = vmatprep.mubr.f32.mxu0 %v2159_v50  ;;  %v6144_v16 = vpop.f32.mrb[114].mxu1  ;;  %v1988_v50 = vadd.f32 %v6059_v13, %v5940_v27  ;;  %v1992_v13 = vadd.f32 %v6062_v22, %v5936_v30 }
 0x38e   : > { %v6148_v58 = vpop.f32.mrb[115].mxu1  ;;  %v2171_v49 = vmax.f32 %v1982_v63, 0.0  ;;  %v2172_v55 = vmax.f32 %v1986_v26, 0.0  ;;  %v2030_v63 = vadd.f32 %v6108_v54, %v5940_v27  ;;  %v2184_v26 = vmax.f32 %v2022_v48, 0.0 }
 0x38f   : > { %v2173_v0 = vmax.f32 %v1988_v50, 0.0  ;;  %v2174_v35 = vmax.f32 %v1992_v13, 0.0  ;;  %v2034_v48 = vadd.f32 %v6112_v47, %v5936_v30 }
 0x390   : > { %2669 = vmatmul.mubr.f32.gmra.mrb[204].mxu1 %v2158_v53  ;;  %3118 = vmatmul.mubr.f32.gmra.mrb[220].mxu0 %v2158_v53  ;;  %v1994_v53 = vadd.f32 %v6065_v31, %v5940_v27  ;;  %v1998_v31 = vadd.f32 %v6068_v38, %v5936_v30  ;;  %v2342_v38 = vsub.s32 2, %v5927_v2 }
 0x391   : > { %2674 = vmatprep.mubr.f32.mxu1 %v2161_v39  ;;  %3123 = vmatprep.mubr.f32.mxu0 %v2161_v39  ;;  %v6152_v41 = vpop.f32.mrb[116].mxu1  ;;  %v2000_v39 = vadd.f32 %v6071_v4, %v5940_v27  ;;  %v2004_v4 = vadd.f32 %v6074_v52, %v5936_v30  ;;  %v2018_v52 = vadd.f32 %v6092_v36, %v5940_v27 }
 0x392   : > { %v6156_v8 = vpop.f32.mrb[117].mxu1  ;;  %v2175_v11 = vmax.f32 %v1994_v53, 0.0  ;;  %v2176_v22 = vmax.f32 %v1998_v31, 0.0  ;;  %v2024_v36 = vadd.f32 %v6100_v59, %v5940_v27  ;;  %v2182_v59 = vmax.f32 %v2016_v10, 0.0 }
 0x393   : > { %v2177_v1 = vmax.f32 %v2000_v39, 0.0  ;;  %v2178_v18 = vmax.f32 %v2004_v4, 0.0  ;;  %v2183_v46 = vmax.f32 %v2018_v52, 0.0  ;;  %v2036_v39 = vadd.f32 %v6116_v12, %v5940_v27 }
 0x394   : > { %2675 = vmatmul.mubr.f32.gmra.mrb[206].mxu1 %v2160_v43  ;;  %3124 = vmatmul.mubr.f32.gmra.mrb[222].mxu0 %v2160_v43  ;;  %v2006_v43 = vadd.f32 %v6077_v57, %v5940_v27  ;;  %v2010_v57 = vadd.f32 %v6080_v34, %v5936_v30  ;;  %v2185_v62 = vmax.f32 %v2024_v36, 0.0 }
 0x395   : > { %2680 = vmatprep.mubr.f32.mxu1 %v2163_v3  ;;  %3129 = vmatprep.mubr.f32.mxu0 %v2163_v3  ;;  %v6160_v51 = vpop.f32.mrb[118].mxu1  ;;  %v2012_v3 = vadd.f32 %v6083_v20, %v5940_v27  ;;  %v2330_v20 = vld [vmem:[%s6583_s8] sm:$0xf] }
 0x396   : > { %v6164_v6 = vpop.f32.mrb[119].mxu1  ;;  %v2179_v42 = vmax.f32 %v2006_v43, 0.0  ;;  %v6209_v34 = vrot.slane %v2330_v20, %v1617_v7 }
 0x397   : > { %v2181_v28 = vmax.f32 %v2012_v3, 0.0 }
 0x398   : > { %2681 = vmatmul.mubr.f32.gmra.mrb[208].mxu1 %v2162_v14  ;;  %3130 = vmatmul.mubr.f32.gmra.mrb[224].mxu0 %v2162_v14  ;;  %v2346_v14 = vsub.s32 3, %v5927_v2 }
 0x399   : > { %2686 = vmatprep.mubr.f32.mxu1 %v2165_v25  ;;  %3135 = vmatprep.mubr.f32.mxu0 %v2165_v25  ;;  %v2180_v25 = vmax.f32 %v2010_v57, 0.0 }
 0x39a   : > { %v6219_v61 = vrot.slane %v2330_v20, %v2346_v14 }
 0x39c   : > { %2687 = vmatmul.mubr.f32.gmra.mrb[210].mxu1 %v2164_v60  ;;  %3136 = vmatmul.mubr.f32.gmra.mrb[226].mxu0 %v2164_v60  ;;  %v6211_v60 = vrot.slane %v2330_v20, %v2342_v38 }
 0x39d   : > { %2692 = vmatprep.mubr.f32.mxu1 %v2167_v17  ;;  %3141 = vmatprep.mubr.f32.mxu0 %v2167_v17 }
 0x3a0   : > { %2693 = vmatmul.mubr.f32.gmra.mrb[212].mxu1 %v2166_v23  ;;  %3142 = vmatmul.mubr.f32.gmra.mrb[228].mxu0 %v2166_v23  ;;  %v6217_v23 = vrot.slane %v2330_v20, %v1621_v9 }
 0x3a1   : > { %2698 = vmatprep.mubr.f32.mxu1 %v2169_v37  ;;  %3147 = vmatprep.mubr.f32.mxu0 %v2169_v37 }
 0x3a4   : > { %2699 = vmatmul.mubr.f32.gmra.mrb[214].mxu1 %v2168_v45  ;;  %3148 = vmatmul.mubr.f32.gmra.mrb[230].mxu0 %v2168_v45 }
 0x3a5   : > { %2704 = vmatprep.mubr.f32.mxu1 %v2171_v49  ;;  %3153 = vmatprep.mubr.f32.mxu0 %v2171_v49 }
 0x3a8   : > { %2705 = vmatmul.mubr.f32.gmra.mrb[216].mxu1 %v2170_v33  ;;  %3154 = vmatmul.mubr.f32.gmra.mrb[232].mxu0 %v2170_v33 }
 0x3a9   : > { %2710 = vmatprep.mubr.f32.mxu1 %v2173_v0  ;;  %3159 = vmatprep.mubr.f32.mxu0 %v2173_v0  ;;  %v2028_v0 = vadd.f32 %v6104_v5, %v5936_v30 }
 0x3ac   : > { %2711 = vmatmul.mubr.f32.gmra.mrb[218].mxu1 %v2172_v55  ;;  %3160 = vmatmul.mubr.f32.gmra.mrb[234].mxu0 %v2172_v55 }
 0x3ad   : > { %2716 = vmatprep.mubr.f32.mxu1 %v2175_v11  ;;  %3165 = vmatprep.mubr.f32.mxu0 %v2175_v11  ;;  %v2187_v11 = vmax.f32 %v2030_v63, 0.0  ;;  %v2189_v63 = vmax.f32 %v2036_v39, 0.0 }
 0x3b0   : > { %2717 = vmatmul.mubr.f32.gmra.mrb[220].mxu1 %v2174_v35  ;;  %3166 = vmatmul.mubr.f32.gmra.mrb[236].mxu0 %v2174_v35 }
 0x3b1   : > { %2722 = vmatprep.mubr.f32.mxu1 %v2177_v1  ;;  %3171 = vmatprep.mubr.f32.mxu0 %v2177_v1 }
 0x3b4   : > { %2723 = vmatmul.mubr.f32.gmra.mrb[222].mxu1 %v2176_v22  ;;  %3172 = vmatmul.mubr.f32.gmra.mrb[238].mxu0 %v2176_v22 }
 0x3b5   : > { %2728 = vmatprep.mubr.f32.mxu1 %v2179_v42  ;;  %3177 = vmatprep.mubr.f32.mxu0 %v2179_v42 }
 0x3b8   : > { %2729 = vmatmul.mubr.f32.gmra.mrb[224].mxu1 %v2178_v18  ;;  %3178 = vmatmul.mubr.f32.gmra.mrb[240].mxu0 %v2178_v18 }
 0x3b9   : > { %2734 = vmatprep.mubr.f32.mxu1 %v2181_v28  ;;  %3183 = vmatprep.mubr.f32.mxu0 %v2181_v28 }
 0x3bb   : > { %v2418_v17 = vpop.f32.mrb[120].mxu1  ;;  %v2867_v44 = vpop.f32.mrb[136].mxu0 }
 0x3bc   : > { %v2420_v37 = vpop.f32.mrb[121].mxu1  ;;  %2735 = vmatmul.mubr.f32.gmra.mrb[226].mxu1 %v2180_v25  ;;  %v2869_v7 = vpop.f32.mrb[137].mxu0  ;;  %3184 = vmatmul.mubr.f32.gmra.mrb[242].mxu0 %v2180_v25  ;;  %v2419_v45 = vadd.f32 %v2418_v17, %v6209_v34  ;;  %v2868_v9 = vadd.f32 %v2867_v44, %v6211_v60  ;;  %v2186_v44 = vmax.f32 %v2028_v0, 0.0 }
 0x3bd   : > { %2740 = vmatprep.mubr.f32.mxu1 %v2183_v46  ;;  %3189 = vmatprep.mubr.f32.mxu0 %v2183_v46  ;;  %v2421_v49 = vadd.f32 %v2420_v37, %v6217_v23  ;;  %v2870_v50 = vadd.f32 %v2869_v7, %v6219_v61 }
 0x3be   : > { %v3250_v1 = vmax.f32 %v2419_v45, 0.0  ;;  %v3252_v5 = vmax.f32 %v2868_v9, 0.0 }
 0x3bf   : > { %v2424_v56 = vpop.f32.mrb[122].mxu1  ;;  %v2873_v33 = vpop.f32.mrb[138].mxu0  ;;  %v3251_v4 = vmax.f32 %v2421_v49, 0.0  ;;  %v3253_v42 = vmax.f32 %v2870_v50, 0.0 }
 0x3c0   : > { %v2425_v54 = vadd.f32 %v2424_v56, %v6209_v34  ;;  %v2874_v53 = vadd.f32 %v2873_v33, %v6211_v60  ;;  %v2426_v55 = vpop.f32.mrb[123].mxu1  ;;  %2741 = vmatmul.mubr.f32.gmra.mrb[228].mxu1 %v2182_v59  ;;  %v2875_v13 = vpop.f32.mrb[139].mxu0  ;;  %3190 = vmatmul.mubr.f32.gmra.mrb[244].mxu0 %v2182_v59  ;;  %v2042_v59 = vadd.f32 %v6124_v24, %v5940_v27  ;;  %v2188_v24 = vmax.f32 %v2034_v48, 0.0 }
 0x3c1   : > { %v2427_v35 = vadd.f32 %v2426_v55, %v6217_v23  ;;  %v2876_v31 = vadd.f32 %v2875_v13, %v6219_v61  ;;  %2746 = vmatprep.mubr.f32.mxu1 %v2185_v62  ;;  %3195 = vmatprep.mubr.f32.mxu0 %v2185_v62 }
 0x3c2   : > { %v3254_v43 = vmax.f32 %v2425_v54, 0.0  ;;  %v3256_v22 = vmax.f32 %v2874_v53, 0.0 }
 0x3c3   : > { %v3255_v3 = vmax.f32 %v2427_v35, 0.0  ;;  %v3257_v38 = vmax.f32 %v2876_v31, 0.0  ;;  %v2430_v18 = vpop.f32.mrb[124].mxu1  ;;  %v2879_v57 = vpop.f32.mrb[140].mxu0  ;;  %v2191_v31 = vmax.f32 %v2042_v59, 0.0 }
 0x3c4   : > { %v3507_v14 = vmax.f32 %v3250_v1, %v3254_v43  ;;  %v3645_v28 = vmax.f32 %v3252_v5, %v3256_v22  ;;  %v2431_v12 = vadd.f32 %v2430_v18, %v6209_v34  ;;  %v2880_v52 = vadd.f32 %v2879_v57, %v6211_v60  ;;  %v2432_v20 = vpop.f32.mrb[125].mxu1  ;;  %2747 = vmatmul.mubr.f32.gmra.mrb[230].mxu1 %v2184_v26  ;;  %v2881_v25 = vpop.f32.mrb[141].mxu0 }
 0x3c5   : > { %v3576_v10 = vmax.f32 %v3251_v4, %v3255_v3  ;;  %v3714_v46 = vmax.f32 %v3253_v42, %v3257_v38  ;;  %v2433_v36 = vadd.f32 %v2432_v20, %v6217_v23  ;;  %v2882_v17 = vadd.f32 %v2881_v25, %v6219_v61  ;;  %3196 = vmatmul.mubr.f32.gmra.mrb[246].mxu0 %v2184_v26 }
 0x3c6   : > { %v3258_v37 = vmax.f32 %v2431_v12, 0.0  ;;  %v3260_v7 = vmax.f32 %v2880_v52, 0.0  ;;  %2752 = vmatprep.mubr.f32.mxu1 %v2187_v11  ;;  %3201 = vmatprep.mubr.f32.mxu0 %v2187_v11  ;;  %v2040_v11 = vadd.f32 %v6120_v32, %v5936_v30  ;;  %v2048_v1 = vadd.f32 %v6132_v15, %v5940_v27 }
 0x3c7   : > { %v3259_v45 = vmax.f32 %v2433_v36, 0.0  ;;  %v3261_v9 = vmax.f32 %v2882_v17, 0.0  ;;  %v2436_v62 = vpop.f32.mrb[126].mxu1  ;;  %v2885_v49 = vpop.f32.mrb[142].mxu0  ;;  %v2046_v20 = vadd.f32 %v6128_v21, %v5936_v30  ;;  %v2054_v36 = vadd.f32 %v6140_v19, %v5940_v27 }
 0x3c8   : > { %v3508_v50 = vmax.f32 %v3507_v14, %v3258_v37  ;;  %v3646_v56 = vmax.f32 %v3645_v28, %v3260_v7  ;;  %v2437_v33 = vadd.f32 %v2436_v62, %v6209_v34  ;;  %v2886_v26 = vadd.f32 %v2885_v49, %v6211_v60  ;;  %v2438_v0 = vpop.f32.mrb[127].mxu1  ;;  %2753 = vmatmul.mubr.f32.gmra.mrb[232].mxu1 %v2186_v44  ;;  %v2887_v47 = vpop.f32.mrb[143].mxu0 }
 0x3c9   : > { %v3577_v54 = vmax.f32 %v3576_v10, %v3259_v45  ;;  %v3715_v53 = vmax.f32 %v3714_v46, %v3261_v9  ;;  %v2439_v55 = vadd.f32 %v2438_v0, %v6217_v23  ;;  %v2888_v13 = vadd.f32 %v2887_v47, %v6219_v61  ;;  %3202 = vmatmul.mubr.f32.gmra.mrb[248].mxu0 %v2186_v44 }
 0x3ca   : > { %v3262_v39 = vmax.f32 %v2437_v33, 0.0  ;;  %v3264_v35 = vmax.f32 %v2886_v26, 0.0  ;;  %2758 = vmatprep.mubr.f32.mxu1 %v2189_v63  ;;  %3207 = vmatprep.mubr.f32.mxu0 %v2189_v63  ;;  %v2190_v15 = vmax.f32 %v2040_v11, 0.0  ;;  %v2193_v46 = vmax.f32 %v2048_v1, 0.0 }
 0x3cb   : > { %v3263_v5 = vmax.f32 %v2439_v55, 0.0  ;;  %v3265_v43 = vmax.f32 %v2888_v13, 0.0  ;;  %v2442_v22 = vpop.f32.mrb[128].mxu1  ;;  %v2891_v4 = vpop.f32.mrb[144].mxu0  ;;  %v2192_v19 = vmax.f32 %v2046_v20, 0.0  ;;  %v2052_v33 = vadd.f32 %v6136_v40, %v5936_v30 }
 0x3cc   : > { %v3509_v42 = vmax.f32 %v3508_v50, %v3262_v39  ;;  %v3647_v3 = vmax.f32 %v3646_v56, %v3264_v35  ;;  %v2443_v38 = vadd.f32 %v2442_v22, %v6209_v34  ;;  %v2892_v18 = vadd.f32 %v2891_v4, %v6211_v60  ;;  %v2444_v57 = vpop.f32.mrb[129].mxu1  ;;  %2759 = vmatmul.mubr.f32.gmra.mrb[234].mxu1 %v2188_v24  ;;  %v2893_v32 = vpop.f32.mrb[145].mxu0 }
 0x3cd   : > { %v3578_v14 = vmax.f32 %v3577_v54, %v3263_v5  ;;  %v3716_v28 = vmax.f32 %v3715_v53, %v3265_v43  ;;  %v2445_v12 = vadd.f32 %v2444_v57, %v6217_v23  ;;  %v2894_v52 = vadd.f32 %v2893_v32, %v6219_v61  ;;  %3208 = vmatmul.mubr.f32.gmra.mrb[250].mxu0 %v2188_v24 }
 0x3ce   : > { %v3266_v25 = vmax.f32 %v2443_v38, 0.0  ;;  %v3268_v10 = vmax.f32 %v2892_v18, 0.0  ;;  %2764 = vmatprep.mubr.f32.mxu1 %v2191_v31  ;;  %3213 = vmatprep.mubr.f32.mxu0 %v2191_v31  ;;  %v2195_v47 = vmax.f32 %v2054_v36, 0.0  ;;  %v2060_v54 = vadd.f32 %v6148_v58, %v5940_v27 }
 0x3cf   : > { %v3267_v17 = vmax.f32 %v2445_v12, 0.0  ;;  %v3269_v44 = vmax.f32 %v2894_v52, 0.0  ;;  %v2448_v48 = vpop.f32.mrb[130].mxu1  ;;  %v2897_v37 = vpop.f32.mrb[146].mxu0  ;;  %v2194_v58 = vmax.f32 %v2052_v33, 0.0  ;;  %v2066_v57 = vadd.f32 %v6156_v8, %v5940_v27 }
 0x3d0   : > { %v3510_v7 = vmax.f32 %v3509_v42, %v3266_v25  ;;  %v3648_v63 = vmax.f32 %v3647_v3, %v3268_v10  ;;  %v2449_v59 = vadd.f32 %v2448_v48, %v6209_v34  ;;  %v2898_v45 = vadd.f32 %v2897_v37, %v6211_v60  ;;  %v2450_v9 = vpop.f32.mrb[131].mxu1  ;;  %2765 = vmatmul.mubr.f32.gmra.mrb[236].mxu1 %v2190_v15  ;;  %v2899_v21 = vpop.f32.mrb[147].mxu0 }
 0x3d1   : > { %v3579_v62 = vmax.f32 %v3578_v14, %v3267_v17  ;;  %v3717_v49 = vmax.f32 %v3716_v28, %v3269_v44  ;;  %v2451_v50 = vadd.f32 %v2450_v9, %v6217_v23  ;;  %v2900_v56 = vadd.f32 %v2899_v21, %v6219_v61  ;;  %3214 = vmatmul.mubr.f32.gmra.mrb[252].mxu0 %v2190_v15 }
 0x3d2   : > { %v3270_v26 = vmax.f32 %v2449_v59, 0.0  ;;  %v3272_v0 = vmax.f32 %v2898_v45, 0.0  ;;  %2770 = vmatprep.mubr.f32.mxu1 %v2193_v46  ;;  %3219 = vmatprep.mubr.f32.mxu0 %v2193_v46  ;;  %v2058_v42 = vadd.f32 %v6144_v16, %v5936_v30  ;;  %v2197_v18 = vmax.f32 %v2060_v54, 0.0 }
 0x3d3   : > { %v3271_v53 = vmax.f32 %v2451_v50, 0.0  ;;  %v3273_v55 = vmax.f32 %v2900_v56, 0.0  ;;  %v2454_v13 = vpop.f32.mrb[132].mxu1  ;;  %v2903_v24 = vpop.f32.mrb[148].mxu0  ;;  %v2064_v48 = vadd.f32 %v6152_v41, %v5936_v30  ;;  %v2072_v59 = vadd.f32 %v6164_v6, %v5940_v27 }
 0x3d4   : > { %v3511_v11 = vmax.f32 %v3510_v7, %v3270_v26  ;;  %v3649_v39 = vmax.f32 %v3648_v63, %v3272_v0  ;;  %v2455_v35 = vadd.f32 %v2454_v13, %v6209_v34  ;;  %v2904_v31 = vadd.f32 %v2903_v24, %v6211_v60  ;;  %v2456_v1 = vpop.f32.mrb[133].mxu1  ;;  %2771 = vmatmul.mubr.f32.gmra.mrb[238].mxu1 %v2192_v19  ;;  %v2905_v40 = vpop.f32.mrb[149].mxu0 }
 0x3d5   : > { %v3580_v5 = vmax.f32 %v3579_v62, %v3271_v53  ;;  %v3718_v43 = vmax.f32 %v3717_v49, %v3273_v55  ;;  %v2457_v22 = vadd.f32 %v2456_v1, %v6217_v23  ;;  %v2906_v4 = vadd.f32 %v2905_v40, %v6219_v61  ;;  %3220 = vmatmul.mubr.f32.gmra.mrb[254].mxu0 %v2192_v19 }
 0x3d6   : > { %v3274_v3 = vmax.f32 %v2455_v35, 0.0  ;;  %v3276_v38 = vmax.f32 %v2904_v31, 0.0  ;;  %2776 = vmatprep.mubr.f32.mxu1 %v2195_v47  ;;  %3225 = vmatprep.mubr.f32.mxu0 %v2195_v47  ;;  %v2196_v8 = vmax.f32 %v2058_v42, 0.0  ;;  %v2199_v63 = vmax.f32 %v2066_v57, 0.0 }
 0x3d7   : > { %v3275_v32 = vmax.f32 %v2457_v22, 0.0  ;;  %v3277_v14 = vmax.f32 %v2906_v4, 0.0  ;;  %v2460_v28 = vpop.f32.mrb[134].mxu1  ;;  %v2909_v12 = vpop.f32.mrb[150].mxu0  ;;  %v2198_v27 = vmax.f32 %v2064_v48, 0.0  ;;  %v2070_v6 = vadd.f32 %v6160_v51, %v5936_v30 }
 0x3d8   : > { %v3512_v52 = vmax.f32 %v3511_v11, %v3274_v3  ;;  %v3650_v15 = vmax.f32 %v3649_v39, %v3276_v38  ;;  %v2461_v20 = vadd.f32 %v2460_v28, %v6209_v34  ;;  %v2910_v25 = vadd.f32 %v2909_v12, %v6211_v60  ;;  %v2462_v10 = vpop.f32.mrb[135].mxu1  ;;  %2777 = vmatmul.mubr.f32.gmra.mrb[240].mxu1 %v2194_v58  ;;  %v2911_v16 = vpop.f32.mrb[151].mxu0 }
 0x3d9   : > { %v3581_v46 = vmax.f32 %v3580_v5, %v3275_v32  ;;  %v3719_v36 = vmax.f32 %v3718_v43, %v3277_v14  ;;  %v2463_v17 = vadd.f32 %v2462_v10, %v6217_v23  ;;  %v2912_v44 = vadd.f32 %v2911_v16, %v6219_v61  ;;  %3226 = vmatmul.mubr.f32.gmra.mrb[0].mxu0 %v2194_v58 }
 0x3da   : > { %v3278_v37 = vmax.f32 %v2461_v20, 0.0  ;;  %v3280_v7 = vmax.f32 %v2910_v25, 0.0  ;;  %2782 = vmatprep.mubr.f32.mxu1 %v2197_v18  ;;  %3231 = vmatprep.mubr.f32.mxu0 %v2197_v18  ;;  %v2201_v13 = vmax.f32 %v2072_v59, 0.0  ;;  %v2200_v42 = vmax.f32 %v2070_v6, 0.0 }
 0x3db   : > { %v3279_v45 = vmax.f32 %v2463_v17, 0.0  ;;  %v3281_v9 = vmax.f32 %v2912_v44, 0.0  ;;  %v2466_v21 = vpop.f32.mrb[136].mxu1  ;;  %v2915_v62 = vpop.f32.mrb[152].mxu0 }
 0x3dc   : > { %v3513_v49 = vmax.f32 %v3512_v52, %v3278_v37  ;;  %v3651_v50 = vmax.f32 %v3650_v15, %v3280_v7  ;;  %v2467_v56 = vadd.f32 %v2466_v21, %v6209_v34  ;;  %v2916_v19 = vadd.f32 %v2915_v62, %v6211_v60  ;;  %v2468_v33 = vpop.f32.mrb[137].mxu1  ;;  %2783 = vmatmul.mubr.f32.gmra.mrb[242].mxu1 %v2196_v8  ;;  %v2917_v41 = vpop.f32.mrb[153].mxu0 }
 0x3dd   : > { %v3582_v26 = vmax.f32 %v3581_v46, %v3279_v45  ;;  %v3720_v0 = vmax.f32 %v3719_v36, %v3281_v9  ;;  %v2469_v47 = vadd.f32 %v2468_v33, %v6217_v23  ;;  %v2918_v54 = vadd.f32 %v2917_v41, %v6219_v61  ;;  %3232 = vmatmul.mubr.f32.gmra.mrb[2].mxu0 %v2196_v8 }
 0x3de   : > { %v3282_v53 = vmax.f32 %v2467_v56, 0.0  ;;  %v3284_v55 = vmax.f32 %v2916_v19, 0.0  ;;  %2788 = vmatprep.mubr.f32.mxu1 %v2199_v63  ;;  %3237 = vmatprep.mubr.f32.mxu0 %v2199_v63 }
 0x3df   : > { %v3283_v24 = vmax.f32 %v2469_v47, 0.0  ;;  %v3285_v11 = vmax.f32 %v2918_v54, 0.0  ;;  %v2472_v39 = vpop.f32.mrb[138].mxu1  ;;  %v2921_v35 = vpop.f32.mrb[154].mxu0 }
 0x3e0   : > { %v3514_v31 = vmax.f32 %v3513_v49, %v3282_v53  ;;  %v3652_v1 = vmax.f32 %v3651_v50, %v3284_v55  ;;  %v2473_v40 = vadd.f32 %v2472_v39, %v6209_v34  ;;  %v2922_v5 = vadd.f32 %v2921_v35, %v6211_v60  ;;  %v2474_v43 = vpop.f32.mrb[139].mxu1  ;;  %2789 = vmatmul.mubr.f32.gmra.mrb[244].mxu1 %v2198_v27  ;;  %v2923_v22 = vpop.f32.mrb[155].mxu0 }
 0x3e1   : > { %v3583_v4 = vmax.f32 %v3582_v26, %v3283_v24  ;;  %v3721_v30 = vmax.f32 %v3720_v0, %v3285_v11  ;;  %v2475_v51 = vadd.f32 %v2474_v43, %v6217_v23  ;;  %v2924_v58 = vadd.f32 %v2923_v22, %v6219_v61  ;;  %3238 = vmatmul.mubr.f32.gmra.mrb[4].mxu0 %v2198_v27 }
 0x3e2   : > { %v3286_v3 = vmax.f32 %v2473_v40, 0.0  ;;  %v3288_v38 = vmax.f32 %v2922_v5, 0.0  ;;  %2794 = vmatprep.mubr.f32.mxu1 %v2201_v13  ;;  %3243 = vmatprep.mubr.f32.mxu0 %v2201_v13 }
 0x3e3   : > { %v3287_v18 = vmax.f32 %v2475_v51, 0.0  ;;  %v3289_v57 = vmax.f32 %v2924_v58, 0.0  ;;  %v2478_v32 = vpop.f32.mrb[140].mxu1  ;;  %v2927_v14 = vpop.f32.mrb[156].mxu0 }
 0x3e4   : > { %v3515_v28 = vmax.f32 %v3514_v31, %v3286_v3  ;;  %v3653_v12 = vmax.f32 %v3652_v1, %v3288_v38  ;;  %v2479_v52 = vadd.f32 %v2478_v32, %v6209_v34  ;;  %v2928_v15 = vadd.f32 %v2927_v14, %v6211_v60  ;;  %v2480_v20 = vpop.f32.mrb[141].mxu1  ;;  %2795 = vmatmul.mubr.f32.gmra.mrb[246].mxu1 %v2200_v42  ;;  %v2929_v25 = vpop.f32.mrb[157].mxu0 }
 0x3e5   : > { %v3584_v10 = vmax.f32 %v3583_v4, %v3287_v18  ;;  %v3722_v16 = vmax.f32 %v3721_v30, %v3289_v57  ;;  %v2481_v46 = vadd.f32 %v2480_v20, %v6217_v23  ;;  %v2930_v36 = vadd.f32 %v2929_v25, %v6219_v61  ;;  %3244 = vmatmul.mubr.f32.gmra.mrb[6].mxu0 %v2200_v42 }
 0x3e6   : > { %v3290_v17 = vmax.f32 %v2479_v52, 0.0  ;;  %v3292_v44 = vmax.f32 %v2928_v15, 0.0 }
 0x3e7   : > { %v3291_v8 = vmax.f32 %v2481_v46, 0.0  ;;  %v3293_v48 = vmax.f32 %v2930_v36, 0.0  ;;  %v2484_v37 = vpop.f32.mrb[142].mxu1  ;;  %v2933_v7 = vpop.f32.mrb[158].mxu0 }
 0x3e8   : > { %v3516_v63 = vmax.f32 %v3515_v28, %v3290_v17  ;;  %v3654_v59 = vmax.f32 %v3653_v12, %v3292_v44  ;;  %v2485_v45 = vadd.f32 %v2484_v37, %v6209_v34  ;;  %v2934_v9 = vadd.f32 %v2933_v7, %v6211_v60  ;;  %v2486_v21 = vpop.f32.mrb[143].mxu1  ;;  %v2935_v62 = vpop.f32.mrb[159].mxu0 }
 0x3e9   : > { %v3585_v49 = vmax.f32 %v3584_v10, %v3291_v8  ;;  %v3723_v50 = vmax.f32 %v3722_v16, %v3293_v48  ;;  %v2487_v56 = vadd.f32 %v2486_v21, %v6217_v23  ;;  %v2936_v19 = vadd.f32 %v2935_v62, %v6219_v61 }
 0x3ea   : > { %v3294_v33 = vmax.f32 %v2485_v45, 0.0  ;;  %v3296_v41 = vmax.f32 %v2934_v9, 0.0 }
 0x3eb   : > { %v3295_v26 = vmax.f32 %v2487_v56, 0.0  ;;  %v3297_v0 = vmax.f32 %v2936_v19, 0.0  ;;  %v2490_v47 = vpop.f32.mrb[144].mxu1  ;;  %v2939_v54 = vpop.f32.mrb[160].mxu0 }
 0x3ec   : > { %v3517_v27 = vmax.f32 %v3516_v63, %v3294_v33  ;;  %v3655_v6 = vmax.f32 %v3654_v59, %v3296_v41  ;;  %v2491_v53 = vadd.f32 %v2490_v47, %v6209_v34  ;;  %v2940_v55 = vadd.f32 %v2939_v54, %v6211_v60  ;;  %v2492_v13 = vpop.f32.mrb[145].mxu1  ;;  %v2941_v24 = vpop.f32.mrb[161].mxu0 }
 0x3ed   : > { %v3586_v11 = vmax.f32 %v3585_v49, %v3295_v26  ;;  %v3724_v39 = vmax.f32 %v3723_v50, %v3297_v0  ;;  %v2493_v35 = vadd.f32 %v2492_v13, %v6217_v23  ;;  %v2942_v31 = vadd.f32 %v2941_v24, %v6219_v61 }
 0x3ee   : > { %v3298_v1 = vmax.f32 %v2491_v53, 0.0  ;;  %v3300_v40 = vmax.f32 %v2940_v55, 0.0 }
 0x3ef   : > { %v3299_v5 = vmax.f32 %v2493_v35, 0.0  ;;  %v3301_v43 = vmax.f32 %v2942_v31, 0.0  ;;  %v2496_v22 = vpop.f32.mrb[146].mxu1  ;;  %v2945_v4 = vpop.f32.mrb[162].mxu0 }
 0x3f0   : > { %v3518_v30 = vmax.f32 %v3517_v27, %v3298_v1  ;;  %v3656_v51 = vmax.f32 %v3655_v6, %v3300_v40  ;;  %v2497_v58 = vadd.f32 %v2496_v22, %v6209_v34  ;;  %v2946_v42 = vadd.f32 %v2945_v4, %v6211_v60  ;;  %v2498_v3 = vpop.f32.mrb[147].mxu1  ;;  %v2947_v38 = vpop.f32.mrb[163].mxu0 }
 0x3f1   : > { %v3587_v18 = vmax.f32 %v3586_v11, %v3299_v5  ;;  %v3725_v57 = vmax.f32 %v3724_v39, %v3301_v43  ;;  %v2499_v32 = vadd.f32 %v2498_v3, %v6217_v23  ;;  %v2948_v14 = vadd.f32 %v2947_v38, %v6219_v61 }
 0x3f2   : > { %v3302_v28 = vmax.f32 %v2497_v58, 0.0  ;;  %v3304_v12 = vmax.f32 %v2946_v42, 0.0 }
 0x3f3   : > { %v3303_v52 = vmax.f32 %v2499_v32, 0.0  ;;  %v3305_v15 = vmax.f32 %v2948_v14, 0.0  ;;  %v2502_v20 = vpop.f32.mrb[148].mxu1  ;;  %v2951_v25 = vpop.f32.mrb[164].mxu0 }
 0x3f4   : > { %v3519_v10 = vmax.f32 %v3518_v30, %v3302_v28  ;;  %v3657_v16 = vmax.f32 %v3656_v51, %v3304_v12  ;;  %v2503_v46 = vadd.f32 %v2502_v20, %v6209_v34  ;;  %v2952_v36 = vadd.f32 %v2951_v25, %v6211_v60  ;;  %v2504_v17 = vpop.f32.mrb[149].mxu1  ;;  %v2953_v44 = vpop.f32.mrb[165].mxu0 }
 0x3f5   : > { %v3588_v8 = vmax.f32 %v3587_v18, %v3303_v52  ;;  %v3726_v48 = vmax.f32 %v3725_v57, %v3305_v15  ;;  %v2505_v37 = vadd.f32 %v2504_v17, %v6217_v23  ;;  %v2954_v7 = vadd.f32 %v2953_v44, %v6219_v61 }
 0x3f6   : > { %v3306_v63 = vmax.f32 %v2503_v46, 0.0  ;;  %v3308_v59 = vmax.f32 %v2952_v36, 0.0 }
 0x3f7   : > { %v3307_v45 = vmax.f32 %v2505_v37, 0.0  ;;  %v3309_v9 = vmax.f32 %v2954_v7, 0.0  ;;  %v2508_v21 = vpop.f32.mrb[150].mxu1  ;;  %v2957_v62 = vpop.f32.mrb[166].mxu0 }
 0x3f8   : > { %v3520_v49 = vmax.f32 %v3519_v10, %v3306_v63  ;;  %v3658_v50 = vmax.f32 %v3657_v16, %v3308_v59  ;;  %v2509_v56 = vadd.f32 %v2508_v21, %v6209_v34  ;;  %v2958_v19 = vadd.f32 %v2957_v62, %v6211_v60  ;;  %v2510_v33 = vpop.f32.mrb[151].mxu1  ;;  %v2959_v41 = vpop.f32.mrb[167].mxu0 }
 0x3f9   : > { %v3589_v26 = vmax.f32 %v3588_v8, %v3307_v45  ;;  %v3727_v0 = vmax.f32 %v3726_v48, %v3309_v9  ;;  %v2511_v47 = vadd.f32 %v2510_v33, %v6217_v23  ;;  %v2960_v54 = vadd.f32 %v2959_v41, %v6219_v61 }
 0x3fa   : > { %v3310_v27 = vmax.f32 %v2509_v56, 0.0  ;;  %v3312_v6 = vmax.f32 %v2958_v19, 0.0 }
 0x3fb   : > { %v3311_v53 = vmax.f32 %v2511_v47, 0.0  ;;  %v3313_v55 = vmax.f32 %v2960_v54, 0.0  ;;  %v2514_v13 = vpop.f32.mrb[152].mxu1  ;;  %v2963_v24 = vpop.f32.mrb[168].mxu0 }
 0x3fc   : > { %v3521_v11 = vmax.f32 %v3520_v49, %v3310_v27  ;;  %v3659_v39 = vmax.f32 %v3658_v50, %v3312_v6  ;;  %v2515_v35 = vadd.f32 %v2514_v13, %v6209_v34  ;;  %v2964_v31 = vadd.f32 %v2963_v24, %v6211_v60  ;;  %v2516_v1 = vpop.f32.mrb[153].mxu1  ;;  %v2965_v40 = vpop.f32.mrb[169].mxu0 }
 0x3fd   : > { %v3590_v5 = vmax.f32 %v3589_v26, %v3311_v53  ;;  %v3728_v43 = vmax.f32 %v3727_v0, %v3313_v55  ;;  %v2517_v22 = vadd.f32 %v2516_v1, %v6217_v23  ;;  %v2966_v4 = vadd.f32 %v2965_v40, %v6219_v61 }
 0x3fe   : > { %v3314_v30 = vmax.f32 %v2515_v35, 0.0  ;;  %v3316_v51 = vmax.f32 %v2964_v31, 0.0 }
 0x3ff   : > { %v3315_v58 = vmax.f32 %v2517_v22, 0.0  ;;  %v3317_v42 = vmax.f32 %v2966_v4, 0.0  ;;  %v2520_v3 = vpop.f32.mrb[154].mxu1  ;;  %v2969_v38 = vpop.f32.mrb[170].mxu0 }
 0x400   : > { %v3522_v18 = vmax.f32 %v3521_v11, %v3314_v30  ;;  %v3660_v57 = vmax.f32 %v3659_v39, %v3316_v51  ;;  %v2521_v32 = vadd.f32 %v2520_v3, %v6209_v34  ;;  %v2970_v14 = vadd.f32 %v2969_v38, %v6211_v60  ;;  %v2522_v28 = vpop.f32.mrb[155].mxu1  ;;  %v2971_v12 = vpop.f32.mrb[171].mxu0 }
 0x401   : > { %v3591_v52 = vmax.f32 %v3590_v5, %v3315_v58  ;;  %v3729_v15 = vmax.f32 %v3728_v43, %v3317_v42  ;;  %v2523_v20 = vadd.f32 %v2522_v28, %v6217_v23  ;;  %v2972_v25 = vadd.f32 %v2971_v12, %v6219_v61 }
 0x402   : > { %v3318_v10 = vmax.f32 %v2521_v32, 0.0  ;;  %v3320_v16 = vmax.f32 %v2970_v14, 0.0 }
 0x403   : > { %v3319_v46 = vmax.f32 %v2523_v20, 0.0  ;;  %v3321_v36 = vmax.f32 %v2972_v25, 0.0  ;;  %v2526_v17 = vpop.f32.mrb[156].mxu1  ;;  %v2975_v44 = vpop.f32.mrb[172].mxu0 }
 0x404   : > { %v3523_v8 = vmax.f32 %v3522_v18, %v3318_v10  ;;  %v3661_v48 = vmax.f32 %v3660_v57, %v3320_v16  ;;  %v2527_v37 = vadd.f32 %v2526_v17, %v6209_v34  ;;  %v2976_v7 = vadd.f32 %v2975_v44, %v6211_v60  ;;  %v2528_v63 = vpop.f32.mrb[157].mxu1  ;;  %v2977_v59 = vpop.f32.mrb[173].mxu0 }
 0x405   : > { %v3592_v45 = vmax.f32 %v3591_v52, %v3319_v46  ;;  %v3730_v9 = vmax.f32 %v3729_v15, %v3321_v36  ;;  %v2529_v21 = vadd.f32 %v2528_v63, %v6217_v23  ;;  %v2978_v62 = vadd.f32 %v2977_v59, %v6219_v61 }
 0x406   : > { %v3322_v49 = vmax.f32 %v2527_v37, 0.0  ;;  %v3324_v50 = vmax.f32 %v2976_v7, 0.0 }
 0x407   : > { %v3323_v56 = vmax.f32 %v2529_v21, 0.0  ;;  %v3325_v19 = vmax.f32 %v2978_v62, 0.0  ;;  %v2532_v33 = vpop.f32.mrb[158].mxu1  ;;  %v2981_v41 = vpop.f32.mrb[174].mxu0 }
 0x408   : > { %v3524_v26 = vmax.f32 %v3523_v8, %v3322_v49  ;;  %v3662_v0 = vmax.f32 %v3661_v48, %v3324_v50  ;;  %v2533_v47 = vadd.f32 %v2532_v33, %v6209_v34  ;;  %v2982_v54 = vadd.f32 %v2981_v41, %v6211_v60  ;;  %v2534_v27 = vpop.f32.mrb[159].mxu1  ;;  %v2983_v6 = vpop.f32.mrb[175].mxu0 }
 0x409   : > { %v3593_v53 = vmax.f32 %v3592_v45, %v3323_v56  ;;  %v3731_v55 = vmax.f32 %v3730_v9, %v3325_v19  ;;  %v2535_v13 = vadd.f32 %v2534_v27, %v6217_v23  ;;  %v2984_v24 = vadd.f32 %v2983_v6, %v6219_v61 }
 0x40a   : > { %v3326_v11 = vmax.f32 %v2533_v47, 0.0  ;;  %v3328_v39 = vmax.f32 %v2982_v54, 0.0 }
 0x40b   : > { %v3327_v35 = vmax.f32 %v2535_v13, 0.0  ;;  %v3329_v31 = vmax.f32 %v2984_v24, 0.0  ;;  %v2538_v1 = vpop.f32.mrb[160].mxu1  ;;  %v2987_v40 = vpop.f32.mrb[176].mxu0 }
 0x40c   : > { %v3525_v5 = vmax.f32 %v3524_v26, %v3326_v11  ;;  %v3663_v43 = vmax.f32 %v3662_v0, %v3328_v39  ;;  %v2539_v22 = vadd.f32 %v2538_v1, %v6209_v34  ;;  %v2988_v4 = vadd.f32 %v2987_v40, %v6211_v60  ;;  %v2540_v30 = vpop.f32.mrb[161].mxu1  ;;  %v2989_v51 = vpop.f32.mrb[177].mxu0 }
 0x40d   : > { %v3594_v58 = vmax.f32 %v3593_v53, %v3327_v35  ;;  %v3732_v42 = vmax.f32 %v3731_v55, %v3329_v31  ;;  %v2541_v3 = vadd.f32 %v2540_v30, %v6217_v23  ;;  %v2990_v38 = vadd.f32 %v2989_v51, %v6219_v61 }
 0x40e   : > { %v3330_v18 = vmax.f32 %v2539_v22, 0.0  ;;  %v3332_v57 = vmax.f32 %v2988_v4, 0.0 }
 0x40f   : > { %v3331_v32 = vmax.f32 %v2541_v3, 0.0  ;;  %v3333_v14 = vmax.f32 %v2990_v38, 0.0  ;;  %v2544_v28 = vpop.f32.mrb[162].mxu1  ;;  %v2993_v12 = vpop.f32.mrb[178].mxu0 }
 0x410   : > { %v3526_v52 = vmax.f32 %v3525_v5, %v3330_v18  ;;  %v3664_v15 = vmax.f32 %v3663_v43, %v3332_v57  ;;  %v2545_v20 = vadd.f32 %v2544_v28, %v6209_v34  ;;  %v2994_v25 = vadd.f32 %v2993_v12, %v6211_v60  ;;  %v2546_v10 = vpop.f32.mrb[163].mxu1  ;;  %v2995_v16 = vpop.f32.mrb[179].mxu0 }
 0x411   : > { %v3595_v46 = vmax.f32 %v3594_v58, %v3331_v32  ;;  %v3733_v36 = vmax.f32 %v3732_v42, %v3333_v14  ;;  %v2547_v17 = vadd.f32 %v2546_v10, %v6217_v23  ;;  %v2996_v44 = vadd.f32 %v2995_v16, %v6219_v61 }
 0x412   : > { %v3334_v8 = vmax.f32 %v2545_v20, 0.0  ;;  %v3336_v48 = vmax.f32 %v2994_v25, 0.0 }
 0x413   : > { %v3335_v37 = vmax.f32 %v2547_v17, 0.0  ;;  %v3337_v7 = vmax.f32 %v2996_v44, 0.0  ;;  %v2550_v63 = vpop.f32.mrb[164].mxu1  ;;  %v2999_v59 = vpop.f32.mrb[180].mxu0 }
 0x414   : > { %v3527_v45 = vmax.f32 %v3526_v52, %v3334_v8  ;;  %v3665_v9 = vmax.f32 %v3664_v15, %v3336_v48  ;;  %v2551_v21 = vadd.f32 %v2550_v63, %v6209_v34  ;;  %v3000_v62 = vadd.f32 %v2999_v59, %v6211_v60  ;;  %v2552_v49 = vpop.f32.mrb[165].mxu1  ;;  %v3001_v50 = vpop.f32.mrb[181].mxu0 }
 0x415   : > { %v3596_v56 = vmax.f32 %v3595_v46, %v3335_v37  ;;  %v3734_v19 = vmax.f32 %v3733_v36, %v3337_v7  ;;  %v2553_v33 = vadd.f32 %v2552_v49, %v6217_v23  ;;  %v3002_v41 = vadd.f32 %v3001_v50, %v6219_v61 }
 0x416   : > { %v3338_v26 = vmax.f32 %v2551_v21, 0.0  ;;  %v3340_v0 = vmax.f32 %v3000_v62, 0.0 }
 0x417   : > { %v3339_v47 = vmax.f32 %v2553_v33, 0.0  ;;  %v3341_v54 = vmax.f32 %v3002_v41, 0.0  ;;  %v2556_v27 = vpop.f32.mrb[166].mxu1  ;;  %v3005_v6 = vpop.f32.mrb[182].mxu0 }
 0x418   : > { %v3528_v53 = vmax.f32 %v3527_v45, %v3338_v26  ;;  %v3666_v55 = vmax.f32 %v3665_v9, %v3340_v0  ;;  %v2557_v13 = vadd.f32 %v2556_v27, %v6209_v34  ;;  %v3006_v24 = vadd.f32 %v3005_v6, %v6211_v60  ;;  %v2558_v11 = vpop.f32.mrb[167].mxu1  ;;  %v3007_v39 = vpop.f32.mrb[183].mxu0 }
 0x419   : > { %v3597_v35 = vmax.f32 %v3596_v56, %v3339_v47  ;;  %v3735_v31 = vmax.f32 %v3734_v19, %v3341_v54  ;;  %v2559_v1 = vadd.f32 %v2558_v11, %v6217_v23  ;;  %v3008_v40 = vadd.f32 %v3007_v39, %v6219_v61 }
 0x41a   : > { %v3342_v5 = vmax.f32 %v2557_v13, 0.0  ;;  %v3344_v43 = vmax.f32 %v3006_v24, 0.0 }
 0x41b   : > { %v3343_v22 = vmax.f32 %v2559_v1, 0.0  ;;  %v3345_v4 = vmax.f32 %v3008_v40, 0.0  ;;  %v2562_v30 = vpop.f32.mrb[168].mxu1  ;;  %v3011_v51 = vpop.f32.mrb[184].mxu0 }
 0x41c   : > { %v3529_v58 = vmax.f32 %v3528_v53, %v3342_v5  ;;  %v3667_v42 = vmax.f32 %v3666_v55, %v3344_v43  ;;  %v2563_v3 = vadd.f32 %v2562_v30, %v6209_v34  ;;  %v3012_v38 = vadd.f32 %v3011_v51, %v6211_v60  ;;  %v2564_v18 = vpop.f32.mrb[169].mxu1  ;;  %v3013_v57 = vpop.f32.mrb[185].mxu0 }
 0x41d   : > { %v3598_v32 = vmax.f32 %v3597_v35, %v3343_v22  ;;  %v3736_v14 = vmax.f32 %v3735_v31, %v3345_v4  ;;  %v2565_v28 = vadd.f32 %v2564_v18, %v6217_v23  ;;  %v3014_v12 = vadd.f32 %v3013_v57, %v6219_v61 }
 0x41e   : > { %v3346_v52 = vmax.f32 %v2563_v3, 0.0  ;;  %v3348_v15 = vmax.f32 %v3012_v38, 0.0 }
 0x41f   : > { %v3347_v20 = vmax.f32 %v2565_v28, 0.0  ;;  %v3349_v25 = vmax.f32 %v3014_v12, 0.0  ;;  %v2568_v10 = vpop.f32.mrb[170].mxu1  ;;  %v3017_v16 = vpop.f32.mrb[186].mxu0 }
 0x420   : > { %v3530_v46 = vmax.f32 %v3529_v58, %v3346_v52  ;;  %v3668_v36 = vmax.f32 %v3667_v42, %v3348_v15  ;;  %v2569_v17 = vadd.f32 %v2568_v10, %v6209_v34  ;;  %v3018_v44 = vadd.f32 %v3017_v16, %v6211_v60  ;;  %v2570_v8 = vpop.f32.mrb[171].mxu1  ;;  %v3019_v48 = vpop.f32.mrb[187].mxu0 }
 0x421   : > { %v3599_v37 = vmax.f32 %v3598_v32, %v3347_v20  ;;  %v3737_v7 = vmax.f32 %v3736_v14, %v3349_v25  ;;  %v2571_v63 = vadd.f32 %v2570_v8, %v6217_v23  ;;  %v3020_v59 = vadd.f32 %v3019_v48, %v6219_v61 }
 0x422   : > { %v3350_v45 = vmax.f32 %v2569_v17, 0.0  ;;  %v3352_v9 = vmax.f32 %v3018_v44, 0.0 }
 0x423   : > { %v3351_v21 = vmax.f32 %v2571_v63, 0.0  ;;  %v3353_v62 = vmax.f32 %v3020_v59, 0.0  ;;  %v2574_v49 = vpop.f32.mrb[172].mxu1  ;;  %v3023_v50 = vpop.f32.mrb[188].mxu0 }
 0x424   : > { %v3531_v56 = vmax.f32 %v3530_v46, %v3350_v45  ;;  %v3669_v19 = vmax.f32 %v3668_v36, %v3352_v9  ;;  %v2575_v33 = vadd.f32 %v2574_v49, %v6209_v34  ;;  %v3024_v41 = vadd.f32 %v3023_v50, %v6211_v60  ;;  %v2576_v26 = vpop.f32.mrb[173].mxu1  ;;  %v3025_v0 = vpop.f32.mrb[189].mxu0 }
 0x425   : > { %v3600_v47 = vmax.f32 %v3599_v37, %v3351_v21  ;;  %v3738_v54 = vmax.f32 %v3737_v7, %v3353_v62  ;;  %v2577_v27 = vadd.f32 %v2576_v26, %v6217_v23  ;;  %v3026_v6 = vadd.f32 %v3025_v0, %v6219_v61 }
 0x426   : > { %v3354_v53 = vmax.f32 %v2575_v33, 0.0  ;;  %v3356_v55 = vmax.f32 %v3024_v41, 0.0 }
 0x427   : > { %v3355_v13 = vmax.f32 %v2577_v27, 0.0  ;;  %v3357_v24 = vmax.f32 %v3026_v6, 0.0  ;;  %v2580_v11 = vpop.f32.mrb[174].mxu1  ;;  %v3029_v39 = vpop.f32.mrb[190].mxu0 }
 0x428   : > { %v3532_v35 = vmax.f32 %v3531_v56, %v3354_v53  ;;  %v3670_v31 = vmax.f32 %v3669_v19, %v3356_v55  ;;  %v2581_v1 = vadd.f32 %v2580_v11, %v6209_v34  ;;  %v3030_v40 = vadd.f32 %v3029_v39, %v6211_v60  ;;  %v2582_v5 = vpop.f32.mrb[175].mxu1  ;;  %v3031_v43 = vpop.f32.mrb[191].mxu0 }
 0x429   : > { %v3601_v22 = vmax.f32 %v3600_v47, %v3355_v13  ;;  %v3739_v4 = vmax.f32 %v3738_v54, %v3357_v24  ;;  %v2583_v30 = vadd.f32 %v2582_v5, %v6217_v23  ;;  %v3032_v51 = vadd.f32 %v3031_v43, %v6219_v61 }
 0x42a   : > { %v3358_v58 = vmax.f32 %v2581_v1, 0.0  ;;  %v3360_v42 = vmax.f32 %v3030_v40, 0.0 }
 0x42b   : > { %v3359_v3 = vmax.f32 %v2583_v30, 0.0  ;;  %v3361_v38 = vmax.f32 %v3032_v51, 0.0  ;;  %v2586_v18 = vpop.f32.mrb[176].mxu1  ;;  %v3035_v57 = vpop.f32.mrb[192].mxu0 }
 0x42c   : > { %v3533_v32 = vmax.f32 %v3532_v35, %v3358_v58  ;;  %v3671_v14 = vmax.f32 %v3670_v31, %v3360_v42  ;;  %v2587_v28 = vadd.f32 %v2586_v18, %v6209_v34  ;;  %v3036_v12 = vadd.f32 %v3035_v57, %v6211_v60  ;;  %v2588_v52 = vpop.f32.mrb[177].mxu1  ;;  %v3037_v15 = vpop.f32.mrb[193].mxu0 }
 0x42d   : > { %v3602_v20 = vmax.f32 %v3601_v22, %v3359_v3  ;;  %v3740_v25 = vmax.f32 %v3739_v4, %v3361_v38  ;;  %v2589_v10 = vadd.f32 %v2588_v52, %v6217_v23  ;;  %v3038_v16 = vadd.f32 %v3037_v15, %v6219_v61 }
 0x42e   : > { %v3362_v46 = vmax.f32 %v2587_v28, 0.0  ;;  %v3364_v36 = vmax.f32 %v3036_v12, 0.0 }
 0x42f   : > { %v3363_v17 = vmax.f32 %v2589_v10, 0.0  ;;  %v3365_v44 = vmax.f32 %v3038_v16, 0.0  ;;  %v2592_v8 = vpop.f32.mrb[178].mxu1  ;;  %v3041_v48 = vpop.f32.mrb[194].mxu0 }
 0x430   : > { %v3534_v37 = vmax.f32 %v3533_v32, %v3362_v46  ;;  %v3672_v7 = vmax.f32 %v3671_v14, %v3364_v36  ;;  %v2593_v63 = vadd.f32 %v2592_v8, %v6209_v34  ;;  %v3042_v59 = vadd.f32 %v3041_v48, %v6211_v60  ;;  %v2594_v45 = vpop.f32.mrb[179].mxu1  ;;  %v3043_v9 = vpop.f32.mrb[195].mxu0 }
 0x431   : > { %v3603_v21 = vmax.f32 %v3602_v20, %v3363_v17  ;;  %v3741_v62 = vmax.f32 %v3740_v25, %v3365_v44  ;;  %v2595_v49 = vadd.f32 %v2594_v45, %v6217_v23  ;;  %v3044_v50 = vadd.f32 %v3043_v9, %v6219_v61 }
 0x432   : > { %v3366_v56 = vmax.f32 %v2593_v63, 0.0  ;;  %v3368_v19 = vmax.f32 %v3042_v59, 0.0 }
 0x433   : > { %v3367_v33 = vmax.f32 %v2595_v49, 0.0  ;;  %v3369_v41 = vmax.f32 %v3044_v50, 0.0  ;;  %v2598_v26 = vpop.f32.mrb[180].mxu1  ;;  %v3047_v0 = vpop.f32.mrb[196].mxu0 }
 0x434   : > { %v3535_v47 = vmax.f32 %v3534_v37, %v3366_v56  ;;  %v3673_v54 = vmax.f32 %v3672_v7, %v3368_v19  ;;  %v2599_v27 = vadd.f32 %v2598_v26, %v6209_v34  ;;  %v3048_v6 = vadd.f32 %v3047_v0, %v6211_v60  ;;  %v2600_v53 = vpop.f32.mrb[181].mxu1  ;;  %v3049_v55 = vpop.f32.mrb[197].mxu0 }
 0x435   : > { %v3604_v13 = vmax.f32 %v3603_v21, %v3367_v33  ;;  %v3742_v24 = vmax.f32 %v3741_v62, %v3369_v41  ;;  %v2601_v11 = vadd.f32 %v2600_v53, %v6217_v23  ;;  %v3050_v39 = vadd.f32 %v3049_v55, %v6219_v61 }
 0x436   : > { %v3370_v35 = vmax.f32 %v2599_v27, 0.0  ;;  %v3372_v31 = vmax.f32 %v3048_v6, 0.0 }
 0x437   : > { %v3371_v1 = vmax.f32 %v2601_v11, 0.0  ;;  %v3373_v40 = vmax.f32 %v3050_v39, 0.0  ;;  %v2604_v5 = vpop.f32.mrb[182].mxu1  ;;  %v3053_v43 = vpop.f32.mrb[198].mxu0 }
 0x438   : > { %v3536_v22 = vmax.f32 %v3535_v47, %v3370_v35  ;;  %v3674_v4 = vmax.f32 %v3673_v54, %v3372_v31  ;;  %v2605_v30 = vadd.f32 %v2604_v5, %v6209_v34  ;;  %v3054_v51 = vadd.f32 %v3053_v43, %v6211_v60  ;;  %v2606_v58 = vpop.f32.mrb[183].mxu1  ;;  %v3055_v42 = vpop.f32.mrb[199].mxu0 }
 0x439   : > { %v3605_v3 = vmax.f32 %v3604_v13, %v3371_v1  ;;  %v3743_v38 = vmax.f32 %v3742_v24, %v3373_v40  ;;  %v2607_v18 = vadd.f32 %v2606_v58, %v6217_v23  ;;  %v3056_v57 = vadd.f32 %v3055_v42, %v6219_v61 }
 0x43a   : > { %v3374_v32 = vmax.f32 %v2605_v30, 0.0  ;;  %v3376_v14 = vmax.f32 %v3054_v51, 0.0 }
 0x43b   : > { %v3375_v28 = vmax.f32 %v2607_v18, 0.0  ;;  %v3377_v12 = vmax.f32 %v3056_v57, 0.0  ;;  %v2610_v52 = vpop.f32.mrb[184].mxu1  ;;  %v3059_v15 = vpop.f32.mrb[200].mxu0 }
 0x43c   : > { %v3537_v20 = vmax.f32 %v3536_v22, %v3374_v32  ;;  %v3675_v25 = vmax.f32 %v3674_v4, %v3376_v14  ;;  %v2611_v10 = vadd.f32 %v2610_v52, %v6209_v34  ;;  %v3060_v16 = vadd.f32 %v3059_v15, %v6211_v60  ;;  %v2612_v46 = vpop.f32.mrb[185].mxu1  ;;  %v3061_v36 = vpop.f32.mrb[201].mxu0 }
 0x43d   : > { %v3606_v17 = vmax.f32 %v3605_v3, %v3375_v28  ;;  %v3744_v44 = vmax.f32 %v3743_v38, %v3377_v12  ;;  %v2613_v8 = vadd.f32 %v2612_v46, %v6217_v23  ;;  %v3062_v48 = vadd.f32 %v3061_v36, %v6219_v61 }
 0x43e   : > { %v3378_v37 = vmax.f32 %v2611_v10, 0.0  ;;  %v3380_v7 = vmax.f32 %v3060_v16, 0.0 }
 0x43f   : > { %v3379_v63 = vmax.f32 %v2613_v8, 0.0  ;;  %v3381_v59 = vmax.f32 %v3062_v48, 0.0  ;;  %v2616_v45 = vpop.f32.mrb[186].mxu1  ;;  %v3065_v9 = vpop.f32.mrb[202].mxu0 }
 0x440   : > { %v3538_v21 = vmax.f32 %v3537_v20, %v3378_v37  ;;  %v3676_v62 = vmax.f32 %v3675_v25, %v3380_v7  ;;  %v2617_v49 = vadd.f32 %v2616_v45, %v6209_v34  ;;  %v3066_v50 = vadd.f32 %v3065_v9, %v6211_v60  ;;  %v2618_v56 = vpop.f32.mrb[187].mxu1  ;;  %v3067_v19 = vpop.f32.mrb[203].mxu0 }
 0x441   : > { %v3607_v33 = vmax.f32 %v3606_v17, %v3379_v63  ;;  %v3745_v41 = vmax.f32 %v3744_v44, %v3381_v59  ;;  %v2619_v26 = vadd.f32 %v2618_v56, %v6217_v23  ;;  %v3068_v0 = vadd.f32 %v3067_v19, %v6219_v61 }
 0x442   : > { %v3382_v47 = vmax.f32 %v2617_v49, 0.0  ;;  %v3384_v54 = vmax.f32 %v3066_v50, 0.0  ;;  %v4826_v59 = vmov -inf  }
 0x443   : > { %v3383_v27 = vmax.f32 %v2619_v26, 0.0  ;;  %v3385_v6 = vmax.f32 %v3068_v0, 0.0  ;;  %v2622_v53 = vpop.f32.mrb[188].mxu1  ;;  %v3071_v55 = vpop.f32.mrb[204].mxu0  ;;  %390 = vst.msk [vmem:[#allocation2] sm:$0xf] %vm6400_vm2, %v4826_v59 }
 0x444   : > { %v3539_v13 = vmax.f32 %v3538_v21, %v3382_v47  ;;  %v3677_v24 = vmax.f32 %v3676_v62, %v3384_v54  ;;  %v2623_v11 = vadd.f32 %v2622_v53, %v6209_v34  ;;  %v3072_v39 = vadd.f32 %v3071_v55, %v6211_v60  ;;  %v2624_v35 = vpop.f32.mrb[189].mxu1  ;;  %v3073_v31 = vpop.f32.mrb[205].mxu0 }
 0x445   : > { %v3608_v1 = vmax.f32 %v3607_v33, %v3383_v27  ;;  %v3746_v40 = vmax.f32 %v3745_v41, %v3385_v6  ;;  %v2625_v5 = vadd.f32 %v2624_v35, %v6217_v23  ;;  %v3074_v43 = vadd.f32 %v3073_v31, %v6219_v61 }
 0x446   : > { %v3386_v22 = vmax.f32 %v2623_v11, 0.0  ;;  %v3388_v4 = vmax.f32 %v3072_v39, 0.0 }
 0x447   : > { %v3387_v30 = vmax.f32 %v2625_v5, 0.0  ;;  %v3389_v51 = vmax.f32 %v3074_v43, 0.0  ;;  %v2628_v58 = vpop.f32.mrb[190].mxu1  ;;  %v3077_v42 = vpop.f32.mrb[206].mxu0 }
 0x448   : > { %v3540_v3 = vmax.f32 %v3539_v13, %v3386_v22  ;;  %v3678_v38 = vmax.f32 %v3677_v24, %v3388_v4  ;;  %v2629_v18 = vadd.f32 %v2628_v58, %v6209_v34  ;;  %v3078_v57 = vadd.f32 %v3077_v42, %v6211_v60  ;;  %v2630_v32 = vpop.f32.mrb[191].mxu1  ;;  %v3079_v14 = vpop.f32.mrb[207].mxu0 }
 0x449   : > { %v3609_v28 = vmax.f32 %v3608_v1, %v3387_v30  ;;  %v3747_v12 = vmax.f32 %v3746_v40, %v3389_v51  ;;  %v2631_v52 = vadd.f32 %v2630_v32, %v6217_v23  ;;  %v3080_v15 = vadd.f32 %v3079_v14, %v6219_v61 }
 0x44a   : > { %v3390_v20 = vmax.f32 %v2629_v18, 0.0  ;;  %v3392_v25 = vmax.f32 %v3078_v57, 0.0 }
 0x44b   : > { %v3391_v10 = vmax.f32 %v2631_v52, 0.0  ;;  %v3393_v16 = vmax.f32 %v3080_v15, 0.0  ;;  %v2634_v46 = vpop.f32.mrb[192].mxu1  ;;  %v3083_v36 = vpop.f32.mrb[208].mxu0 }
 0x44c   : > { %v3541_v44 = vmax.f32 %v3540_v3, %v3390_v20  ;;  %v3679_v8 = vmax.f32 %v3678_v38, %v3392_v25  ;;  %v2635_v48 = vadd.f32 %v2634_v46, %v6209_v34  ;;  %v3084_v37 = vadd.f32 %v3083_v36, %v6211_v60  ;;  %v2636_v7 = vpop.f32.mrb[193].mxu1  ;;  %v3085_v63 = vpop.f32.mrb[209].mxu0 }
 0x44d   : > { %v3610_v45 = vmax.f32 %v3609_v28, %v3391_v10  ;;  %v3748_v9 = vmax.f32 %v3747_v12, %v3393_v16  ;;  %v2637_v21 = vadd.f32 %v2636_v7, %v6217_v23  ;;  %v3086_v29 = vadd.f32 %v3085_v63, %v6219_v61 }
 0x44e   : > { %v3394_v62 = vmax.f32 %v2635_v48, 0.0  ;;  %v3396_v49 = vmax.f32 %v3084_v37, 0.0 }
 0x44f   : > { %v3395_v50 = vmax.f32 %v2637_v21, 0.0  ;;  %v3397_v56 = vmax.f32 %v3086_v29, 0.0  ;;  %v2640_v19 = vpop.f32.mrb[194].mxu1  ;;  %v3089_v33 = vpop.f32.mrb[210].mxu0 }
 0x450   : > { %v3542_v41 = vmax.f32 %v3541_v44, %v3394_v62  ;;  %v3680_v26 = vmax.f32 %v3679_v8, %v3396_v49  ;;  %v2641_v0 = vadd.f32 %v2640_v19, %v6209_v34  ;;  %v3090_v47 = vadd.f32 %v3089_v33, %v6211_v60  ;;  %v2642_v54 = vpop.f32.mrb[195].mxu1  ;;  %v3091_v27 = vpop.f32.mrb[211].mxu0 }
 0x451   : > { %v3611_v6 = vmax.f32 %v3610_v45, %v3395_v50  ;;  %v3749_v53 = vmax.f32 %v3748_v9, %v3397_v56  ;;  %v2643_v55 = vadd.f32 %v2642_v54, %v6217_v23  ;;  %v3092_v13 = vadd.f32 %v3091_v27, %v6219_v61 }
 0x452   : > { %v3398_v24 = vmax.f32 %v2641_v0, 0.0  ;;  %v3400_v11 = vmax.f32 %v3090_v47, 0.0 }
 0x453   : > { %v3399_v39 = vmax.f32 %v2643_v55, 0.0  ;;  %v3401_v35 = vmax.f32 %v3092_v13, 0.0  ;;  %v2646_v31 = vpop.f32.mrb[196].mxu1  ;;  %v3095_v1 = vpop.f32.mrb[212].mxu0 }
 0x454   : > { %v3543_v40 = vmax.f32 %v3542_v41, %v3398_v24  ;;  %v3681_v5 = vmax.f32 %v3680_v26, %v3400_v11  ;;  %v2647_v43 = vadd.f32 %v2646_v31, %v6209_v34  ;;  %v3096_v22 = vadd.f32 %v3095_v1, %v6211_v60  ;;  %v2648_v4 = vpop.f32.mrb[197].mxu1  ;;  %v3097_v30 = vpop.f32.mrb[213].mxu0 }
 0x455   : > { %v3612_v51 = vmax.f32 %v3611_v6, %v3399_v39  ;;  %v3750_v58 = vmax.f32 %v3749_v53, %v3401_v35  ;;  %v2649_v42 = vadd.f32 %v2648_v4, %v6217_v23  ;;  %v3098_v3 = vadd.f32 %v3097_v30, %v6219_v61 }
 0x456   : > { %v3402_v38 = vmax.f32 %v2647_v43, 0.0  ;;  %v3404_v18 = vmax.f32 %v3096_v22, 0.0 }
 0x457   : > { %v3403_v57 = vmax.f32 %v2649_v42, 0.0  ;;  %v3405_v32 = vmax.f32 %v3098_v3, 0.0  ;;  %v2652_v14 = vpop.f32.mrb[198].mxu1  ;;  %v3101_v28 = vpop.f32.mrb[214].mxu0 }
 0x458   : > { %v3544_v12 = vmax.f32 %v3543_v40, %v3402_v38  ;;  %v3682_v52 = vmax.f32 %v3681_v5, %v3404_v18  ;;  %v2653_v15 = vadd.f32 %v2652_v14, %v6209_v34  ;;  %v3102_v20 = vadd.f32 %v3101_v28, %v6211_v60  ;;  %v2654_v25 = vpop.f32.mrb[199].mxu1  ;;  %v3103_v10 = vpop.f32.mrb[215].mxu0 }
 0x459   : > { %v3613_v16 = vmax.f32 %v3612_v51, %v3403_v57  ;;  %v3751_v46 = vmax.f32 %v3750_v58, %v3405_v32  ;;  %v2655_v36 = vadd.f32 %v2654_v25, %v6217_v23  ;;  %v3104_v44 = vadd.f32 %v3103_v10, %v6219_v61 }
 0x45a   : > { %v3406_v8 = vmax.f32 %v2653_v15, 0.0  ;;  %v3408_v48 = vmax.f32 %v3102_v20, 0.0 }
 0x45b   : > { %v3407_v37 = vmax.f32 %v2655_v36, 0.0  ;;  %v3409_v7 = vmax.f32 %v3104_v44, 0.0  ;;  %v2658_v63 = vpop.f32.mrb[200].mxu1  ;;  %v3107_v59 = vpop.f32.mrb[216].mxu0 }
 0x45c   : > { %v3545_v45 = vmax.f32 %v3544_v12, %v3406_v8  ;;  %v3683_v9 = vmax.f32 %v3682_v52, %v3408_v48  ;;  %v2659_v21 = vadd.f32 %v2658_v63, %v6209_v34  ;;  %v3108_v29 = vadd.f32 %v3107_v59, %v6211_v60  ;;  %v2660_v62 = vpop.f32.mrb[201].mxu1  ;;  %v3109_v49 = vpop.f32.mrb[217].mxu0 }
 0x45d   : > { %v3614_v50 = vmax.f32 %v3613_v16, %v3407_v37  ;;  %v3752_v56 = vmax.f32 %v3751_v46, %v3409_v7  ;;  %v2661_v19 = vadd.f32 %v2660_v62, %v6217_v23  ;;  %v3110_v33 = vadd.f32 %v3109_v49, %v6219_v61 }
 0x45e   : > { %v3410_v41 = vmax.f32 %v2659_v21, 0.0  ;;  %v3412_v26 = vmax.f32 %v3108_v29, 0.0 }
 0x45f   : > { %v3411_v0 = vmax.f32 %v2661_v19, 0.0  ;;  %v3413_v47 = vmax.f32 %v3110_v33, 0.0  ;;  %v2664_v54 = vpop.f32.mrb[202].mxu1  ;;  %v3113_v27 = vpop.f32.mrb[218].mxu0 }
 0x460   : > { %v3546_v6 = vmax.f32 %v3545_v45, %v3410_v41  ;;  %v3684_v53 = vmax.f32 %v3683_v9, %v3412_v26  ;;  %v2665_v55 = vadd.f32 %v2664_v54, %v6209_v34  ;;  %v3114_v13 = vadd.f32 %v3113_v27, %v6211_v60  ;;  %v2666_v24 = vpop.f32.mrb[203].mxu1  ;;  %v3115_v11 = vpop.f32.mrb[219].mxu0 }
 0x461   : > { %v3615_v39 = vmax.f32 %v3614_v50, %v3411_v0  ;;  %v3753_v35 = vmax.f32 %v3752_v56, %v3413_v47  ;;  %v2667_v31 = vadd.f32 %v2666_v24, %v6217_v23  ;;  %v3116_v1 = vadd.f32 %v3115_v11, %v6219_v61 }
 0x462   : > { %v3414_v40 = vmax.f32 %v2665_v55, 0.0  ;;  %v3416_v5 = vmax.f32 %v3114_v13, 0.0 }
 0x463   : > { %v3415_v43 = vmax.f32 %v2667_v31, 0.0  ;;  %v3417_v22 = vmax.f32 %v3116_v1, 0.0  ;;  %v2670_v4 = vpop.f32.mrb[204].mxu1  ;;  %v3119_v30 = vpop.f32.mrb[220].mxu0 }
 0x464   : > { %v3547_v51 = vmax.f32 %v3546_v6, %v3414_v40  ;;  %v3685_v58 = vmax.f32 %v3684_v53, %v3416_v5  ;;  %v2671_v42 = vadd.f32 %v2670_v4, %v6209_v34  ;;  %v3120_v3 = vadd.f32 %v3119_v30, %v6211_v60  ;;  %v2672_v38 = vpop.f32.mrb[205].mxu1  ;;  %v3121_v18 = vpop.f32.mrb[221].mxu0 }
 0x465   : > { %v3616_v57 = vmax.f32 %v3615_v39, %v3415_v43  ;;  %v3754_v32 = vmax.f32 %v3753_v35, %v3417_v22  ;;  %v2673_v14 = vadd.f32 %v2672_v38, %v6217_v23  ;;  %v3122_v28 = vadd.f32 %v3121_v18, %v6219_v61 }
 0x466   : > { %v3418_v12 = vmax.f32 %v2671_v42, 0.0  ;;  %v3420_v52 = vmax.f32 %v3120_v3, 0.0 }
 0x467   : > { %v3419_v15 = vmax.f32 %v2673_v14, 0.0  ;;  %v3421_v20 = vmax.f32 %v3122_v28, 0.0  ;;  %v2676_v25 = vpop.f32.mrb[206].mxu1  ;;  %v3125_v10 = vpop.f32.mrb[222].mxu0 }
 0x468   : > { %v3548_v16 = vmax.f32 %v3547_v51, %v3418_v12  ;;  %v3686_v46 = vmax.f32 %v3685_v58, %v3420_v52  ;;  %v2677_v36 = vadd.f32 %v2676_v25, %v6209_v34  ;;  %v3126_v44 = vadd.f32 %v3125_v10, %v6211_v60  ;;  %v2678_v8 = vpop.f32.mrb[207].mxu1  ;;  %v3127_v48 = vpop.f32.mrb[223].mxu0 }
 0x469   : > { %v3617_v37 = vmax.f32 %v3616_v57, %v3419_v15  ;;  %v3755_v7 = vmax.f32 %v3754_v32, %v3421_v20  ;;  %v2679_v63 = vadd.f32 %v2678_v8, %v6217_v23  ;;  %v3128_v59 = vadd.f32 %v3127_v48, %v6219_v61 }
 0x46a   : > { %v3422_v45 = vmax.f32 %v2677_v36, 0.0  ;;  %v3424_v9 = vmax.f32 %v3126_v44, 0.0 }
 0x46b   : > { %v3423_v21 = vmax.f32 %v2679_v63, 0.0  ;;  %v3425_v29 = vmax.f32 %v3128_v59, 0.0  ;;  %v2682_v62 = vpop.f32.mrb[208].mxu1  ;;  %v3131_v49 = vpop.f32.mrb[224].mxu0 }
 0x46c   : > { %v3549_v50 = vmax.f32 %v3548_v16, %v3422_v45  ;;  %v3687_v56 = vmax.f32 %v3686_v46, %v3424_v9  ;;  %v2683_v19 = vadd.f32 %v2682_v62, %v6209_v34  ;;  %v3132_v33 = vadd.f32 %v3131_v49, %v6211_v60  ;;  %v2684_v41 = vpop.f32.mrb[209].mxu1  ;;  %v3133_v26 = vpop.f32.mrb[225].mxu0 }
 0x46d   : > { %v3618_v0 = vmax.f32 %v3617_v37, %v3423_v21  ;;  %v3756_v47 = vmax.f32 %v3755_v7, %v3425_v29  ;;  %v2685_v54 = vadd.f32 %v2684_v41, %v6217_v23  ;;  %v3134_v27 = vadd.f32 %v3133_v26, %v6219_v61 }
 0x46e   : > { %v3426_v6 = vmax.f32 %v2683_v19, 0.0  ;;  %v3428_v53 = vmax.f32 %v3132_v33, 0.0 }
 0x46f   : > { %v3427_v55 = vmax.f32 %v2685_v54, 0.0  ;;  %v3429_v13 = vmax.f32 %v3134_v27, 0.0  ;;  %v2688_v24 = vpop.f32.mrb[210].mxu1  ;;  %v3137_v11 = vpop.f32.mrb[226].mxu0 }
 0x470   : > { %v3550_v39 = vmax.f32 %v3549_v50, %v3426_v6  ;;  %v3688_v35 = vmax.f32 %v3687_v56, %v3428_v53  ;;  %v2689_v31 = vadd.f32 %v2688_v24, %v6209_v34  ;;  %v3138_v1 = vadd.f32 %v3137_v11, %v6211_v60  ;;  %v2690_v40 = vpop.f32.mrb[211].mxu1  ;;  %v3139_v5 = vpop.f32.mrb[227].mxu0 }
 0x471   : > { %v3619_v43 = vmax.f32 %v3618_v0, %v3427_v55  ;;  %v3757_v22 = vmax.f32 %v3756_v47, %v3429_v13  ;;  %v2691_v4 = vadd.f32 %v2690_v40, %v6217_v23  ;;  %v3140_v30 = vadd.f32 %v3139_v5, %v6219_v61 }
 0x472   : > { %v3430_v51 = vmax.f32 %v2689_v31, 0.0  ;;  %v3432_v58 = vmax.f32 %v3138_v1, 0.0 }
 0x473   : > { %v3431_v42 = vmax.f32 %v2691_v4, 0.0  ;;  %v3433_v3 = vmax.f32 %v3140_v30, 0.0  ;;  %v2694_v38 = vpop.f32.mrb[212].mxu1  ;;  %v3143_v18 = vpop.f32.mrb[228].mxu0 }
 0x474   : > { %v3551_v57 = vmax.f32 %v3550_v39, %v3430_v51  ;;  %v3689_v32 = vmax.f32 %v3688_v35, %v3432_v58  ;;  %v2695_v14 = vadd.f32 %v2694_v38, %v6209_v34  ;;  %v3144_v28 = vadd.f32 %v3143_v18, %v6211_v60  ;;  %v2696_v12 = vpop.f32.mrb[213].mxu1  ;;  %v3145_v52 = vpop.f32.mrb[229].mxu0 }
 0x475   : > { %v3620_v15 = vmax.f32 %v3619_v43, %v3431_v42  ;;  %v3758_v20 = vmax.f32 %v3757_v22, %v3433_v3  ;;  %v2697_v25 = vadd.f32 %v2696_v12, %v6217_v23  ;;  %v3146_v10 = vadd.f32 %v3145_v52, %v6219_v61 }
 0x476   : > { %v3434_v16 = vmax.f32 %v2695_v14, 0.0  ;;  %v3436_v46 = vmax.f32 %v3144_v28, 0.0 }
 0x477   : > { %v3435_v36 = vmax.f32 %v2697_v25, 0.0  ;;  %v3437_v44 = vmax.f32 %v3146_v10, 0.0  ;;  %v2700_v8 = vpop.f32.mrb[214].mxu1  ;;  %v3149_v48 = vpop.f32.mrb[230].mxu0 }
 0x478   : > { %v3552_v37 = vmax.f32 %v3551_v57, %v3434_v16  ;;  %v3690_v7 = vmax.f32 %v3689_v32, %v3436_v46  ;;  %v2701_v63 = vadd.f32 %v2700_v8, %v6209_v34  ;;  %v3150_v59 = vadd.f32 %v3149_v48, %v6211_v60  ;;  %v2702_v45 = vpop.f32.mrb[215].mxu1  ;;  %v3151_v9 = vpop.f32.mrb[231].mxu0 }
 0x479   : > { %v3621_v21 = vmax.f32 %v3620_v15, %v3435_v36  ;;  %v3759_v29 = vmax.f32 %v3758_v20, %v3437_v44  ;;  %v2703_v62 = vadd.f32 %v2702_v45, %v6217_v23  ;;  %v3152_v49 = vadd.f32 %v3151_v9, %v6219_v61 }
 0x47a   : > { %v3438_v50 = vmax.f32 %v2701_v63, 0.0  ;;  %v3440_v56 = vmax.f32 %v3150_v59, 0.0 }
 0x47b   : > { %v3439_v19 = vmax.f32 %v2703_v62, 0.0  ;;  %v3441_v33 = vmax.f32 %v3152_v49, 0.0  ;;  %v2706_v41 = vpop.f32.mrb[216].mxu1  ;;  %v3155_v26 = vpop.f32.mrb[232].mxu0 }
 0x47c   : > { %v3553_v0 = vmax.f32 %v3552_v37, %v3438_v50  ;;  %v3691_v47 = vmax.f32 %v3690_v7, %v3440_v56  ;;  %v2707_v54 = vadd.f32 %v2706_v41, %v6209_v34  ;;  %v3156_v27 = vadd.f32 %v3155_v26, %v6211_v60  ;;  %v2708_v6 = vpop.f32.mrb[217].mxu1  ;;  %v3157_v53 = vpop.f32.mrb[233].mxu0 }
 0x47d   : > { %v3622_v55 = vmax.f32 %v3621_v21, %v3439_v19  ;;  %v3760_v13 = vmax.f32 %v3759_v29, %v3441_v33  ;;  %v2709_v24 = vadd.f32 %v2708_v6, %v6217_v23  ;;  %v3158_v11 = vadd.f32 %v3157_v53, %v6219_v61 }
 0x47e   : > { %v3442_v39 = vmax.f32 %v2707_v54, 0.0  ;;  %v3444_v35 = vmax.f32 %v3156_v27, 0.0 }
 0x47f   : > { %v3443_v31 = vmax.f32 %v2709_v24, 0.0  ;;  %v3445_v1 = vmax.f32 %v3158_v11, 0.0  ;;  %v2712_v40 = vpop.f32.mrb[218].mxu1  ;;  %v3161_v5 = vpop.f32.mrb[234].mxu0 }
 0x480   : > { %v3554_v43 = vmax.f32 %v3553_v0, %v3442_v39  ;;  %v3692_v22 = vmax.f32 %v3691_v47, %v3444_v35  ;;  %v2713_v4 = vadd.f32 %v2712_v40, %v6209_v34  ;;  %v3162_v30 = vadd.f32 %v3161_v5, %v6211_v60  ;;  %v2714_v51 = vpop.f32.mrb[219].mxu1  ;;  %v3163_v58 = vpop.f32.mrb[235].mxu0 }
 0x481   : > { %v3623_v42 = vmax.f32 %v3622_v55, %v3443_v31  ;;  %v3761_v3 = vmax.f32 %v3760_v13, %v3445_v1  ;;  %v2715_v38 = vadd.f32 %v2714_v51, %v6217_v23  ;;  %v3164_v18 = vadd.f32 %v3163_v58, %v6219_v61 }
 0x482   : > { %v3446_v57 = vmax.f32 %v2713_v4, 0.0  ;;  %v3448_v32 = vmax.f32 %v3162_v30, 0.0 }
 0x483   : > { %v3447_v14 = vmax.f32 %v2715_v38, 0.0  ;;  %v3449_v28 = vmax.f32 %v3164_v18, 0.0  ;;  %v2718_v12 = vpop.f32.mrb[220].mxu1  ;;  %v3167_v52 = vpop.f32.mrb[236].mxu0 }
 0x484   : > { %v3555_v15 = vmax.f32 %v3554_v43, %v3446_v57  ;;  %v3693_v20 = vmax.f32 %v3692_v22, %v3448_v32  ;;  %v2719_v25 = vadd.f32 %v2718_v12, %v6209_v34  ;;  %v3168_v10 = vadd.f32 %v3167_v52, %v6211_v60  ;;  %v2720_v16 = vpop.f32.mrb[221].mxu1  ;;  %v3169_v46 = vpop.f32.mrb[237].mxu0 }
 0x485   : > { %v3624_v36 = vmax.f32 %v3623_v42, %v3447_v14  ;;  %v3762_v44 = vmax.f32 %v3761_v3, %v3449_v28  ;;  %v2721_v8 = vadd.f32 %v2720_v16, %v6217_v23  ;;  %v3170_v48 = vadd.f32 %v3169_v46, %v6219_v61 }
 0x486   : > { %v3450_v37 = vmax.f32 %v2719_v25, 0.0  ;;  %v3452_v7 = vmax.f32 %v3168_v10, 0.0 }
 0x487   : > { %v3451_v63 = vmax.f32 %v2721_v8, 0.0  ;;  %v3453_v59 = vmax.f32 %v3170_v48, 0.0  ;;  %v2724_v45 = vpop.f32.mrb[222].mxu1  ;;  %v3173_v9 = vpop.f32.mrb[238].mxu0 }
 0x488   : > { %v3556_v21 = vmax.f32 %v3555_v15, %v3450_v37  ;;  %v3694_v29 = vmax.f32 %v3693_v20, %v3452_v7  ;;  %v2725_v62 = vadd.f32 %v2724_v45, %v6209_v34  ;;  %v3174_v49 = vadd.f32 %v3173_v9, %v6211_v60  ;;  %v2726_v50 = vpop.f32.mrb[223].mxu1  ;;  %v3175_v56 = vpop.f32.mrb[239].mxu0 }
 0x489   : > { %v3625_v19 = vmax.f32 %v3624_v36, %v3451_v63  ;;  %v3763_v33 = vmax.f32 %v3762_v44, %v3453_v59  ;;  %v2727_v41 = vadd.f32 %v2726_v50, %v6217_v23  ;;  %v3176_v26 = vadd.f32 %v3175_v56, %v6219_v61 }
 0x48a   : > { %v3454_v0 = vmax.f32 %v2725_v62, 0.0  ;;  %v3456_v47 = vmax.f32 %v3174_v49, 0.0 }
 0x48b   : > { %v3455_v54 = vmax.f32 %v2727_v41, 0.0  ;;  %v3457_v27 = vmax.f32 %v3176_v26, 0.0  ;;  %v2730_v6 = vpop.f32.mrb[224].mxu1  ;;  %v3179_v53 = vpop.f32.mrb[240].mxu0 }
 0x48c   : > { %v3557_v55 = vmax.f32 %v3556_v21, %v3454_v0  ;;  %v3695_v13 = vmax.f32 %v3694_v29, %v3456_v47  ;;  %v2731_v24 = vadd.f32 %v2730_v6, %v6209_v34  ;;  %v3180_v11 = vadd.f32 %v3179_v53, %v6211_v60  ;;  %v2732_v39 = vpop.f32.mrb[225].mxu1  ;;  %v3181_v35 = vpop.f32.mrb[241].mxu0 }
 0x48d   : > { %v3626_v31 = vmax.f32 %v3625_v19, %v3455_v54  ;;  %v3764_v1 = vmax.f32 %v3763_v33, %v3457_v27  ;;  %v2733_v40 = vadd.f32 %v2732_v39, %v6217_v23  ;;  %v3182_v5 = vadd.f32 %v3181_v35, %v6219_v61 }
 0x48e   : > { %v3458_v43 = vmax.f32 %v2731_v24, 0.0  ;;  %v3460_v22 = vmax.f32 %v3180_v11, 0.0 }
 0x48f   : > { %v3459_v4 = vmax.f32 %v2733_v40, 0.0  ;;  %v3461_v30 = vmax.f32 %v3182_v5, 0.0  ;;  %v2736_v51 = vpop.f32.mrb[226].mxu1  ;;  %v3185_v58 = vpop.f32.mrb[242].mxu0 }
 0x490   : > { %v3558_v42 = vmax.f32 %v3557_v55, %v3458_v43  ;;  %v3696_v3 = vmax.f32 %v3695_v13, %v3460_v22  ;;  %v2737_v38 = vadd.f32 %v2736_v51, %v6209_v34  ;;  %v3186_v18 = vadd.f32 %v3185_v58, %v6211_v60  ;;  %v2738_v57 = vpop.f32.mrb[227].mxu1  ;;  %v3187_v32 = vpop.f32.mrb[243].mxu0 }
 0x491   : > { %v3627_v14 = vmax.f32 %v3626_v31, %v3459_v4  ;;  %v3765_v28 = vmax.f32 %v3764_v1, %v3461_v30  ;;  %v2739_v12 = vadd.f32 %v2738_v57, %v6217_v23  ;;  %v3188_v52 = vadd.f32 %v3187_v32, %v6219_v61 }
 0x492   : > { %v3462_v15 = vmax.f32 %v2737_v38, 0.0  ;;  %v3464_v20 = vmax.f32 %v3186_v18, 0.0 }
 0x493   : > { %v3463_v25 = vmax.f32 %v2739_v12, 0.0  ;;  %v3465_v10 = vmax.f32 %v3188_v52, 0.0  ;;  %v2742_v16 = vpop.f32.mrb[228].mxu1  ;;  %v3191_v46 = vpop.f32.mrb[244].mxu0 }
 0x494   : > { %v3559_v36 = vmax.f32 %v3558_v42, %v3462_v15  ;;  %v3697_v44 = vmax.f32 %v3696_v3, %v3464_v20  ;;  %v2743_v8 = vadd.f32 %v2742_v16, %v6209_v34  ;;  %v3192_v48 = vadd.f32 %v3191_v46, %v6211_v60  ;;  %v2744_v37 = vpop.f32.mrb[229].mxu1  ;;  %v3193_v7 = vpop.f32.mrb[245].mxu0 }
 0x495   : > { %v3628_v63 = vmax.f32 %v3627_v14, %v3463_v25  ;;  %v3766_v59 = vmax.f32 %v3765_v28, %v3465_v10  ;;  %v2745_v45 = vadd.f32 %v2744_v37, %v6217_v23  ;;  %v3194_v9 = vadd.f32 %v3193_v7, %v6219_v61 }
 0x496   : > { %v3466_v21 = vmax.f32 %v2743_v8, 0.0  ;;  %v3468_v29 = vmax.f32 %v3192_v48, 0.0 }
 0x497   : > { %v3467_v62 = vmax.f32 %v2745_v45, 0.0  ;;  %v3469_v49 = vmax.f32 %v3194_v9, 0.0  ;;  %v2748_v50 = vpop.f32.mrb[230].mxu1 }
 0x498   : > { %v3560_v56 = vmax.f32 %v3559_v36, %v3466_v21  ;;  %v3698_v19 = vmax.f32 %v3697_v44, %v3468_v29  ;;  %v2749_v33 = vadd.f32 %v2748_v50, %v6209_v34  ;;  %v3197_v41 = vpop.f32.mrb[246].mxu0  ;;  %v2750_v26 = vpop.f32.mrb[231].mxu1 }
 0x499   : > { %v3629_v0 = vmax.f32 %v3628_v63, %v3467_v62  ;;  %v3767_v47 = vmax.f32 %v3766_v59, %v3469_v49  ;;  %v3198_v54 = vadd.f32 %v3197_v41, %v6211_v60  ;;  %v2751_v27 = vadd.f32 %v2750_v26, %v6217_v23  ;;  %v3199_v6 = vpop.f32.mrb[247].mxu0 }
 0x49a   : > { %v3470_v53 = vmax.f32 %v2749_v33, 0.0  ;;  %v3200_v55 = vadd.f32 %v3199_v6, %v6219_v61 }
 0x49b   : > { %v3472_v13 = vmax.f32 %v3198_v54, 0.0  ;;  %v3471_v24 = vmax.f32 %v2751_v27, 0.0  ;;  %v2754_v11 = vpop.f32.mrb[232].mxu1 }
 0x49c   : > { %v3561_v39 = vmax.f32 %v3560_v56, %v3470_v53  ;;  %v3473_v35 = vmax.f32 %v3200_v55, 0.0  ;;  %v2755_v31 = vadd.f32 %v2754_v11, %v6209_v34  ;;  %v3203_v1 = vpop.f32.mrb[248].mxu0  ;;  %v2756_v40 = vpop.f32.mrb[233].mxu1 }
 0x49d   : > { %v3699_v5 = vmax.f32 %v3698_v19, %v3472_v13  ;;  %v3630_v43 = vmax.f32 %v3629_v0, %v3471_v24  ;;  %v3204_v22 = vadd.f32 %v3203_v1, %v6211_v60  ;;  %v2757_v4 = vadd.f32 %v2756_v40, %v6217_v23  ;;  %v3205_v30 = vpop.f32.mrb[249].mxu0 }
 0x49e   : > { %v3768_v51 = vmax.f32 %v3767_v47, %v3473_v35  ;;  %v3474_v58 = vmax.f32 %v2755_v31, 0.0  ;;  %v3206_v42 = vadd.f32 %v3205_v30, %v6219_v61 }
 0x49f   : > { %v3476_v3 = vmax.f32 %v3204_v22, 0.0  ;;  %v3475_v38 = vmax.f32 %v2757_v4, 0.0  ;;  %v2760_v18 = vpop.f32.mrb[234].mxu1 }
 0x4a0   : > { %v3562_v57 = vmax.f32 %v3561_v39, %v3474_v58  ;;  %v3477_v32 = vmax.f32 %v3206_v42, 0.0  ;;  %v2761_v14 = vadd.f32 %v2760_v18, %v6209_v34  ;;  %v3209_v28 = vpop.f32.mrb[250].mxu0  ;;  %v2762_v12 = vpop.f32.mrb[235].mxu1 }
 0x4a1   : > { %v3700_v52 = vmax.f32 %v3699_v5, %v3476_v3  ;;  %v3631_v15 = vmax.f32 %v3630_v43, %v3475_v38  ;;  %v3210_v20 = vadd.f32 %v3209_v28, %v6211_v60  ;;  %v2763_v25 = vadd.f32 %v2762_v12, %v6217_v23  ;;  %v3211_v10 = vpop.f32.mrb[251].mxu0 }
 0x4a2   : > { %v3769_v16 = vmax.f32 %v3768_v51, %v3477_v32  ;;  %v3478_v46 = vmax.f32 %v2761_v14, 0.0  ;;  %v3212_v36 = vadd.f32 %v3211_v10, %v6219_v61 }
 0x4a3   : > { %v3480_v44 = vmax.f32 %v3210_v20, 0.0  ;;  %v3479_v8 = vmax.f32 %v2763_v25, 0.0  ;;  %v2766_v48 = vpop.f32.mrb[236].mxu1 }
 0x4a4   : > { %v3563_v37 = vmax.f32 %v3562_v57, %v3478_v46  ;;  %v3481_v7 = vmax.f32 %v3212_v36, 0.0  ;;  %v2767_v63 = vadd.f32 %v2766_v48, %v6209_v34  ;;  %v3215_v59 = vpop.f32.mrb[252].mxu0  ;;  %v2768_v45 = vpop.f32.mrb[237].mxu1 }
 0x4a5   : > { %v3701_v9 = vmax.f32 %v3700_v52, %v3480_v44  ;;  %v3632_v21 = vmax.f32 %v3631_v15, %v3479_v8  ;;  %v3216_v29 = vadd.f32 %v3215_v59, %v6211_v60  ;;  %v2769_v62 = vadd.f32 %v2768_v45, %v6217_v23  ;;  %v3217_v49 = vpop.f32.mrb[253].mxu0 }
 0x4a6   : > { %v3770_v50 = vmax.f32 %v3769_v16, %v3481_v7  ;;  %v3482_v56 = vmax.f32 %v2767_v63, 0.0  ;;  %v3218_v19 = vadd.f32 %v3217_v49, %v6219_v61 }
 0x4a7   : > { %v3484_v33 = vmax.f32 %v3216_v29, 0.0  ;;  %v3483_v41 = vmax.f32 %v2769_v62, 0.0  ;;  %v2772_v26 = vpop.f32.mrb[238].mxu1 }
 0x4a8   : > { %v3564_v0 = vmax.f32 %v3563_v37, %v3482_v56  ;;  %v3485_v47 = vmax.f32 %v3218_v19, 0.0  ;;  %v2773_v54 = vadd.f32 %v2772_v26, %v6209_v34  ;;  %v3221_v27 = vpop.f32.mrb[254].mxu0  ;;  %v2774_v6 = vpop.f32.mrb[239].mxu1 }
 0x4a9   : > { %v3702_v53 = vmax.f32 %v3701_v9, %v3484_v33  ;;  %v3633_v55 = vmax.f32 %v3632_v21, %v3483_v41  ;;  %v3222_v13 = vadd.f32 %v3221_v27, %v6211_v60  ;;  %v2775_v24 = vadd.f32 %v2774_v6, %v6217_v23  ;;  %v3223_v11 = vpop.f32.mrb[255].mxu0 }
 0x4aa   : > { %v3771_v39 = vmax.f32 %v3770_v50, %v3485_v47  ;;  %v3486_v35 = vmax.f32 %v2773_v54, 0.0  ;;  %v3224_v31 = vadd.f32 %v3223_v11, %v6219_v61 }
 0x4ab   : > { %v3488_v1 = vmax.f32 %v3222_v13, 0.0  ;;  %v3487_v40 = vmax.f32 %v2775_v24, 0.0  ;;  %v2778_v5 = vpop.f32.mrb[240].mxu1 }
 0x4ac   : > { %v3565_v43 = vmax.f32 %v3564_v0, %v3486_v35  ;;  %v3489_v22 = vmax.f32 %v3224_v31, 0.0  ;;  %v2779_v4 = vadd.f32 %v2778_v5, %v6209_v34  ;;  %v3227_v30 = vpop.f32.mrb[0].mxu0  ;;  %v2780_v51 = vpop.f32.mrb[241].mxu1 }
 0x4ad   : > { %v3703_v58 = vmax.f32 %v3702_v53, %v3488_v1  ;;  %v3634_v42 = vmax.f32 %v3633_v55, %v3487_v40  ;;  %v3228_v3 = vadd.f32 %v3227_v30, %v6211_v60  ;;  %v2781_v38 = vadd.f32 %v2780_v51, %v6217_v23  ;;  %v3229_v18 = vpop.f32.mrb[1].mxu0 }
 0x4ae   : > { %v3772_v57 = vmax.f32 %v3771_v39, %v3489_v22  ;;  %v3490_v32 = vmax.f32 %v2779_v4, 0.0  ;;  %v3230_v14 = vadd.f32 %v3229_v18, %v6219_v61 }
 0x4af   : > { %v3492_v28 = vmax.f32 %v3228_v3, 0.0  ;;  %v3491_v12 = vmax.f32 %v2781_v38, 0.0  ;;  %v2784_v52 = vpop.f32.mrb[242].mxu1 }
 0x4b0   : > { %v3566_v15 = vmax.f32 %v3565_v43, %v3490_v32  ;;  %v3493_v20 = vmax.f32 %v3230_v14, 0.0  ;;  %v2785_v25 = vadd.f32 %v2784_v52, %v6209_v34  ;;  %v3233_v10 = vpop.f32.mrb[2].mxu0  ;;  %v2786_v16 = vpop.f32.mrb[243].mxu1 }
 0x4b1   : > { %v3704_v46 = vmax.f32 %v3703_v58, %v3492_v28  ;;  %v3635_v36 = vmax.f32 %v3634_v42, %v3491_v12  ;;  %v3234_v44 = vadd.f32 %v3233_v10, %v6211_v60  ;;  %v2787_v8 = vadd.f32 %v2786_v16, %v6217_v23  ;;  %v3235_v48 = vpop.f32.mrb[3].mxu0 }
 0x4b2   : > { %v3773_v37 = vmax.f32 %v3772_v57, %v3493_v20  ;;  %v3494_v7 = vmax.f32 %v2785_v25, 0.0  ;;  %v3236_v63 = vadd.f32 %v3235_v48, %v6219_v61 }
 0x4b3   : > { %v3496_v59 = vmax.f32 %v3234_v44, 0.0  ;;  %v3495_v45 = vmax.f32 %v2787_v8, 0.0  ;;  %v2790_v9 = vpop.f32.mrb[244].mxu1 }
 0x4b4   : > { %v3567_v21 = vmax.f32 %v3566_v15, %v3494_v7  ;;  %v3497_v29 = vmax.f32 %v3236_v63, 0.0  ;;  %v2791_v62 = vadd.f32 %v2790_v9, %v6209_v34  ;;  %v3239_v49 = vpop.f32.mrb[4].mxu0  ;;  %v2792_v50 = vpop.f32.mrb[245].mxu1 }
 0x4b5   : > { %v3705_v56 = vmax.f32 %v3704_v46, %v3496_v59  ;;  %v3636_v19 = vmax.f32 %v3635_v36, %v3495_v45  ;;  %v3240_v33 = vadd.f32 %v3239_v49, %v6211_v60  ;;  %v2793_v41 = vadd.f32 %v2792_v50, %v6217_v23  ;;  %v3241_v26 = vpop.f32.mrb[5].mxu0 }
 0x4b6   : > { %v3774_v0 = vmax.f32 %v3773_v37, %v3497_v29  ;;  %v3498_v47 = vmax.f32 %v2791_v62, 0.0  ;;  %v3242_v54 = vadd.f32 %v3241_v26, %v6219_v61 }
 0x4b7   : > { %v3500_v27 = vmax.f32 %v3240_v33, 0.0  ;;  %v3499_v6 = vmax.f32 %v2793_v41, 0.0  ;;  %v2796_v53 = vpop.f32.mrb[246].mxu1  ;;  %v3506_v33 = vld [vmem:[#allocation2] sm:$0xf] }
 0x4b8   : > { %v3568_v55 = vmax.f32 %v3567_v21, %v3498_v47  ;;  %v3501_v13 = vmax.f32 %v3242_v54, 0.0  ;;  %v2797_v24 = vadd.f32 %v2796_v53, %v6209_v34  ;;  %v3245_v11 = vpop.f32.mrb[6].mxu0  ;;  %v2798_v39 = vpop.f32.mrb[247].mxu1 }
 0x4b9   : > { %v3706_v35 = vmax.f32 %v3705_v56, %v3500_v27  ;;  %v3637_v31 = vmax.f32 %v3636_v19, %v3499_v6  ;;  %v3246_v1 = vadd.f32 %v3245_v11, %v6211_v60  ;;  %v2799_v40 = vadd.f32 %v2798_v39, %v6217_v23  ;;  %v3247_v5 = vpop.f32.mrb[7].mxu0 }
 0x4ba   : > { %v3775_v43 = vmax.f32 %v3774_v0, %v3501_v13  ;;  %v3502_v22 = vmax.f32 %v2797_v24, 0.0  ;;  %v3248_v4 = vadd.f32 %v3247_v5, %v6219_v61  ;;  %v4827_v23 = vmov 1966171168  }
 0x4bb   : > { %v3504_v30 = vmax.f32 %v3246_v1, 0.0  ;;  %v3503_v51 = vmax.f32 %v2799_v40, 0.0  ;;  %v3790_v52 = vunpack.c.l.s4 %v4827_v23 }
 0x4bc   : > { %v3569_v58 = vmax.f32 %v3568_v55, %v3502_v22  ;;  %v3505_v42 = vmax.f32 %v3248_v4, 0.0 }
 0x4bd   : > { %v3707_v3 = vmax.f32 %v3706_v35, %v3504_v30  ;;  %v3638_v38 = vmax.f32 %v3637_v31, %v3503_v51  ;;  %v3791_v44 = vunpack.c.0.s8 %v3790_v52 }
 0x4be   : > { %v3570_v34 = vrot.slane %v3569_v58, 4  ;;  %v3776_v18 = vmax.f32 %v3775_v43, %v3505_v42 }
 0x4bf   : > { %v3708_v57 = vrot.slane %v3707_v3, 4  ;;  %v3639_v32 = vrot.slane %v3638_v38, 4  ;;  %v3794_v21 = vsub.s32 %v3791_v44, %v5927_v2 }
 0x4c0   : > { %v3571_v14 = vmax.f32 %v3569_v58, %v3570_v34  ;;  %v3777_v28 = vrot.slane %v3776_v18, 4 }
 0x4c1   : > { %v3709_v60 = vmax.f32 %v3707_v3, %v3708_v57  ;;  %v3640_v12 = vmax.f32 %v3638_v38, %v3639_v32 }
 0x4c2   : > { %v3572_v15 = vrot.slane %v3571_v14, 2  ;;  %v3778_v20 = vmax.f32 %v3776_v18, %v3777_v28 }
 0x4c3   : > { %v3710_v25 = vrot.slane %v3709_v60, 2  ;;  %v3641_v61 = vrot.slane %v3640_v12, 2 }
 0x4c4   : > { %v3573_v10 = vmax.f32 %v3571_v14, %v3572_v15  ;;  %v3779_v16 = vrot.slane %v3778_v20, 2 }
 0x4c5   : > { %v3711_v46 = vmax.f32 %v3709_v60, %v3710_v25  ;;  %v3642_v36 = vmax.f32 %v3640_v12, %v3641_v61 }
 0x4c6   : > { %v3574_v8 = vrot.slane %v3573_v10, 1  ;;  %v3780_v48 = vmax.f32 %v3778_v20, %v3779_v16 }
 0x4c7   : > { %v3712_v37 = vrot.slane %v3711_v46, 1  ;;  %v3643_v7 = vrot.slane %v3642_v36, 1 }
 0x4c8   : > { %v3575_v63 = vmax.f32 %v3573_v10, %v3574_v8  ;;  %v3781_v59 = vrot.slane %v3780_v48, 1 }
 0x4c9   : > { %v3713_v45 = vmax.f32 %v3711_v46, %v3712_v37  ;;  %v3644_v9 = vmax.f32 %v3642_v36, %v3643_v7 }
 0x4ca   : > { %v3782_v29 = vmax.f32 %v3780_v48, %v3781_v59 }
 0x4cb   : > { %v3787_v62 = vcombine.low %v3575_v63, %v3644_v9 }
 0x4cc   : > { %v3788_v49 = vcombine.low %v3713_v45, %v3782_v29 }
 0x4cd   : > { %v3795_v50 = vrot.slane %v3787_v62, %v3794_v21 }
 0x4ce   : > { %v3802_v56 = vrot.slane %v3788_v49, %v3794_v21 }
 0x4d0   : > { %v3803_v19 = vcombine.low %v3795_v50, %v3802_v56 }
 0x4d2   : > { %v3810_v41 = vrot.slane %v3803_v19, %v3794_v21 }
 0x4d4   : > { %v3812_v26 = vmax.f32 %v3506_v33, %v3810_v41 }
 0x4d6   : > { %3817 = vst.msk [vmem:[#allocation2] sm:$0xf] %vm6400_vm2, %v3812_v26 }
 0x4dd   : > { %v3821_v2 = vld [vmem:[#allocation2] sm:$0xf] }
 0x4de   : > { %3822 = vst.msk [vmem:[%s373_s13] sm:$0xf] %vm6400_vm2, %v3821_v2 }
 0x4df   : > { %4744 = shalt.err (!%p4741_p6)
}
 0x4e0   : > { %s4745_s11 = scalar_lea.hbm %s6526_s12, 64  ;;  %s4749_s17 = scalar_lea.hbm %s6584_s9, 128 }
 0x4e1   : > { %p4746_p7 = scmp.ne.s32.totalorder %s6526_s12, %s4745_s11  ;;  %p4750_p0 = scmp.lt.u32.totalorder %s6526_s12, %s6584_s9 }
 0x4e2   : > { %p4751_p1 = scmp.lt.u32.totalorder %s4749_s17, %s4745_s11  ;;  %p4753_p4 = scmp.lt.u32.totalorder %s4745_s11, %s6526_s12 }
 0x4e3   : > { %p4747_p9 = pnand %p4746_p7, %p6607_p8 }
 0x4e4   : > { %p4752_p13 = por %p4751_p1, %p4750_p0 }
 0x4e5   : > { %p4748_p12 = pneg %p4747_p9 }
 0x4e6   : > { %p4754_p10 = por %p4753_p4, %p4752_p13 }
 0x4e8   : > { %p4755_p11 = pnand %p4754_p10, %p4748_p12 }
 0x4ea   : > { %4758 = shalt.err (!%p4755_p11)
}
 0x4eb   : > { %4599 = dma.vmem_to_hbm [thread:$0]  (%p6607_p8), %s6528_s16, 64, %s6526_s12, %s3824_s24  }
 0x4ec PF: > { %s6608_s15 = sld [smem:[#allocation15_spill]]  ;;  %p4616_p2 = scmp.ge.s32.totalorder %s4817_s14, 2 }
 0x4ed   : > { %s3850_s13 = sand.u32 1, %s4797_s30  }
 0x4ee   : > { %s3851_s18 = scalar_lea.sflag [#allocation5], %s3850_s13 }
 0x4f2   : > { %p6609_p3 = scmp.ne.s32.totalorder %s6608_s15, 0 }
 0x4f4   : > { %p4609_p5 = pnand %p4616_p2, %p6609_p3 }
 0x4f6   : > { %4792 = dma.done.wait (!%p4609_p5), %s3851_s18, 64  }
 0x4f7   : > { %4794 = vsyncadd (!%p4609_p5), %s3851_s18, 4294967232  ;;  %s24_s14 = sadd.s32 1, %s4817_s14   ;;  %s6610_s20 = sld [smem:[#allocation12_spill]] }
 0x4f8   : > { %p21_p6 = scmp.ge.s32.totalorder %s24_s14, 4   ;;  %s6611_s11 = sld [smem:[#allocation16_spill]] }
 0x4f9   : > { %s6612_s12 = sld [smem:[#allocation13_spill]]  ;;  %s6613_s13 = sld [smem:[#allocation14_spill]] }
 0x4fa   : > { %s6614_s30 = smov %s4801_s10  ;;  %23 = sbr.rel (!%p21_p6) target bundleno = 6 (0x6), region = 108 }
 0x4fd   : > { %s6615_s10 = smov %s6610_s20 }
 0x501   :  { %3856 = vsyncpa [#allocation4], 1 }
 0x502   :  { %3858 = vsyncpa [#allocation4 + $0x1], 1 }
 0x503   :  { %3859 = vsyncpa [#allocation7], 1 }
 0x504   :  { %3860 = vsyncpa [#allocation5], 1 }
 0x505   :  { %3862 = vsyncpa [#allocation5 + $0x1], 1 }

</bundles_post_ra>
